<compile_context>
chip_gen: v7x
topology: tpu7x:2x2x1
jax: 0.10.0
libtpu: 0.0.40
codegen_flags: <defaults>
</compile_context>

<pallas_src>
import math
import functools

import jax
import jax.numpy as jnp
from jax.experimental import pallas as pl
from jax.experimental.pallas import tpu as pltpu

EPS = float(jnp.finfo(jnp.float32).eps)   # F.rms_norm default eps for f32 inputs
_VMEM_LIMIT = 48 * 1024 * 1024            # scoped-VMEM budget (fits v7x's 64 MiB)
_NEG_INF = -1e30


# ----------------------------- small helpers -----------------------------
def _round_up(v, m):
    return ((v + m - 1) // m) * m


def _pick_row_tile(m, cap):
    for c in (cap, 512, 256, 128, 64, 32, 16):
        if c <= cap and m % c == 0:
            return c
    raise ValueError(f"B*T ({m}) must be a multiple of 16")


def _pick_seq_tile(t):
    for c in (128, 256, 64, 32, 16, 8):
        if t % c == 0:
            return c
    raise ValueError(f"sequence length ({t}) must be a multiple of 8")


def _pick_vocab_tile(vp):
    for c in (512, 256, 128):
        if vp % c == 0:
            return c
    raise ValueError("padded vocab must be a multiple of 128")


# ----------------------------- qkv projection (rms + matmul + q/k rms+rope) ---------
def _qkv_kernel(x_ref, w_ref, b_ref, cos_ref, sin_ref, o_ref, *, nh, hd, C):
    d = hd // 2
    xv = x_ref[...].astype(jnp.float32)
    xb = (xv * jax.lax.rsqrt(jnp.mean(xv * xv, axis=-1, keepdims=True) + EPS)
          ).astype(jnp.bfloat16)
    acc = jnp.dot(xb, w_ref[...], preferred_element_type=jnp.float32) + b_ref[...]

    # v columns pass straight through
    o_ref[:, 2 * C:] = acc[:, 2 * C:].astype(o_ref.dtype)

    # q / k columns: per-head rms_norm + rotary.  Rotation angle depends on the HEAD
    # index (reference quirk), so cos/sin are tiny (nh, hd//2) tables.
    cos_all = cos_ref[...]
    sin_all = sin_ref[...]
    for h in range(nh):
        cos_h = cos_all[h:h + 1, :]
        sin_h = sin_all[h:h + 1, :]
        for base in (0, C):                       # base 0 -> q, base C -> k
            lo = base + h * hd
            z = acc[:, lo:lo + hd]
            z = z * jax.lax.rsqrt(jnp.mean(z * z, axis=-1, keepdims=True) + EPS)
            z1 = z[:, :d]
            z2 = z[:, d:]
            o_ref[:, lo:lo + d] = (z1 * cos_h + z2 * sin_h).astype(o_ref.dtype)
            o_ref[:, lo + d:lo + hd] = (z2 * cos_h - z1 * sin_h).astype(o_ref.dtype)


def qkv_project(x, w, b, cos_t, sin_t, nh, hd):
    M, C = x.shape
    N = w.shape[1]                                # 3C
    tm = _pick_row_tile(M, 256)
    kernel = functools.partial(_qkv_kernel, nh=nh, hd=hd, C=C)
    return pl.pallas_call(
        kernel,
        out_shape=jax.ShapeDtypeStruct((M, N), jnp.bfloat16),
        grid=(M // tm,),
        in_specs=[
            pl.BlockSpec((tm, C), lambda i: (i, 0)),
            pl.BlockSpec((C, N), lambda i: (0, 0)),       # weight VMEM-resident
            pl.BlockSpec((1, N), lambda i: (0, 0)),
            pl.BlockSpec(cos_t.shape, lambda i: (0, 0)),  # tiny rotary tables
            pl.BlockSpec(sin_t.shape, lambda i: (0, 0)),
        ],
        out_specs=pl.BlockSpec((tm, N), lambda i: (i, 0)),
        compiler_params=pltpu.CompilerParams(
            dimension_semantics=("parallel",),
            vmem_limit_bytes=_VMEM_LIMIT),
    )(x, w, b, cos_t, sin_t)


# ----------------------------- flash-style causal attention -----------------------------
def _attn_kernel(q_ref, k_ref, v_ref, o_ref, acc_scr, m_scr, l_scr,
                 *, nh, hd, tq, tkv, scale):
    qi = pl.program_id(1)
    ki = pl.program_id(2)
    nkv = pl.num_programs(2)

    @pl.when(ki == 0)
    def _init():
        m_scr[...] = jnp.full_like(m_scr, _NEG_INF)
        l_scr[...] = jnp.zeros_like(l_scr)
        acc_scr[...] = jnp.zeros_like(acc_scr)

    def _step(masked):
        if masked:
            row = jax.lax.broadcasted_iota(jnp.int32, (tq, tkv), 0)
            col = jax.lax.broadcasted_iota(jnp.int32, (tq, tkv), 1)
            causal = row >= col          # diagonal block: local indices suffice (tq == tkv)
        for h in range(nh):
            lo = h * hd
            qh = q_ref[0, :, lo:lo + hd]             # (tq, hd) bf16, already normed + rotated
            kh = k_ref[0, :, lo:lo + hd]             # (tkv, hd) bf16
            s = jax.lax.dot_general(qh, kh, (((1,), (1,)), ((), ())),
                                    preferred_element_type=jnp.float32) * scale
            if masked:
                s = jnp.where(causal, s, _NEG_INF)
            m_prev = m_scr[h]                        # (tq, 1)
            m_new = jnp.maximum(m_prev, jnp.max(s, axis=-1, keepdims=True))
            alpha = jnp.exp(m_prev - m_new)
            p = jnp.exp(s - m_new)
            l_scr[h] = alpha * l_scr[h] + jnp.sum(p, axis=-1, keepdims=True)
            m_scr[h] = m_new
            pv = jnp.dot(p.astype(jnp.bfloat16), v_ref[0, :, lo:lo + hd],
                         preferred_element_type=jnp.float32)
            acc_scr[:, lo:lo + hd] = alpha * acc_scr[:, lo:lo + hd] + pv

    @pl.when(ki < qi)       # fully-visible block: no mask work at all
    def _full():
        _step(masked=False)

    @pl.when(ki == qi)      # diagonal block: apply the causal mask
    def _diag():
        _step(masked=True)

    # blocks with ki > qi are fully masked and skipped entirely

    @pl.when(ki == nkv - 1)
    def _fin():
        for h in range(nh):
            lo = h * hd
            acc_scr[:, lo:lo + hd] = acc_scr[:, lo:lo + hd] * pl.reciprocal(
                l_scr[h], approx=True)
        o_ref[0] = acc_scr[...].astype(o_ref.dtype)   # single lane-dense store


def attention(qkvr, nh, hd):
    """Flash attention over the fused (B, T, 3C) qkv buffer (q/k already normed+rotated)."""
    B, T, C3 = qkvr.shape
    C = C3 // 3
    ts = _pick_seq_tile(T)
    tq = tkv = ts
    nq = T // tq
    scale = 1.0 / math.sqrt(hd)
    kernel = functools.partial(_attn_kernel, nh=nh, hd=hd, tq=tq, tkv=tkv, scale=scale)
    return pl.pallas_call(
        kernel,
        out_shape=jax.ShapeDtypeStruct((B, T, C), qkvr.dtype),
        grid=(B, nq, nq),
        in_specs=[
            pl.BlockSpec((1, tq, C), lambda b, i, j: (b, i, 0)),    # q columns
            pl.BlockSpec((1, tkv, C), lambda b, i, j: (b, j, 1)),   # k columns
            pl.BlockSpec((1, tkv, C), lambda b, i, j: (b, j, 2)),   # v columns
        ],
        out_specs=pl.BlockSpec((1, tq, C), lambda b, i, j: (b, i, 0)),
        scratch_shapes=[
            pltpu.VMEM((tq, C), jnp.float32),       # un-normalised output accumulator
            pltpu.VMEM((nh, tq, 1), jnp.float32),   # running max per head
            pltpu.VMEM((nh, tq, 1), jnp.float32),   # running softmax denom per head
        ],
        compiler_params=pltpu.CompilerParams(
            dimension_semantics=("parallel", "parallel", "arbitrary"),
            vmem_limit_bytes=_VMEM_LIMIT),
    )(qkvr, qkvr, qkvr)


# ----------------------------- attention output projection (+ residual) -----------------
def _proj_kernel(y_ref, w_ref, b_ref, res_ref, o_ref):
    acc = jnp.dot(y_ref[...].astype(jnp.bfloat16), w_ref[...],
                  preferred_element_type=jnp.float32)
    o_ref[...] = (acc + b_ref[...] + res_ref[...]).astype(o_ref.dtype)


def attn_out_proj(y, w, b, residual):
    M, C = y.shape
    N = w.shape[1]
    tm = _pick_row_tile(M, 256)
    return pl.pallas_call(
        _proj_kernel,
        out_shape=jax.ShapeDtypeStruct((M, N), jnp.float32),
        grid=(M // tm,),
        in_specs=[
            pl.BlockSpec((tm, C), lambda i: (i, 0)),
            pl.BlockSpec((C, N), lambda i: (0, 0)),       # weight VMEM-resident
            pl.BlockSpec((1, N), lambda i: (0, 0)),
            pl.BlockSpec((tm, N), lambda i: (i, 0)),      # residual stream (f32)
        ],
        out_specs=pl.BlockSpec((tm, N), lambda i: (i, 0)),
        compiler_params=pltpu.CompilerParams(
            dimension_semantics=("parallel",),
            vmem_limit_bytes=_VMEM_LIMIT),
    )(y, w, b, residual)


# ----------------------------- fused MLP (rms + fc + relu^2 + c_proj + residual) --------
def _mlp_kernel(x_ref, wfc_ref, bfc_ref, wcp_ref, bcp_ref, o_ref):
    xv = x_ref[...].astype(jnp.float32)
    xb = (xv * jax.lax.rsqrt(jnp.mean(xv * xv, axis=-1, keepdims=True) + EPS)
          ).astype(jnp.bfloat16)
    h = jnp.dot(xb, wfc_ref[...], preferred_element_type=jnp.float32) + bfc_ref[...]
    h = jnp.maximum(h, 0.0)
    hb = (h * h).astype(jnp.bfloat16)               # (tm, 4C) never leaves VMEM
    y = jnp.dot(hb, wcp_ref[...], preferred_element_type=jnp.float32) + bcp_ref[...]
    o_ref[...] = (xv + y).astype(o_ref.dtype)       # residual add fused


def fused_mlp(x, w_fc, b_fc, w_cproj, b_cproj):
    M, C = x.shape
    H = w_fc.shape[1]                               # 4C
    tm = _pick_row_tile(M, 256)
    return pl.pallas_call(
        _mlp_kernel,
        out_shape=jax.ShapeDtypeStruct((M, C), jnp.float32),
        grid=(M // tm,),
        in_specs=[
            pl.BlockSpec((tm, C), lambda i: (i, 0)),
            pl.BlockSpec((C, H), lambda i: (0, 0)),       # w_fc VMEM-resident
            pl.BlockSpec((1, H), lambda i: (0, 0)),
            pl.BlockSpec((H, C), lambda i: (0, 0)),       # w_cproj VMEM-resident
            pl.BlockSpec((1, C), lambda i: (0, 0)),
        ],
        out_specs=pl.BlockSpec((tm, C), lambda i: (i, 0)),
        compiler_params=pltpu.CompilerParams(
            dimension_semantics=("parallel",),
            vmem_limit_bytes=_VMEM_LIMIT),
    )(x, w_fc, b_fc, w_cproj, b_cproj)


# ----------------------------- tied lm_head (final rms fused, rms cached per row tile) ---
def _lm_head_kernel(x_ref, w_ref, o_ref, xn_scr):
    @pl.when(pl.program_id(1) == 0)
    def _():
        xv = x_ref[...].astype(jnp.float32)
        xn_scr[...] = (xv * jax.lax.rsqrt(jnp.mean(xv * xv, axis=-1, keepdims=True) + EPS)
                       ).astype(jnp.bfloat16)
    o_ref[...] = jnp.dot(xn_scr[...], w_ref[...],
                         preferred_element_type=jnp.float32).astype(o_ref.dtype)


def lm_head(x, w_t):
    M, C = x.shape
    Vp = w_t.shape[1]
    # tm=512 fits v7x's 64 MiB VMEM; on v5e/v6e it could be raised to 1024 and the weight
    # BlockSpec deepened to pipeline_mode=pl.Buffered(3) to hide the streaming DMA.
    tm = _pick_row_tile(M, 512)
    tn = _pick_vocab_tile(Vp)
    return pl.pallas_call(
        _lm_head_kernel,
        out_shape=jax.ShapeDtypeStruct((M, Vp), jnp.float32),
        grid=(M // tm, Vp // tn),
        in_specs=[
            pl.BlockSpec((tm, C), lambda i, j: (i, 0)),   # fetched once per row tile
            pl.BlockSpec((C, tn), lambda i, j: (0, j)),   # streamed vocab tiles
        ],
        out_specs=pl.BlockSpec((tm, tn), lambda i, j: (i, j)),
        scratch_shapes=[pltpu.VMEM((tm, C), jnp.bfloat16)],   # cached rms-normed x
        compiler_params=pltpu.CompilerParams(
            dimension_semantics=("parallel", "arbitrary"),
            vmem_limit_bytes=_VMEM_LIMIT),
    )(x, w_t)


# ----------------------------- parameter init (one-time bf16 cast / pad / transpose) ----
def init_params(key, vocab_size, n_layer, n_head, n_embd):
    C = n_embd
    V = vocab_size
    Vp = _round_up(V, 128)
    key, k_wte = jax.random.split(key)
    wte = 0.02 * jax.random.normal(k_wte, (V, C), jnp.float32)
    params = {
        "wte": wte,   # f32 table for the embedding gather
        # tied lm_head weight: padded to a lane multiple, pre-transposed, pre-cast ONCE
        "wte_t": jnp.pad(wte, ((0, Vp - V), (0, 0))).T.astype(jnp.bfloat16),  # (C, Vp)
    }
    blocks = []
    for _ in range(n_layer):
        key, k1, k2, k3, k4 = jax.random.split(key, 5)
        blocks.append(dict(
            w_attn=(0.02 * jax.random.normal(k1, (C, 3 * C), jnp.float32)).astype(jnp.bfloat16),
            b_attn=jnp.zeros((1, 3 * C), jnp.float32),
            w_proj=(0.02 * jax.random.normal(k2, (C, C), jnp.float32)).astype(jnp.bfloat16),
            b_proj=jnp.zeros((1, C), jnp.float32),
            w_fc=(0.02 * jax.random.normal(k3, (C, 4 * C), jnp.float32)).astype(jnp.bfloat16),
            b_fc=jnp.zeros((1, 4 * C), jnp.float32),
            w_cproj=(0.02 * jax.random.normal(k4, (4 * C, C), jnp.float32)).astype(jnp.bfloat16),
            b_cproj=jnp.zeros((1, C), jnp.float32),
        ))
    params["blocks"] = blocks
    return params


# ----------------------------- model forward -----------------------------
def gpt_forward(params, idx, targets, n_head):
    B, T = idx.shape
    wte = params["wte"]
    V, C = wte.shape
    nh = n_head
    hd = C // nh
    assert C % 128 == 0, "n_embd must be a multiple of 128 (lane-dense blocks)"
    assert hd % 2 == 0

    # token embedding (gather is XLA glue); residual stream kept in f32
    x = jnp.take(wte, idx, axis=0).reshape(B * T, C).astype(jnp.float32)

    # rotary tables -- reference quirk: rotary(q) sees (B, nh, T, hs), so seq_len == n_head
    # and angles depend on the HEAD index.  Only a tiny (nh, hd//2) table is needed.
    inv_freq = 1.0 / (10000.0 ** (jnp.arange(0, hd, 2, dtype=jnp.float32) / hd))
    t = jnp.arange(nh, dtype=jnp.float32)
    freqs = jnp.outer(t, inv_freq)                 # (nh, hd//2)
    cos_t = jnp.cos(freqs)
    sin_t = jnp.sin(freqs)

    for bp in params["blocks"]:
        # attention sub-block: rms fused into qkv prologue, q/k rms+rope into its epilogue
        qkvr = qkv_project(x, bp["w_attn"], bp["b_attn"], cos_t, sin_t, nh, hd)
        y = attention(qkvr.reshape(B, T, 3 * C), nh, hd)                # (B, T, C) bf16
        x = attn_out_proj(y.reshape(B * T, C), bp["w_proj"], bp["b_proj"], x)
        # MLP sub-block: single fused kernel, (tm, 4C) intermediate stays in VMEM
        x = fused_mlp(x, bp["w_fc"], bp["b_fc"], bp["w_cproj"], bp["b_cproj"])

    # final rms_norm fused into the tied lm_head matmul (pre-transposed bf16 weight)
    logits_p = lm_head(x, params["wte_t"])          # (B*T, Vp) f32
    Vp = logits_p.shape[1]

    # TODO(synk): a fully fused cross-entropy epilogue could avoid re-reading logits, but
    # the module contract returns full logits, so the loss is computed with XLA ops here.
    loss = None
    if targets is not None:
        if Vp > V:
            col_mask = (jnp.arange(Vp) < V)[None, :]
            lf_m = jnp.where(col_mask, logits_p, -jnp.inf)   # mask padded vocab columns
        else:
            lf_m = logits_p
        tf = targets.reshape(-1)
        lse = jax.scipy.special.logsumexp(lf_m, axis=-1)
        nll = lse - jnp.take_along_axis(logits_p, tf[:, None], axis=-1)[:, 0]
        loss = jnp.mean(nll)

    logits = (logits_p[:, :V] if Vp > V else logits_p).reshape(B, T, V)
    return logits, loss


# ----------------------------- demo -----------------------------
if __name__ == "__main__":
    # small config consistent with the module's forward (C must be a multiple of 128)
    vocab_size = 512
    n_layer = 2
    n_head = 2
    n_embd = 128
    B, T = 2, 16

    key = jax.random.PRNGKey(0)
    key, k_params, k_idx, k_tgt = jax.random.split(key, 4)
    params = init_params(k_params, vocab_size, n_layer, n_head, n_embd)
    idx = jax.random.randint(k_idx, (B, T), 0, vocab_size, dtype=jnp.int32)
    targets = jax.random.randint(k_tgt, (B, T), 0, vocab_size, dtype=jnp.int32)

    fwd = jax.jit(functools.partial(gpt_forward, n_head=n_head))
    logits, loss = fwd(params, idx, targets)
    jax.block_until_ready((logits, loss))

    assert logits.shape == (B, T, vocab_size)
    assert logits.dtype == jnp.float32
    assert bool(jnp.all(jnp.isfinite(logits)))
    assert bool(jnp.isfinite(loss))
    print("KERNEL_OK")
</pallas_src>

<mosaic_0001>
module attributes {stable_mosaic.version = 11 : i64} {
  func.func @_proj_kernel(%arg0: i32, %arg1: memref<32x128xbf16, #tpu.memory_space<vmem>>, %arg2: memref<128x128xbf16, #tpu.memory_space<vmem>>, %arg3: memref<1x128xf32, #tpu.memory_space<vmem>>, %arg4: memref<32x128xf32, #tpu.memory_space<vmem>>, %arg5: memref<32x128xf32, #tpu.memory_space<vmem>>) attributes {dimension_semantics = [#tpu.dimension_semantics<parallel>], iteration_bounds = array<i64: 1>, scalar_prefetch = 0 : i64, scratch_operands = 0 : i64, tpu.core_type = #tpu.core_type<tc>, window_params = [{transform_indices = @transform_0, window_bounds = array<i64: 32, 128>}, {pipeline_mode = #tpu.pipeline_mode<synchronous>, transform_indices = @transform_1, window_bounds = array<i64: 128, 128>}, {pipeline_mode = #tpu.pipeline_mode<synchronous>, transform_indices = @transform_2, window_bounds = array<i64: 1, 128>}, {transform_indices = @transform_3, window_bounds = array<i64: 32, 128>}, {transform_indices = @transform_4, window_bounds = array<i64: 32, 128>}]} {
    %c0 = arith.constant 0 : index
    %c0_0 = arith.constant 0 : index
    %0 = vector.load %arg1[%c0, %c0_0] : memref<32x128xbf16, #tpu.memory_space<vmem>>, vector<32x128xbf16>
    %c0_1 = arith.constant 0 : index
    %c0_2 = arith.constant 0 : index
    %1 = vector.load %arg2[%c0_1, %c0_2] : memref<128x128xbf16, #tpu.memory_space<vmem>>, vector<128x128xbf16>
    %cst = arith.constant dense<0.000000e+00> : vector<32x128xf32>
    %2 = tpu.matmul %0, %1, %cst {dimension_numbers = #tpu.dot_dimension_numbers<[1], [0], [0], [1], [0, 0, 1, 1], [], []>} : vector<32x128xbf16>, vector<128x128xbf16>, vector<32x128xf32> -> vector<32x128xf32>
    %c0_3 = arith.constant 0 : index
    %c0_4 = arith.constant 0 : index
    %3 = vector.load %arg3[%c0_3, %c0_4] : memref<1x128xf32, #tpu.memory_space<vmem>>, vector<1x128xf32>
    %4 = vector.broadcast %3 : vector<1x128xf32> to vector<32x128xf32>
    %5 = arith.addf %2, %4 : vector<32x128xf32>
    %c0_5 = arith.constant 0 : index
    %c0_6 = arith.constant 0 : index
    %6 = vector.load %arg4[%c0_5, %c0_6] : memref<32x128xf32, #tpu.memory_space<vmem>>, vector<32x128xf32>
    %7 = arith.addf %5, %6 : vector<32x128xf32>
    %c0_7 = arith.constant 0 : index
    %c0_8 = arith.constant 0 : index
    %8 = vector.load %arg5[%c0_7, %c0_8] : memref<32x128xf32, #tpu.memory_space<vmem>>, vector<32x128xf32>
    tpu.vector_store %arg5[%c0_7, %c0_8], %7 {strides = array<i32>} : memref<32x128xf32, #tpu.memory_space<vmem>>, vector<32x128xf32>,
    return
  }
  func.func @transform_0(%arg0: i32) -> (i32, i32) {
    %c0_i32 = arith.constant 0 : i32
    %c0_i32_0 = arith.constant 0 : i32
    return %arg0, %c0_i32 : i32, i32
  }
  func.func @transform_1(%arg0: i32) -> (i32, i32) {
    %c0_i32 = arith.constant 0 : i32
    %c0_i32_0 = arith.constant 0 : i32
    %c0_i32_1 = arith.constant 0 : i32
    return %c0_i32, %c0_i32_0 : i32, i32
  }
  func.func @transform_2(%arg0: i32) -> (i32, i32) {
    %c0_i32 = arith.constant 0 : i32
    %c0_i32_0 = arith.constant 0 : i32
    %c0_i32_1 = arith.constant 0 : i32
    return %c0_i32, %c0_i32_0 : i32, i32
  }
  func.func @transform_3(%arg0: i32) -> (i32, i32) {
    %c0_i32 = arith.constant 0 : i32
    %c0_i32_0 = arith.constant 0 : i32
    return %arg0, %c0_i32 : i32, i32
  }
  func.func @transform_4(%arg0: i32) -> (i32, i32) {
    %c0_i32 = arith.constant 0 : i32
    %c0_i32_0 = arith.constant 0 : i32
    return %arg0, %c0_i32 : i32, i32
  }
}

module attributes {stable_mosaic.version = 11 : i64} {
  func.func @_qkv_kernel(%arg0: i32, %arg1: memref<32x128xf32, #tpu.memory_space<vmem>>, %arg2: memref<128x384xbf16, #tpu.memory_space<vmem>>, %arg3: memref<1x384xf32, #tpu.memory_space<vmem>>, %arg4: memref<2x32xf32, #tpu.memory_space<vmem>>, %arg5: memref<2x32xf32, #tpu.memory_space<vmem>>, %arg6: memref<32x384xbf16, #tpu.memory_space<vmem>>) attributes {dimension_semantics = [#tpu.dimension_semantics<parallel>], iteration_bounds = array<i64: 1>, scalar_prefetch = 0 : i64, scratch_operands = 0 : i64, tpu.core_type = #tpu.core_type<tc>, window_params = [{transform_indices = @transform_0, window_bounds = array<i64: 32, 128>}, {pipeline_mode = #tpu.pipeline_mode<synchronous>, transform_indices = @transform_1, window_bounds = array<i64: 128, 384>}, {pipeline_mode = #tpu.pipeline_mode<synchronous>, transform_indices = @transform_2, window_bounds = array<i64: 1, 384>}, {pipeline_mode = #tpu.pipeline_mode<synchronous>, transform_indices = @transform_3, window_bounds = array<i64: 2, 32>}, {pipeline_mode = #tpu.pipeline_mode<synchronous>, transform_indices = @transform_4, window_bounds = array<i64: 2, 32>}, {transform_indices = @transform_5, window_bounds = array<i64: 32, 384>}]} {
    %c0 = arith.constant 0 : index
    %c0_0 = arith.constant 0 : index
    %0 = vector.load %arg1[%c0, %c0_0] : memref<32x128xf32, #tpu.memory_space<vmem>>, vector<32x128xf32>
    %1 = arith.mulf %0, %0 : vector<32x128xf32>
    %cst = arith.constant dense<0.000000e+00> : vector<32xf32>
    %2 = vector.multi_reduction <add>, %1, %cst [1] : vector<32x128xf32> to vector<32xf32>
    %3 = vector.shape_cast %2 : vector<32xf32> to vector<32x1xf32>
    %cst_1 = arith.constant 1.280000e+02 : f32
    %4 = vector.broadcast %cst_1 : f32 to vector<32x1xf32>
    %5 = arith.divf %3, %4 : vector<32x1xf32>
    %cst_2 = arith.constant 1.1920929E-7 : f32
    %6 = vector.broadcast %cst_2 : f32 to vector<32x1xf32>
    %7 = arith.addf %5, %6 : vector<32x1xf32>
    %8 = math.rsqrt %7 : vector<32x1xf32>
    %9 = vector.broadcast %8 : vector<32x1xf32> to vector<32x128xf32>
    %10 = arith.mulf %0, %9 : vector<32x128xf32>
    %11 = arith.truncf %10 : vector<32x128xf32> to vector<32x128xbf16>
    %c0_3 = arith.constant 0 : index
    %c0_4 = arith.constant 0 : index
    %12 = vector.load %arg2[%c0_3, %c0_4] : memref<128x384xbf16, #tpu.memory_space<vmem>>, vector<128x384xbf16>
    %cst_5 = arith.constant dense<0.000000e+00> : vector<32x384xf32>
    %13 = tpu.matmul %11, %12, %cst_5 {dimension_numbers = #tpu.dot_dimension_numbers<[1], [0], [0], [1], [0, 0, 1, 1], [], []>} : vector<32x128xbf16>, vector<128x384xbf16>, vector<32x384xf32> -> vector<32x384xf32>
    %c0_6 = arith.constant 0 : index
    %c0_7 = arith.constant 0 : index
    %14 = vector.load %arg3[%c0_6, %c0_7] : memref<1x384xf32, #tpu.memory_space<vmem>>, vector<1x384xf32>
    %15 = vector.broadcast %14 : vector<1x384xf32> to vector<32x384xf32>
    %16 = arith.addf %13, %15 : vector<32x384xf32>
    %17 = vector.extract_strided_slice %16 {offsets = [0, 256], sizes = [32, 128], strides = [1, 1]} : vector<32x384xf32> to vector<32x128xf32>
    %18 = arith.truncf %17 : vector<32x128xf32> to vector<32x128xbf16>
    %c0_8 = arith.constant 0 : index
    %c256 = arith.constant 256 : index
    %19 = vector.load %arg6[%c0_8, %c256] : memref<32x384xbf16, #tpu.memory_space<vmem>>, vector<32x128xbf16>
    tpu.vector_store %arg6[%c0_8, %c256], %18 {strides = array<i32>} : memref<32x384xbf16, #tpu.memory_space<vmem>>, vector<32x128xbf16>,
    %c0_9 = arith.constant 0 : index
    %c0_10 = arith.constant 0 : index
    %20 = vector.load %arg4[%c0_9, %c0_10] : memref<2x32xf32, #tpu.memory_space<vmem>>, vector<2x32xf32>
    %c0_11 = arith.constant 0 : index
    %c0_12 = arith.constant 0 : index
    %21 = vector.load %arg5[%c0_11, %c0_12] : memref<2x32xf32, #tpu.memory_space<vmem>>, vector<2x32xf32>
    %22 = vector.extract_strided_slice %20 {offsets = [0, 0], sizes = [1, 32], strides = [1, 1]} : vector<2x32xf32> to vector<1x32xf32>
    %23 = vector.extract_strided_slice %21 {offsets = [0, 0], sizes = [1, 32], strides = [1, 1]} : vector<2x32xf32> to vector<1x32xf32>
    %24 = vector.extract_strided_slice %16 {offsets = [0, 0], sizes = [32, 64], strides = [1, 1]} : vector<32x384xf32> to vector<32x64xf32>
    %25 = arith.mulf %24, %24 : vector<32x64xf32>
    %cst_13 = arith.constant dense<0.000000e+00> : vector<32xf32>
    %26 = vector.multi_reduction <add>, %25, %cst_13 [1] : vector<32x64xf32> to vector<32xf32>
    %27 = vector.shape_cast %26 : vector<32xf32> to vector<32x1xf32>
    %cst_14 = arith.constant 6.400000e+01 : f32
    %28 = vector.broadcast %cst_14 : f32 to vector<32x1xf32>
    %29 = arith.divf %27, %28 : vector<32x1xf32>
    %cst_15 = arith.constant 1.1920929E-7 : f32
    %30 = vector.broadcast %cst_15 : f32 to vector<32x1xf32>
    %31 = arith.addf %29, %30 : vector<32x1xf32>
    %32 = math.rsqrt %31 : vector<32x1xf32>
    %33 = vector.broadcast %32 : vector<32x1xf32> to vector<32x64xf32>
    %34 = arith.mulf %24, %33 : vector<32x64xf32>
    %35 = vector.extract_strided_slice %34 {offsets = [0, 0], sizes = [32, 32], strides = [1, 1]} : vector<32x64xf32> to vector<32x32xf32>
    %36 = vector.extract_strided_slice %34 {offsets = [0, 32], sizes = [32, 32], strides = [1, 1]} : vector<32x64xf32> to vector<32x32xf32>
    %37 = vector.broadcast %22 : vector<1x32xf32> to vector<32x32xf32>
    %38 = arith.mulf %35, %37 : vector<32x32xf32>
    %39 = vector.broadcast %23 : vector<1x32xf32> to vector<32x32xf32>
    %40 = arith.mulf %36, %39 : vector<32x32xf32>
    %41 = arith.addf %38, %40 : vector<32x32xf32>
    %42 = arith.truncf %41 : vector<32x32xf32> to vector<32x32xbf16>
    %c0_16 = arith.constant 0 : index
    %c0_17 = arith.constant 0 : index
    %43 = vector.load %arg6[%c0_16, %c0_17] : memref<32x384xbf16, #tpu.memory_space<vmem>>, vector<32x32xbf16>
    tpu.vector_store %arg6[%c0_16, %c0_17], %42 {strides = array<i32>} : memref<32x384xbf16, #tpu.memory_space<vmem>>, vector<32x32xbf16>,
    %44 = vector.broadcast %22 : vector<1x32xf32> to vector<32x32xf32>
    %45 = arith.mulf %36, %44 : vector<32x32xf32>
    %46 = vector.broadcast %23 : vector<1x32xf32> to vector<32x32xf32>
    %47 = arith.mulf %35, %46 : vector<32x32xf32>
    %48 = arith.subf %45, %47 : vector<32x32xf32>
    %49 = arith.truncf %48 : vector<32x32xf32> to vector<32x32xbf16>
    %c0_18 = arith.constant 0 : index
    %c32 = arith.constant 32 : index
    %50 = vector.load %arg6[%c0_18, %c32] : memref<32x384xbf16, #tpu.memory_space<vmem>>, vector<32x32xbf16>
    tpu.vector_store %arg6[%c0_18, %c32], %49 {strides = array<i32>} : memref<32x384xbf16, #tpu.memory_space<vmem>>, vector<32x32xbf16>,
    %51 = vector.extract_strided_slice %16 {offsets = [0, 128], sizes = [32, 64], strides = [1, 1]} : vector<32x384xf32> to vector<32x64xf32>
    %52 = arith.mulf %51, %51 : vector<32x64xf32>
    %cst_19 = arith.constant dense<0.000000e+00> : vector<32xf32>
    %53 = vector.multi_reduction <add>, %52, %cst_19 [1] : vector<32x64xf32> to vector<32xf32>
    %54 = vector.shape_cast %53 : vector<32xf32> to vector<32x1xf32>
    %cst_20 = arith.constant 6.400000e+01 : f32
    %55 = vector.broadcast %cst_20 : f32 to vector<32x1xf32>
    %56 = arith.divf %54, %55 : vector<32x1xf32>
    %cst_21 = arith.constant 1.1920929E-7 : f32
    %57 = vector.broadcast %cst_21 : f32 to vector<32x1xf32>
    %58 = arith.addf %56, %57 : vector<32x1xf32>
    %59 = math.rsqrt %58 : vector<32x1xf32>
    %60 = vector.broadcast %59 : vector<32x1xf32> to vector<32x64xf32>
    %61 = arith.mulf %51, %60 : vector<32x64xf32>
    %62 = vector.extract_strided_slice %61 {offsets = [0, 0], sizes = [32, 32], strides = [1, 1]} : vector<32x64xf32> to vector<32x32xf32>
    %63 = vector.extract_strided_slice %61 {offsets = [0, 32], sizes = [32, 32], strides = [1, 1]} : vector<32x64xf32> to vector<32x32xf32>
    %64 = vector.broadcast %22 : vector<1x32xf32> to vector<32x32xf32>
    %65 = arith.mulf %62, %64 : vector<32x32xf32>
    %66 = vector.broadcast %23 : vector<1x32xf32> to vector<32x32xf32>
    %67 = arith.mulf %63, %66 : vector<32x32xf32>
    %68 = arith.addf %65, %67 : vector<32x32xf32>
    %69 = arith.truncf %68 : vector<32x32xf32> to vector<32x32xbf16>
    %c0_22 = arith.constant 0 : index
    %c128 = arith.constant 128 : index
    %70 = vector.load %arg6[%c0_22, %c128] : memref<32x384xbf16, #tpu.memory_space<vmem>>, vector<32x32xbf16>
    tpu.vector_store %arg6[%c0_22, %c128], %69 {strides = array<i32>} : memref<32x384xbf16, #tpu.memory_space<vmem>>, vector<32x32xbf16>,
    %71 = vector.broadcast %22 : vector<1x32xf32> to vector<32x32xf32>
    %72 = arith.mulf %63, %71 : vector<32x32xf32>
    %73 = vector.broadcast %23 : vector<1x32xf32> to vector<32x32xf32>
    %74 = arith.mulf %62, %73 : vector<32x32xf32>
    %75 = arith.subf %72, %74 : vector<32x32xf32>
    %76 = arith.truncf %75 : vector<32x32xf32> to vector<32x32xbf16>
    %c0_23 = arith.constant 0 : index
    %c160 = arith.constant 160 : index
    %77 = vector.load %arg6[%c0_23, %c160] : memref<32x384xbf16, #tpu.memory_space<vmem>>, vector<32x32xbf16>
    tpu.vector_store %arg6[%c0_23, %c160], %76 {strides = array<i32>} : memref<32x384xbf16, #tpu.memory_space<vmem>>, vector<32x32xbf16>,
    %78 = vector.extract_strided_slice %20 {offsets = [1, 0], sizes = [1, 32], strides = [1, 1]} : vector<2x32xf32> to vector<1x32xf32>
    %79 = vector.extract_strided_slice %21 {offsets = [1, 0], sizes = [1, 32], strides = [1, 1]} : vector<2x32xf32> to vector<1x32xf32>
    %80 = vector.extract_strided_slice %16 {offsets = [0, 64], sizes = [32, 64], strides = [1, 1]} : vector<32x384xf32> to vector<32x64xf32>
    %81 = arith.mulf %80, %80 : vector<32x64xf32>
    %cst_24 = arith.constant dense<0.000000e+00> : vector<32xf32>
    %82 = vector.multi_reduction <add>, %81, %cst_24 [1] : vector<32x64xf32> to vector<32xf32>
    %83 = vector.shape_cast %82 : vector<32xf32> to vector<32x1xf32>
    %cst_25 = arith.constant 6.400000e+01 : f32
    %84 = vector.broadcast %cst_25 : f32 to vector<32x1xf32>
    %85 = arith.divf %83, %84 : vector<32x1xf32>
    %cst_26 = arith.constant 1.1920929E-7 : f32
    %86 = vector.broadcast %cst_26 : f32 to vector<32x1xf32>
    %87 = arith.addf %85, %86 : vector<32x1xf32>
    %88 = math.rsqrt %87 : vector<32x1xf32>
    %89 = vector.broadcast %88 : vector<32x1xf32> to vector<32x64xf32>
    %90 = arith.mulf %80, %89 : vector<32x64xf32>
    %91 = vector.extract_strided_slice %90 {offsets = [0, 0], sizes = [32, 32], strides = [1, 1]} : vector<32x64xf32> to vector<32x32xf32>
    %92 = vector.extract_strided_slice %90 {offsets = [0, 32], sizes = [32, 32], strides = [1, 1]} : vector<32x64xf32> to vector<32x32xf32>
    %93 = vector.broadcast %78 : vector<1x32xf32> to vector<32x32xf32>
    %94 = arith.mulf %91, %93 : vector<32x32xf32>
    %95 = vector.broadcast %79 : vector<1x32xf32> to vector<32x32xf32>
    %96 = arith.mulf %92, %95 : vector<32x32xf32>
    %97 = arith.addf %94, %96 : vector<32x32xf32>
    %98 = arith.truncf %97 : vector<32x32xf32> to vector<32x32xbf16>
    %c0_27 = arith.constant 0 : index
    %c64 = arith.constant 64 : index
    %99 = vector.load %arg6[%c0_27, %c64] : memref<32x384xbf16, #tpu.memory_space<vmem>>, vector<32x32xbf16>
    tpu.vector_store %arg6[%c0_27, %c64], %98 {strides = array<i32>} : memref<32x384xbf16, #tpu.memory_space<vmem>>, vector<32x32xbf16>,
    %100 = vector.broadcast %78 : vector<1x32xf32> to vector<32x32xf32>
    %101 = arith.mulf %92, %100 : vector<32x32xf32>
    %102 = vector.broadcast %79 : vector<1x32xf32> to vector<32x32xf32>
    %103 = arith.mulf %91, %102 : vector<32x32xf32>
    %104 = arith.subf %101, %103 : vector<32x32xf32>
    %105 = arith.truncf %104 : vector<32x32xf32> to vector<32x32xbf16>
    %c0_28 = arith.constant 0 : index
    %c96 = arith.constant 96 : index
    %106 = vector.load %arg6[%c0_28, %c96] : memref<32x384xbf16, #tpu.memory_space<vmem>>, vector<32x32xbf16>
    tpu.vector_store %arg6[%c0_28, %c96], %105 {strides = array<i32>} : memref<32x384xbf16, #tpu.memory_space<vmem>>, vector<32x32xbf16>,
    %107 = vector.extract_strided_slice %16 {offsets = [0, 192], sizes = [32, 64], strides = [1, 1]} : vector<32x384xf32> to vector<32x64xf32>
    %108 = arith.mulf %107, %107 : vector<32x64xf32>
    %cst_29 = arith.constant dense<0.000000e+00> : vector<32xf32>
    %109 = vector.multi_reduction <add>, %108, %cst_29 [1] : vector<32x64xf32> to vector<32xf32>
    %110 = vector.shape_cast %109 : vector<32xf32> to vector<32x1xf32>
    %cst_30 = arith.constant 6.400000e+01 : f32
    %111 = vector.broadcast %cst_30 : f32 to vector<32x1xf32>
    %112 = arith.divf %110, %111 : vector<32x1xf32>
    %cst_31 = arith.constant 1.1920929E-7 : f32
    %113 = vector.broadcast %cst_31 : f32 to vector<32x1xf32>
    %114 = arith.addf %112, %113 : vector<32x1xf32>
    %115 = math.rsqrt %114 : vector<32x1xf32>
    %116 = vector.broadcast %115 : vector<32x1xf32> to vector<32x64xf32>
    %117 = arith.mulf %107, %116 : vector<32x64xf32>
    %118 = vector.extract_strided_slice %117 {offsets = [0, 0], sizes = [32, 32], strides = [1, 1]} : vector<32x64xf32> to vector<32x32xf32>
    %119 = vector.extract_strided_slice %117 {offsets = [0, 32], sizes = [32, 32], strides = [1, 1]} : vector<32x64xf32> to vector<32x32xf32>
    %120 = vector.broadcast %78 : vector<1x32xf32> to vector<32x32xf32>
    %121 = arith.mulf %118, %120 : vector<32x32xf32>
    %122 = vector.broadcast %79 : vector<1x32xf32> to vector<32x32xf32>
    %123 = arith.mulf %119, %122 : vector<32x32xf32>
    %124 = arith.addf %121, %123 : vector<32x32xf32>
    %125 = arith.truncf %124 : vector<32x32xf32> to vector<32x32xbf16>
    %c0_32 = arith.constant 0 : index
    %c192 = arith.constant 192 : index
    %126 = vector.load %arg6[%c0_32, %c192] : memref<32x384xbf16, #tpu.memory_space<vmem>>, vector<32x32xbf16>
    tpu.vector_store %arg6[%c0_32, %c192], %125 {strides = array<i32>} : memref<32x384xbf16, #tpu.memory_space<vmem>>, vector<32x32xbf16>,
    %127 = vector.broadcast %78 : vector<1x32xf32> to vector<32x32xf32>
    %128 = arith.mulf %119, %127 : vector<32x32xf32>
    %129 = vector.broadcast %79 : vector<1x32xf32> to vector<32x32xf32>
    %130 = arith.mulf %118, %129 : vector<32x32xf32>
    %131 = arith.subf %128, %130 : vector<32x32xf32>
    %132 = arith.truncf %131 : vector<32x32xf32> to vector<32x32xbf16>
    %c0_33 = arith.constant 0 : index
    %c224 = arith.constant 224 : index
    %133 = vector.load %arg6[%c0_33, %c224] : memref<32x384xbf16, #tpu.memory_space<vmem>>, vector<32x32xbf16>
    tpu.vector_store %arg6[%c0_33, %c224], %132 {strides = array<i32>} : memref<32x384xbf16, #tpu.memory_space<vmem>>, vector<32x32xbf16>,
    return
  }
  func.func @transform_0(%arg0: i32) -> (i32, i32) {
    %c0_i32 = arith.constant 0 : i32
    %c0_i32_0 = arith.constant 0 : i32
    return %arg0, %c0_i32 : i32, i32
  }
  func.func @transform_1(%arg0: i32) -> (i32, i32) {
    %c0_i32 = arith.constant 0 : i32
    %c0_i32_0 = arith.constant 0 : i32
    %c0_i32_1 = arith.constant 0 : i32
    return %c0_i32, %c0_i32_0 : i32, i32
  }
  func.func @transform_2(%arg0: i32) -> (i32, i32) {
    %c0_i32 = arith.constant 0 : i32
    %c0_i32_0 = arith.constant 0 : i32
    %c0_i32_1 = arith.constant 0 : i32
    return %c0_i32, %c0_i32_0 : i32, i32
  }
  func.func @transform_3(%arg0: i32) -> (i32, i32) {
    %c0_i32 = arith.constant 0 : i32
    %c0_i32_0 = arith.constant 0 : i32
    %c0_i32_1 = arith.constant 0 : i32
    return %c0_i32, %c0_i32_0 : i32, i32
  }
  func.func @transform_4(%arg0: i32) -> (i32, i32) {
    %c0_i32 = arith.constant 0 : i32
    %c0_i32_0 = arith.constant 0 : i32
    %c0_i32_1 = arith.constant 0 : i32
    return %c0_i32, %c0_i32_0 : i32, i32
  }
  func.func @transform_5(%arg0: i32) -> (i32, i32) {
    %c0_i32 = arith.constant 0 : i32
    %c0_i32_0 = arith.constant 0 : i32
    return %arg0, %c0_i32 : i32, i32
  }
}

module attributes {stable_mosaic.version = 11 : i64} {
  func.func @_attn_kernel(%arg0: i32, %arg1: i32, %arg2: i32, %arg3: memref<1x16x128xbf16, #tpu.memory_space<vmem>>, %arg4: memref<1x16x128xbf16, #tpu.memory_space<vmem>>, %arg5: memref<1x16x128xbf16, #tpu.memory_space<vmem>>, %arg6: memref<1x16x128xbf16, #tpu.memory_space<vmem>>, %arg7: memref<16x128xf32, #tpu.memory_space<vmem>>, %arg8: memref<2x16x1xf32, #tpu.memory_space<vmem>>, %arg9: memref<2x16x1xf32, #tpu.memory_space<vmem>>) attributes {dimension_semantics = [#tpu.dimension_semantics<parallel>, #tpu.dimension_semantics<parallel>, #tpu.dimension_semantics<arbitrary>], iteration_bounds = array<i64: 2, 1, 1>, scalar_prefetch = 0 : i64, scratch_operands = 3 : i64, tpu.core_type = #tpu.core_type<tc>, window_params = [{transform_indices = @transform_0, window_bounds = array<i64: 1, 16, 128>}, {transform_indices = @transform_1, window_bounds = array<i64: 1, 16, 128>}, {transform_indices = @transform_2, window_bounds = array<i64: 1, 16, 128>}, {transform_indices = @transform_3, window_bounds = array<i64: 1, 16, 128>}]} {
    %c0_i32 = arith.constant 0 : i32
    %0 = arith.cmpi eq, %arg2, %c0_i32 : i32
    %1 = arith.extui %0 : i1 to i32
    %c0_i32_0 = arith.constant 0 : i32
    %2 = arith.cmpi ne, %1, %c0_i32_0 : i32
    scf.if %2 {
      %cst = arith.constant -1.000000e+30 : f32
      %12 = vector.broadcast %cst : f32 to vector<2x16x1xf32>
      %c0 = arith.constant 0 : index
      %c0_5 = arith.constant 0 : index
      %c0_6 = arith.constant 0 : index
      %13 = vector.load %arg8[%c0, %c0_5, %c0_6] : memref<2x16x1xf32, #tpu.memory_space<vmem>>, vector<2x16x1xf32>
      tpu.vector_store %arg8[%c0, %c0_5, %c0_6], %12 {strides = array<i32>} : memref<2x16x1xf32, #tpu.memory_space<vmem>>, vector<2x16x1xf32>,
      %cst_7 = arith.constant 0.000000e+00 : f32
      %14 = vector.broadcast %cst_7 : f32 to vector<2x16x1xf32>
      %c0_8 = arith.constant 0 : index
      %c0_9 = arith.constant 0 : index
      %c0_10 = arith.constant 0 : index
      %15 = vector.load %arg9[%c0_8, %c0_9, %c0_10] : memref<2x16x1xf32, #tpu.memory_space<vmem>>, vector<2x16x1xf32>
      tpu.vector_store %arg9[%c0_8, %c0_9, %c0_10], %14 {strides = array<i32>} : memref<2x16x1xf32, #tpu.memory_space<vmem>>, vector<2x16x1xf32>,
      %cst_11 = arith.constant 0.000000e+00 : f32
      %16 = vector.broadcast %cst_11 : f32 to vector<16x128xf32>
      %c0_12 = arith.constant 0 : index
      %c0_13 = arith.constant 0 : index
      %17 = vector.load %arg7[%c0_12, %c0_13] : memref<16x128xf32, #tpu.memory_space<vmem>>, vector<16x128xf32>
      tpu.vector_store %arg7[%c0_12, %c0_13], %16 {strides = array<i32>} : memref<16x128xf32, #tpu.memory_space<vmem>>, vector<16x128xf32>,
    } else {
    }
    %3 = arith.cmpi slt, %arg2, %arg1 : i32
    %4 = arith.extui %3 : i1 to i32
    %c0_i32_1 = arith.constant 0 : i32
    %5 = arith.cmpi ne, %4, %c0_i32_1 : i32
    scf.if %5 {
      %c0 = arith.constant 0 : index
      %c0_5 = arith.constant 0 : index
      %c0_6 = arith.constant 0 : index
      %12 = vector.load %arg3[%c0, %c0_5, %c0_6] : memref<1x16x128xbf16, #tpu.memory_space<vmem>>, vector<1x16x64xbf16>
      %13 = vector.shape_cast %12 : vector<1x16x64xbf16> to vector<16x64xbf16>
      %c0_7 = arith.constant 0 : index
      %c0_8 = arith.constant 0 : index
      %c0_9 = arith.constant 0 : index
      %14 = vector.load %arg4[%c0_7, %c0_8, %c0_9] : memref<1x16x128xbf16, #tpu.memory_space<vmem>>, vector<1x16x64xbf16>
      %15 = vector.shape_cast %14 : vector<1x16x64xbf16> to vector<16x64xbf16>
      %cst = arith.constant dense<0.000000e+00> : vector<16x16xf32>
      %16 = tpu.matmul %13, %15, %cst {dimension_numbers = #tpu.dot_dimension_numbers<[1], [1], [0], [0], [0, 0, 1, 0], [], []>} : vector<16x64xbf16>, vector<16x64xbf16>, vector<16x16xf32> -> vector<16x16xf32>
      %cst_10 = arith.constant 1.250000e-01 : f32
      %17 = vector.broadcast %cst_10 : f32 to vector<16x16xf32>
      %18 = arith.mulf %16, %17 : vector<16x16xf32>
      %c0_11 = arith.constant 0 : index
      %c0_12 = arith.constant 0 : index
      %c0_13 = arith.constant 0 : index
      %19 = vector.load %arg8[%c0_11, %c0_12, %c0_13] : memref<2x16x1xf32, #tpu.memory_space<vmem>>, vector<1x16x1xf32>
      %20 = vector.shape_cast %19 : vector<1x16x1xf32> to vector<16x1xf32>
      %cst_14 = arith.constant dense<0xFF800000> : vector<16xf32>
      %21 = vector.multi_reduction <maximumf>, %18, %cst_14 [1] : vector<16x16xf32> to vector<16xf32>
      %22 = vector.shape_cast %21 : vector<16xf32> to vector<16x1xf32>
      %23 = arith.maximumf %20, %22 : vector<16x1xf32>
      %24 = arith.subf %20, %23 : vector<16x1xf32>
      %25 = math.exp %24 : vector<16x1xf32>
      %26 = vector.broadcast %23 : vector<16x1xf32> to vector<16x16xf32>
      %27 = arith.subf %18, %26 : vector<16x16xf32>
      %28 = math.exp %27 : vector<16x16xf32>
      %c0_15 = arith.constant 0 : index
      %c0_16 = arith.constant 0 : index
      %c0_17 = arith.constant 0 : index
      %29 = vector.load %arg9[%c0_15, %c0_16, %c0_17] : memref<2x16x1xf32, #tpu.memory_space<vmem>>, vector<1x16x1xf32>
      %30 = vector.shape_cast %29 : vector<1x16x1xf32> to vector<16x1xf32>
      %31 = arith.mulf %25, %30 : vector<16x1xf32>
      %cst_18 = arith.constant dense<0.000000e+00> : vector<16xf32>
      %32 = vector.multi_reduction <add>, %28, %cst_18 [1] : vector<16x16xf32> to vector<16xf32>
      %33 = vector.shape_cast %32 : vector<16xf32> to vector<16x1xf32>
      %34 = arith.addf %31, %33 : vector<16x1xf32>
      %c0_19 = arith.constant 0 : index
      %c0_20 = arith.constant 0 : index
      %c0_21 = arith.constant 0 : index
      %35 = vector.load %arg9[%c0_19, %c0_20, %c0_21] : memref<2x16x1xf32, #tpu.memory_space<vmem>>, vector<1x16x1xf32>
      %36 = vector.shape_cast %35 : vector<1x16x1xf32> to vector<16x1xf32>
      %37 = vector.shape_cast %34 : vector<16x1xf32> to vector<1x16x1xf32>
      tpu.vector_store %arg9[%c0_19, %c0_20, %c0_21], %37 {strides = array<i32>} : memref<2x16x1xf32, #tpu.memory_space<vmem>>, vector<1x16x1xf32>,
      %c0_22 = arith.constant 0 : index
      %c0_23 = arith.constant 0 : index
      %c0_24 = arith.constant 0 : index
      %38 = vector.load %arg8[%c0_22, %c0_23, %c0_24] : memref<2x16x1xf32, #tpu.memory_space<vmem>>, vector<1x16x1xf32>
      %39 = vector.shape_cast %38 : vector<1x16x1xf32> to vector<16x1xf32>
      %40 = vector.shape_cast %23 : vector<16x1xf32> to vector<1x16x1xf32>
      tpu.vector_store %arg8[%c0_22, %c0_23, %c0_24], %40 {strides = array<i32>} : memref<2x16x1xf32, #tpu.memory_space<vmem>>, vector<1x16x1xf32>,
      %41 = arith.truncf %28 : vector<16x16xf32> to vector<16x16xbf16>
      %c0_25 = arith.constant 0 : index
      %c0_26 = arith.constant 0 : index
      %c0_27 = arith.constant 0 : index
      %42 = vector.load %arg5[%c0_25, %c0_26, %c0_27] : memref<1x16x128xbf16, #tpu.memory_space<vmem>>, vector<1x16x64xbf16>
      %43 = vector.shape_cast %42 : vector<1x16x64xbf16> to vector<16x64xbf16>
      %cst_28 = arith.constant dense<0.000000e+00> : vector<16x64xf32>
      %44 = tpu.matmul %41, %43, %cst_28 {dimension_numbers = #tpu.dot_dimension_numbers<[1], [0], [0], [1], [0, 0, 1, 1], [], []>} : vector<16x16xbf16>, vector<16x64xbf16>, vector<16x64xf32> -> vector<16x64xf32>
      %c0_29 = arith.constant 0 : index
      %c0_30 = arith.constant 0 : index
      %45 = vector.load %arg7[%c0_29, %c0_30] : memref<16x128xf32, #tpu.memory_space<vmem>>, vector<16x64xf32>
      %46 = vector.broadcast %25 : vector<16x1xf32> to vector<16x64xf32>
      %47 = arith.mulf %46, %45 : vector<16x64xf32>
      %48 = arith.addf %47, %44 : vector<16x64xf32>
      %c0_31 = arith.constant 0 : index
      %c0_32 = arith.constant 0 : index
      %49 = vector.load %arg7[%c0_31, %c0_32] : memref<16x128xf32, #tpu.memory_space<vmem>>, vector<16x64xf32>
      tpu.vector_store %arg7[%c0_31, %c0_32], %48 {strides = array<i32>} : memref<16x128xf32, #tpu.memory_space<vmem>>, vector<16x64xf32>,
      %c0_33 = arith.constant 0 : index
      %c0_34 = arith.constant 0 : index
      %c64 = arith.constant 64 : index
      %50 = vector.load %arg3[%c0_33, %c0_34, %c64] : memref<1x16x128xbf16, #tpu.memory_space<vmem>>, vector<1x16x64xbf16>
      %51 = vector.shape_cast %50 : vector<1x16x64xbf16> to vector<16x64xbf16>
      %c0_35 = arith.constant 0 : index
      %c0_36 = arith.constant 0 : index
      %c64_37 = arith.constant 64 : index
      %52 = vector.load %arg4[%c0_35, %c0_36, %c64_37] : memref<1x16x128xbf16, #tpu.memory_space<vmem>>, vector<1x16x64xbf16>
      %53 = vector.shape_cast %52 : vector<1x16x64xbf16> to vector<16x64xbf16>
      %cst_38 = arith.constant dense<0.000000e+00> : vector<16x16xf32>
      %54 = tpu.matmul %51, %53, %cst_38 {dimension_numbers = #tpu.dot_dimension_numbers<[1], [1], [0], [0], [0, 0, 1, 0], [], []>} : vector<16x64xbf16>, vector<16x64xbf16>, vector<16x16xf32> -> vector<16x16xf32>
      %cst_39 = arith.constant 1.250000e-01 : f32
      %55 = vector.broadcast %cst_39 : f32 to vector<16x16xf32>
      %56 = arith.mulf %54, %55 : vector<16x16xf32>
      %c1 = arith.constant 1 : index
      %c0_40 = arith.constant 0 : index
      %c0_41 = arith.constant 0 : index
      %57 = vector.load %arg8[%c1, %c0_40, %c0_41] : memref<2x16x1xf32, #tpu.memory_space<vmem>>, vector<1x16x1xf32>
      %58 = vector.shape_cast %57 : vector<1x16x1xf32> to vector<16x1xf32>
      %cst_42 = arith.constant dense<0xFF800000> : vector<16xf32>
      %59 = vector.multi_reduction <maximumf>, %56, %cst_42 [1] : vector<16x16xf32> to vector<16xf32>
      %60 = vector.shape_cast %59 : vector<16xf32> to vector<16x1xf32>
      %61 = arith.maximumf %58, %60 : vector<16x1xf32>
      %62 = arith.subf %58, %61 : vector<16x1xf32>
      %63 = math.exp %62 : vector<16x1xf32>
      %64 = vector.broadcast %61 : vector<16x1xf32> to vector<16x16xf32>
      %65 = arith.subf %56, %64 : vector<16x16xf32>
      %66 = math.exp %65 : vector<16x16xf32>
      %c1_43 = arith.constant 1 : index
      %c0_44 = arith.constant 0 : index
      %c0_45 = arith.constant 0 : index
      %67 = vector.load %arg9[%c1_43, %c0_44, %c0_45] : memref<2x16x1xf32, #tpu.memory_space<vmem>>, vector<1x16x1xf32>
      %68 = vector.shape_cast %67 : vector<1x16x1xf32> to vector<16x1xf32>
      %69 = arith.mulf %63, %68 : vector<16x1xf32>
      %cst_46 = arith.constant dense<0.000000e+00> : vector<16xf32>
      %70 = vector.multi_reduction <add>, %66, %cst_46 [1] : vector<16x16xf32> to vector<16xf32>
      %71 = vector.shape_cast %70 : vector<16xf32> to vector<16x1xf32>
      %72 = arith.addf %69, %71 : vector<16x1xf32>
      %c1_47 = arith.constant 1 : index
      %c0_48 = arith.constant 0 : index
      %c0_49 = arith.constant 0 : index
      %73 = vector.load %arg9[%c1_47, %c0_48, %c0_49] : memref<2x16x1xf32, #tpu.memory_space<vmem>>, vector<1x16x1xf32>
      %74 = vector.shape_cast %73 : vector<1x16x1xf32> to vector<16x1xf32>
      %75 = vector.shape_cast %72 : vector<16x1xf32> to vector<1x16x1xf32>
      tpu.vector_store %arg9[%c1_47, %c0_48, %c0_49], %75 {strides = array<i32>} : memref<2x16x1xf32, #tpu.memory_space<vmem>>, vector<1x16x1xf32>,
      %c1_50 = arith.constant 1 : index
      %c0_51 = arith.constant 0 : index
      %c0_52 = arith.constant 0 : index
      %76 = vector.load %arg8[%c1_50, %c0_51, %c0_52] : memref<2x16x1xf32, #tpu.memory_space<vmem>>, vector<1x16x1xf32>
      %77 = vector.shape_cast %76 : vector<1x16x1xf32> to vector<16x1xf32>
      %78 = vector.shape_cast %61 : vector<16x1xf32> to vector<1x16x1xf32>
      tpu.vector_store %arg8[%c1_50, %c0_51, %c0_52], %78 {strides = array<i32>} : memref<2x16x1xf32, #tpu.memory_space<vmem>>, vector<1x16x1xf32>,
      %79 = arith.truncf %66 : vector<16x16xf32> to vector<16x16xbf16>
      %c0_53 = arith.constant 0 : index
      %c0_54 = arith.constant 0 : index
      %c64_55 = arith.constant 64 : index
      %80 = vector.load %arg5[%c0_53, %c0_54, %c64_55] : memref<1x16x128xbf16, #tpu.memory_space<vmem>>, vector<1x16x64xbf16>
      %81 = vector.shape_cast %80 : vector<1x16x64xbf16> to vector<16x64xbf16>
      %cst_56 = arith.constant dense<0.000000e+00> : vector<16x64xf32>
      %82 = tpu.matmul %79, %81, %cst_56 {dimension_numbers = #tpu.dot_dimension_numbers<[1], [0], [0], [1], [0, 0, 1, 1], [], []>} : vector<16x16xbf16>, vector<16x64xbf16>, vector<16x64xf32> -> vector<16x64xf32>
      %c0_57 = arith.constant 0 : index
      %c64_58 = arith.constant 64 : index
      %83 = vector.load %arg7[%c0_57, %c64_58] : memref<16x128xf32, #tpu.memory_space<vmem>>, vector<16x64xf32>
      %84 = vector.broadcast %63 : vector<16x1xf32> to vector<16x64xf32>
      %85 = arith.mulf %84, %83 : vector<16x64xf32>
      %86 = arith.addf %85, %82 : vector<16x64xf32>
      %c0_59 = arith.constant 0 : index
      %c64_60 = arith.constant 64 : index
      %87 = vector.load %arg7[%c0_59, %c64_60] : memref<16x128xf32, #tpu.memory_space<vmem>>, vector<16x64xf32>
      tpu.vector_store %arg7[%c0_59, %c64_60], %86 {strides = array<i32>} : memref<16x128xf32, #tpu.memory_space<vmem>>, vector<16x64xf32>,
    } else {
    }
    %6 = arith.cmpi eq, %arg2, %arg1 : i32
    %7 = arith.extui %6 : i1 to i32
    %c0_i32_2 = arith.constant 0 : i32
    %8 = arith.cmpi ne, %7, %c0_i32_2 : i32
    scf.if %8 {
      %12 = tpu.iota {dimensions = array<i32: 0>} : vector<16x16xi32>
      %13 = tpu.iota {dimensions = array<i32: 1>} : vector<16x16xi32>
      %14 = arith.cmpi sge, %12, %13 : vector<16x16xi32>
      %c0 = arith.constant 0 : index
      %c0_5 = arith.constant 0 : index
      %c0_6 = arith.constant 0 : index
      %15 = vector.load %arg3[%c0, %c0_5, %c0_6] : memref<1x16x128xbf16, #tpu.memory_space<vmem>>, vector<1x16x64xbf16>
      %16 = vector.shape_cast %15 : vector<1x16x64xbf16> to vector<16x64xbf16>
      %c0_7 = arith.constant 0 : index
      %c0_8 = arith.constant 0 : index
      %c0_9 = arith.constant 0 : index
      %17 = vector.load %arg4[%c0_7, %c0_8, %c0_9] : memref<1x16x128xbf16, #tpu.memory_space<vmem>>, vector<1x16x64xbf16>
      %18 = vector.shape_cast %17 : vector<1x16x64xbf16> to vector<16x64xbf16>
      %cst = arith.constant dense<0.000000e+00> : vector<16x16xf32>
      %19 = tpu.matmul %16, %18, %cst {dimension_numbers = #tpu.dot_dimension_numbers<[1], [1], [0], [0], [0, 0, 1, 0], [], []>} : vector<16x64xbf16>, vector<16x64xbf16>, vector<16x16xf32> -> vector<16x16xf32>
      %cst_10 = arith.constant 1.250000e-01 : f32
      %20 = vector.broadcast %cst_10 : f32 to vector<16x16xf32>
      %21 = arith.mulf %19, %20 : vector<16x16xf32>
      %cst_11 = arith.constant -1.000000e+30 : f32
      %22 = vector.broadcast %cst_11 : f32 to vector<16x16xf32>
      %23 = arith.select %14, %21, %22 : vector<16x16xi1>, vector<16x16xf32>
      %c0_12 = arith.constant 0 : index
      %c0_13 = arith.constant 0 : index
      %c0_14 = arith.constant 0 : index
      %24 = vector.load %arg8[%c0_12, %c0_13, %c0_14] : memref<2x16x1xf32, #tpu.memory_space<vmem>>, vector<1x16x1xf32>
      %25 = vector.shape_cast %24 : vector<1x16x1xf32> to vector<16x1xf32>
      %cst_15 = arith.constant dense<0xFF800000> : vector<16xf32>
      %26 = vector.multi_reduction <maximumf>, %23, %cst_15 [1] : vector<16x16xf32> to vector<16xf32>
      %27 = vector.shape_cast %26 : vector<16xf32> to vector<16x1xf32>
      %28 = arith.maximumf %25, %27 : vector<16x1xf32>
      %29 = arith.subf %25, %28 : vector<16x1xf32>
      %30 = math.exp %29 : vector<16x1xf32>
      %31 = vector.broadcast %28 : vector<16x1xf32> to vector<16x16xf32>
      %32 = arith.subf %23, %31 : vector<16x16xf32>
      %33 = math.exp %32 : vector<16x16xf32>
      %c0_16 = arith.constant 0 : index
      %c0_17 = arith.constant 0 : index
      %c0_18 = arith.constant 0 : index
      %34 = vector.load %arg9[%c0_16, %c0_17, %c0_18] : memref<2x16x1xf32, #tpu.memory_space<vmem>>, vector<1x16x1xf32>
      %35 = vector.shape_cast %34 : vector<1x16x1xf32> to vector<16x1xf32>
      %36 = arith.mulf %30, %35 : vector<16x1xf32>
      %cst_19 = arith.constant dense<0.000000e+00> : vector<16xf32>
      %37 = vector.multi_reduction <add>, %33, %cst_19 [1] : vector<16x16xf32> to vector<16xf32>
      %38 = vector.shape_cast %37 : vector<16xf32> to vector<16x1xf32>
      %39 = arith.addf %36, %38 : vector<16x1xf32>
      %c0_20 = arith.constant 0 : index
      %c0_21 = arith.constant 0 : index
      %c0_22 = arith.constant 0 : index
      %40 = vector.load %arg9[%c0_20, %c0_21, %c0_22] : memref<2x16x1xf32, #tpu.memory_space<vmem>>, vector<1x16x1xf32>
      %41 = vector.shape_cast %40 : vector<1x16x1xf32> to vector<16x1xf32>
      %42 = vector.shape_cast %39 : vector<16x1xf32> to vector<1x16x1xf32>
      tpu.vector_store %arg9[%c0_20, %c0_21, %c0_22], %42 {strides = array<i32>} : memref<2x16x1xf32, #tpu.memory_space<vmem>>, vector<1x16x1xf32>,
      %c0_23 = arith.constant 0 : index
      %c0_24 = arith.constant 0 : index
      %c0_25 = arith.constant 0 : index
      %43 = vector.load %arg8[%c0_23, %c0_24, %c0_25] : memref<2x16x1xf32, #tpu.memory_space<vmem>>, vector<1x16x1xf32>
      %44 = vector.shape_cast %43 : vector<1x16x1xf32> to vector<16x1xf32>
      %45 = vector.shape_cast %28 : vector<16x1xf32> to vector<1x16x1xf32>
      tpu.vector_store %arg8[%c0_23, %c0_24, %c0_25], %45 {strides = array<i32>} : memref<2x16x1xf32, #tpu.memory_space<vmem>>, vector<1x16x1xf32>,
      %46 = arith.truncf %33 : vector<16x16xf32> to vector<16x16xbf16>
      %c0_26 = arith.constant 0 : index
      %c0_27 = arith.constant 0 : index
      %c0_28 = arith.constant 0 : index
      %47 = vector.load %arg5[%c0_26, %c0_27, %c0_28] : memref<1x16x128xbf16, #tpu.memory_space<vmem>>, vector<1x16x64xbf16>
      %48 = vector.shape_cast %47 : vector<1x16x64xbf16> to vector<16x64xbf16>
      %cst_29 = arith.constant dense<0.000000e+00> : vector<16x64xf32>
      %49 = tpu.matmul %46, %48, %cst_29 {dimension_numbers = #tpu.dot_dimension_numbers<[1], [0], [0], [1], [0, 0, 1, 1], [], []>} : vector<16x16xbf16>, vector<16x64xbf16>, vector<16x64xf32> -> vector<16x64xf32>
      %c0_30 = arith.constant 0 : index
      %c0_31 = arith.constant 0 : index
      %50 = vector.load %arg7[%c0_30, %c0_31] : memref<16x128xf32, #tpu.memory_space<vmem>>, vector<16x64xf32>
      %51 = vector.broadcast %30 : vector<16x1xf32> to vector<16x64xf32>
      %52 = arith.mulf %51, %50 : vector<16x64xf32>
      %53 = arith.addf %52, %49 : vector<16x64xf32>
      %c0_32 = arith.constant 0 : index
      %c0_33 = arith.constant 0 : index
      %54 = vector.load %arg7[%c0_32, %c0_33] : memref<16x128xf32, #tpu.memory_space<vmem>>, vector<16x64xf32>
      tpu.vector_store %arg7[%c0_32, %c0_33], %53 {strides = array<i32>} : memref<16x128xf32, #tpu.memory_space<vmem>>, vector<16x64xf32>,
      %c0_34 = arith.constant 0 : index
      %c0_35 = arith.constant 0 : index
      %c64 = arith.constant 64 : index
      %55 = vector.load %arg3[%c0_34, %c0_35, %c64] : memref<1x16x128xbf16, #tpu.memory_space<vmem>>, vector<1x16x64xbf16>
      %56 = vector.shape_cast %55 : vector<1x16x64xbf16> to vector<16x64xbf16>
      %c0_36 = arith.constant 0 : index
      %c0_37 = arith.constant 0 : index
      %c64_38 = arith.constant 64 : index
      %57 = vector.load %arg4[%c0_36, %c0_37, %c64_38] : memref<1x16x128xbf16, #tpu.memory_space<vmem>>, vector<1x16x64xbf16>
      %58 = vector.shape_cast %57 : vector<1x16x64xbf16> to vector<16x64xbf16>
      %cst_39 = arith.constant dense<0.000000e+00> : vector<16x16xf32>
      %59 = tpu.matmul %56, %58, %cst_39 {dimension_numbers = #tpu.dot_dimension_numbers<[1], [1], [0], [0], [0, 0, 1, 0], [], []>} : vector<16x64xbf16>, vector<16x64xbf16>, vector<16x16xf32> -> vector<16x16xf32>
      %cst_40 = arith.constant 1.250000e-01 : f32
      %60 = vector.broadcast %cst_40 : f32 to vector<16x16xf32>
      %61 = arith.mulf %59, %60 : vector<16x16xf32>
      %cst_41 = arith.constant -1.000000e+30 : f32
      %62 = vector.broadcast %cst_41 : f32 to vector<16x16xf32>
      %63 = arith.select %14, %61, %62 : vector<16x16xi1>, vector<16x16xf32>
      %c1 = arith.constant 1 : index
      %c0_42 = arith.constant 0 : index
      %c0_43 = arith.constant 0 : index
      %64 = vector.load %arg8[%c1, %c0_42, %c0_43] : memref<2x16x1xf32, #tpu.memory_space<vmem>>, vector<1x16x1xf32>
      %65 = vector.shape_cast %64 : vector<1x16x1xf32> to vector<16x1xf32>
      %cst_44 = arith.constant dense<0xFF800000> : vector<16xf32>
      %66 = vector.multi_reduction <maximumf>, %63, %cst_44 [1] : vector<16x16xf32> to vector<16xf32>
      %67 = vector.shape_cast %66 : vector<16xf32> to vector<16x1xf32>
      %68 = arith.maximumf %65, %67 : vector<16x1xf32>
      %69 = arith.subf %65, %68 : vector<16x1xf32>
      %70 = math.exp %69 : vector<16x1xf32>
      %71 = vector.broadcast %68 : vector<16x1xf32> to vector<16x16xf32>
      %72 = arith.subf %63, %71 : vector<16x16xf32>
      %73 = math.exp %72 : vector<16x16xf32>
      %c1_45 = arith.constant 1 : index
      %c0_46 = arith.constant 0 : index
      %c0_47 = arith.constant 0 : index
      %74 = vector.load %arg9[%c1_45, %c0_46, %c0_47] : memref<2x16x1xf32, #tpu.memory_space<vmem>>, vector<1x16x1xf32>
      %75 = vector.shape_cast %74 : vector<1x16x1xf32> to vector<16x1xf32>
      %76 = arith.mulf %70, %75 : vector<16x1xf32>
      %cst_48 = arith.constant dense<0.000000e+00> : vector<16xf32>
      %77 = vector.multi_reduction <add>, %73, %cst_48 [1] : vector<16x16xf32> to vector<16xf32>
      %78 = vector.shape_cast %77 : vector<16xf32> to vector<16x1xf32>
      %79 = arith.addf %76, %78 : vector<16x1xf32>
      %c1_49 = arith.constant 1 : index
      %c0_50 = arith.constant 0 : index
      %c0_51 = arith.constant 0 : index
      %80 = vector.load %arg9[%c1_49, %c0_50, %c0_51] : memref<2x16x1xf32, #tpu.memory_space<vmem>>, vector<1x16x1xf32>
      %81 = vector.shape_cast %80 : vector<1x16x1xf32> to vector<16x1xf32>
      %82 = vector.shape_cast %79 : vector<16x1xf32> to vector<1x16x1xf32>
      tpu.vector_store %arg9[%c1_49, %c0_50, %c0_51], %82 {strides = array<i32>} : memref<2x16x1xf32, #tpu.memory_space<vmem>>, vector<1x16x1xf32>,
      %c1_52 = arith.constant 1 : index
      %c0_53 = arith.constant 0 : index
      %c0_54 = arith.constant 0 : index
      %83 = vector.load %arg8[%c1_52, %c0_53, %c0_54] : memref<2x16x1xf32, #tpu.memory_space<vmem>>, vector<1x16x1xf32>
      %84 = vector.shape_cast %83 : vector<1x16x1xf32> to vector<16x1xf32>
      %85 = vector.shape_cast %68 : vector<16x1xf32> to vector<1x16x1xf32>
      tpu.vector_store %arg8[%c1_52, %c0_53, %c0_54], %85 {strides = array<i32>} : memref<2x16x1xf32, #tpu.memory_space<vmem>>, vector<1x16x1xf32>,
      %86 = arith.truncf %73 : vector<16x16xf32> to vector<16x16xbf16>
      %c0_55 = arith.constant 0 : index
      %c0_56 = arith.constant 0 : index
      %c64_57 = arith.constant 64 : index
      %87 = vector.load %arg5[%c0_55, %c0_56, %c64_57] : memref<1x16x128xbf16, #tpu.memory_space<vmem>>, vector<1x16x64xbf16>
      %88 = vector.shape_cast %87 : vector<1x16x64xbf16> to vector<16x64xbf16>
      %cst_58 = arith.constant dense<0.000000e+00> : vector<16x64xf32>
      %89 = tpu.matmul %86, %88, %cst_58 {dimension_numbers = #tpu.dot_dimension_numbers<[1], [0], [0], [1], [0, 0, 1, 1], [], []>} : vector<16x16xbf16>, vector<16x64xbf16>, vector<16x64xf32> -> vector<16x64xf32>
      %c0_59 = arith.constant 0 : index
      %c64_60 = arith.constant 64 : index
      %90 = vector.load %arg7[%c0_59, %c64_60] : memref<16x128xf32, #tpu.memory_space<vmem>>, vector<16x64xf32>
      %91 = vector.broadcast %70 : vector<16x1xf32> to vector<16x64xf32>
      %92 = arith.mulf %91, %90 : vector<16x64xf32>
      %93 = arith.addf %92, %89 : vector<16x64xf32>
      %c0_61 = arith.constant 0 : index
      %c64_62 = arith.constant 64 : index
      %94 = vector.load %arg7[%c0_61, %c64_62] : memref<16x128xf32, #tpu.memory_space<vmem>>, vector<16x64xf32>
      tpu.vector_store %arg7[%c0_61, %c64_62], %93 {strides = array<i32>} : memref<16x128xf32, #tpu.memory_space<vmem>>, vector<16x64xf32>,
    } else {
    }
    %c0_i32_3 = arith.constant 0 : i32
    %9 = arith.cmpi eq, %arg2, %c0_i32_3 : i32
    %10 = arith.extui %9 : i1 to i32
    %c0_i32_4 = arith.constant 0 : i32
    %11 = arith.cmpi ne, %10, %c0_i32_4 : i32
    scf.if %11 {
      %c0 = arith.constant 0 : index
      %c0_5 = arith.constant 0 : index
      %12 = vector.load %arg7[%c0, %c0_5] : memref<16x128xf32, #tpu.memory_space<vmem>>, vector<16x64xf32>
      %c0_6 = arith.constant 0 : index
      %c0_7 = arith.constant 0 : index
      %c0_8 = arith.constant 0 : index
      %13 = vector.load %arg9[%c0_6, %c0_7, %c0_8] : memref<2x16x1xf32, #tpu.memory_space<vmem>>, vector<1x16x1xf32>
      %14 = vector.shape_cast %13 : vector<1x16x1xf32> to vector<16x1xf32>
      %15 = tpu.reciprocal %14 {approx = true} : vector<16x1xf32> -> vector<16x1xf32>
      %16 = vector.broadcast %15 : vector<16x1xf32> to vector<16x64xf32>
      %17 = arith.mulf %12, %16 : vector<16x64xf32>
      %c0_9 = arith.constant 0 : index
      %c0_10 = arith.constant 0 : index
      %18 = vector.load %arg7[%c0_9, %c0_10] : memref<16x128xf32, #tpu.memory_space<vmem>>, vector<16x64xf32>
      tpu.vector_store %arg7[%c0_9, %c0_10], %17 {strides = array<i32>} : memref<16x128xf32, #tpu.memory_space<vmem>>, vector<16x64xf32>,
      %c0_11 = arith.constant 0 : index
      %c64 = arith.constant 64 : index
      %19 = vector.load %arg7[%c0_11, %c64] : memref<16x128xf32, #tpu.memory_space<vmem>>, vector<16x64xf32>
      %c1 = arith.constant 1 : index
      %c0_12 = arith.constant 0 : index
      %c0_13 = arith.constant 0 : index
      %20 = vector.load %arg9[%c1, %c0_12, %c0_13] : memref<2x16x1xf32, #tpu.memory_space<vmem>>, vector<1x16x1xf32>
      %21 = vector.shape_cast %20 : vector<1x16x1xf32> to vector<16x1xf32>
      %22 = tpu.reciprocal %21 {approx = true} : vector<16x1xf32> -> vector<16x1xf32>
      %23 = vector.broadcast %22 : vector<16x1xf32> to vector<16x64xf32>
      %24 = arith.mulf %19, %23 : vector<16x64xf32>
      %c0_14 = arith.constant 0 : index
      %c64_15 = arith.constant 64 : index
      %25 = vector.load %arg7[%c0_14, %c64_15] : memref<16x128xf32, #tpu.memory_space<vmem>>, vector<16x64xf32>
      tpu.vector_store %arg7[%c0_14, %c64_15], %24 {strides = array<i32>} : memref<16x128xf32, #tpu.memory_space<vmem>>, vector<16x64xf32>,
      %c0_16 = arith.constant 0 : index
      %c0_17 = arith.constant 0 : index
      %26 = vector.load %arg7[%c0_16, %c0_17] : memref<16x128xf32, #tpu.memory_space<vmem>>, vector<16x128xf32>
      %27 = arith.truncf %26 : vector<16x128xf32> to vector<16x128xbf16>
      %c0_18 = arith.constant 0 : index
      %c0_19 = arith.constant 0 : index
      %c0_20 = arith.constant 0 : index
      %28 = vector.load %arg6[%c0_18, %c0_19, %c0_20] : memref<1x16x128xbf16, #tpu.memory_space<vmem>>, vector<1x16x128xbf16>
      %29 = vector.shape_cast %28 : vector<1x16x128xbf16> to vector<16x128xbf16>
      %30 = vector.shape_cast %27 : vector<16x128xbf16> to vector<1x16x128xbf16>
      tpu.vector_store %arg6[%c0_18, %c0_19, %c0_20], %30 {strides = array<i32>} : memref<1x16x128xbf16, #tpu.memory_space<vmem>>, vector<1x16x128xbf16>,
    } else {
    }
    return
  }
  func.func @transform_0(%arg0: i32, %arg1: i32, %arg2: i32) -> (i32, i32, i32) {
    %c0_i32 = arith.constant 0 : i32
    %c0_i32_0 = arith.constant 0 : i32
    return %arg0, %arg1, %c0_i32 : i32, i32, i32
  }
  func.func @transform_1(%arg0: i32, %arg1: i32, %arg2: i32) -> (i32, i32, i32) {
    %c1_i32 = arith.constant 1 : i32
    %c0_i32 = arith.constant 0 : i32
    return %arg0, %arg2, %c1_i32 : i32, i32, i32
  }
  func.func @transform_2(%arg0: i32, %arg1: i32, %arg2: i32) -> (i32, i32, i32) {
    %c2_i32 = arith.constant 2 : i32
    %c0_i32 = arith.constant 0 : i32
    return %arg0, %arg2, %c2_i32 : i32, i32, i32
  }
  func.func @transform_3(%arg0: i32, %arg1: i32, %arg2: i32) -> (i32, i32, i32) {
    %c0_i32 = arith.constant 0 : i32
    %c0_i32_0 = arith.constant 0 : i32
    return %arg0, %arg1, %c0_i32 : i32, i32, i32
  }
}

module attributes {stable_mosaic.version = 11 : i64} {
  func.func @_mlp_kernel(%arg0: i32, %arg1: memref<32x128xf32, #tpu.memory_space<vmem>>, %arg2: memref<128x512xbf16, #tpu.memory_space<vmem>>, %arg3: memref<1x512xf32, #tpu.memory_space<vmem>>, %arg4: memref<512x128xbf16, #tpu.memory_space<vmem>>, %arg5: memref<1x128xf32, #tpu.memory_space<vmem>>, %arg6: memref<32x128xf32, #tpu.memory_space<vmem>>) attributes {dimension_semantics = [#tpu.dimension_semantics<parallel>], iteration_bounds = array<i64: 1>, scalar_prefetch = 0 : i64, scratch_operands = 0 : i64, tpu.core_type = #tpu.core_type<tc>, window_params = [{transform_indices = @transform_0, window_bounds = array<i64: 32, 128>}, {pipeline_mode = #tpu.pipeline_mode<synchronous>, transform_indices = @transform_1, window_bounds = array<i64: 128, 512>}, {pipeline_mode = #tpu.pipeline_mode<synchronous>, transform_indices = @transform_2, window_bounds = array<i64: 1, 512>}, {pipeline_mode = #tpu.pipeline_mode<synchronous>, transform_indices = @transform_3, window_bounds = array<i64: 512, 128>}, {pipeline_mode = #tpu.pipeline_mode<synchronous>, transform_indices = @transform_4, window_bounds = array<i64: 1, 128>}, {transform_indices = @transform_5, window_bounds = array<i64: 32, 128>}]} {
    %c0 = arith.constant 0 : index
    %c0_0 = arith.constant 0 : index
    %0 = vector.load %arg1[%c0, %c0_0] : memref<32x128xf32, #tpu.memory_space<vmem>>, vector<32x128xf32>
    %1 = arith.mulf %0, %0 : vector<32x128xf32>
    %cst = arith.constant dense<0.000000e+00> : vector<32xf32>
    %2 = vector.multi_reduction <add>, %1, %cst [1] : vector<32x128xf32> to vector<32xf32>
    %3 = vector.shape_cast %2 : vector<32xf32> to vector<32x1xf32>
    %cst_1 = arith.constant 1.280000e+02 : f32
    %4 = vector.broadcast %cst_1 : f32 to vector<32x1xf32>
    %5 = arith.divf %3, %4 : vector<32x1xf32>
    %cst_2 = arith.constant 1.1920929E-7 : f32
    %6 = vector.broadcast %cst_2 : f32 to vector<32x1xf32>
    %7 = arith.addf %5, %6 : vector<32x1xf32>
    %8 = math.rsqrt %7 : vector<32x1xf32>
    %9 = vector.broadcast %8 : vector<32x1xf32> to vector<32x128xf32>
    %10 = arith.mulf %0, %9 : vector<32x128xf32>
    %11 = arith.truncf %10 : vector<32x128xf32> to vector<32x128xbf16>
    %c0_3 = arith.constant 0 : index
    %c0_4 = arith.constant 0 : index
    %12 = vector.load %arg2[%c0_3, %c0_4] : memref<128x512xbf16, #tpu.memory_space<vmem>>, vector<128x512xbf16>
    %cst_5 = arith.constant dense<0.000000e+00> : vector<32x512xf32>
    %13 = tpu.matmul %11, %12, %cst_5 {dimension_numbers = #tpu.dot_dimension_numbers<[1], [0], [0], [1], [0, 0, 1, 1], [], []>} : vector<32x128xbf16>, vector<128x512xbf16>, vector<32x512xf32> -> vector<32x512xf32>
    %c0_6 = arith.constant 0 : index
    %c0_7 = arith.constant 0 : index
    %14 = vector.load %arg3[%c0_6, %c0_7] : memref<1x512xf32, #tpu.memory_space<vmem>>, vector<1x512xf32>
    %15 = vector.broadcast %14 : vector<1x512xf32> to vector<32x512xf32>
    %16 = arith.addf %13, %15 : vector<32x512xf32>
    %cst_8 = arith.constant 0.000000e+00 : f32
    %17 = vector.broadcast %cst_8 : f32 to vector<32x512xf32>
    %18 = arith.maximumf %16, %17 : vector<32x512xf32>
    %19 = arith.mulf %18, %18 : vector<32x512xf32>
    %20 = arith.truncf %19 : vector<32x512xf32> to vector<32x512xbf16>
    %c0_9 = arith.constant 0 : index
    %c0_10 = arith.constant 0 : index
    %21 = vector.load %arg4[%c0_9, %c0_10] : memref<512x128xbf16, #tpu.memory_space<vmem>>, vector<512x128xbf16>
    %cst_11 = arith.constant dense<0.000000e+00> : vector<32x128xf32>
    %22 = tpu.matmul %20, %21, %cst_11 {dimension_numbers = #tpu.dot_dimension_numbers<[1], [0], [0], [1], [0, 0, 1, 1], [], []>} : vector<32x512xbf16>, vector<512x128xbf16>, vector<32x128xf32> -> vector<32x128xf32>
    %c0_12 = arith.constant 0 : index
    %c0_13 = arith.constant 0 : index
    %23 = vector.load %arg5[%c0_12, %c0_13] : memref<1x128xf32, #tpu.memory_space<vmem>>, vector<1x128xf32>
    %24 = vector.broadcast %23 : vector<1x128xf32> to vector<32x128xf32>
    %25 = arith.addf %22, %24 : vector<32x128xf32>
    %26 = arith.addf %0, %25 : vector<32x128xf32>
    %c0_14 = arith.constant 0 : index
    %c0_15 = arith.constant 0 : index
    %27 = vector.load %arg6[%c0_14, %c0_15] : memref<32x128xf32, #tpu.memory_space<vmem>>, vector<32x128xf32>
    tpu.vector_store %arg6[%c0_14, %c0_15], %26 {strides = array<i32>} : memref<32x128xf32, #tpu.memory_space<vmem>>, vector<32x128xf32>,
    return
  }
  func.func @transform_0(%arg0: i32) -> (i32, i32) {
    %c0_i32 = arith.constant 0 : i32
    %c0_i32_0 = arith.constant 0 : i32
    return %arg0, %c0_i32 : i32, i32
  }
  func.func @transform_1(%arg0: i32) -> (i32, i32) {
    %c0_i32 = arith.constant 0 : i32
    %c0_i32_0 = arith.constant 0 : i32
    %c0_i32_1 = arith.constant 0 : i32
    return %c0_i32, %c0_i32_0 : i32, i32
  }
  func.func @transform_2(%arg0: i32) -> (i32, i32) {
    %c0_i32 = arith.constant 0 : i32
    %c0_i32_0 = arith.constant 0 : i32
    %c0_i32_1 = arith.constant 0 : i32
    return %c0_i32, %c0_i32_0 : i32, i32
  }
  func.func @transform_3(%arg0: i32) -> (i32, i32) {
    %c0_i32 = arith.constant 0 : i32
    %c0_i32_0 = arith.constant 0 : i32
    %c0_i32_1 = arith.constant 0 : i32
    return %c0_i32, %c0_i32_0 : i32, i32
  }
  func.func @transform_4(%arg0: i32) -> (i32, i32) {
    %c0_i32 = arith.constant 0 : i32
    %c0_i32_0 = arith.constant 0 : i32
    %c0_i32_1 = arith.constant 0 : i32
    return %c0_i32, %c0_i32_0 : i32, i32
  }
  func.func @transform_5(%arg0: i32) -> (i32, i32) {
    %c0_i32 = arith.constant 0 : i32
    %c0_i32_0 = arith.constant 0 : i32
    return %arg0, %c0_i32 : i32, i32
  }
}

module attributes {stable_mosaic.version = 11 : i64} {
  func.func @_lm_head_kernel(%arg0: i32, %arg1: i32, %arg2: memref<32x128xf32, #tpu.memory_space<vmem>>, %arg3: memref<128x512xbf16, #tpu.memory_space<vmem>>, %arg4: memref<32x512xf32, #tpu.memory_space<vmem>>, %arg5: memref<32x128xbf16, #tpu.memory_space<vmem>>) attributes {dimension_semantics = [#tpu.dimension_semantics<parallel>, #tpu.dimension_semantics<arbitrary>], iteration_bounds = array<i64: 1, 1>, scalar_prefetch = 0 : i64, scratch_operands = 1 : i64, tpu.core_type = #tpu.core_type<tc>, window_params = [{transform_indices = @transform_0, window_bounds = array<i64: 32, 128>}, {transform_indices = @transform_1, window_bounds = array<i64: 128, 512>}, {transform_indices = @transform_2, window_bounds = array<i64: 32, 512>}]} {
    %c0_i32 = arith.constant 0 : i32
    %0 = arith.cmpi eq, %arg1, %c0_i32 : i32
    %1 = arith.extui %0 : i1 to i32
    %c0_i32_0 = arith.constant 0 : i32
    %2 = arith.cmpi ne, %1, %c0_i32_0 : i32
    scf.if %2 {
      %c0_6 = arith.constant 0 : index
      %c0_7 = arith.constant 0 : index
      %7 = vector.load %arg2[%c0_6, %c0_7] : memref<32x128xf32, #tpu.memory_space<vmem>>, vector<32x128xf32>
      %8 = arith.mulf %7, %7 : vector<32x128xf32>
      %cst_8 = arith.constant dense<0.000000e+00> : vector<32xf32>
      %9 = vector.multi_reduction <add>, %8, %cst_8 [1] : vector<32x128xf32> to vector<32xf32>
      %10 = vector.shape_cast %9 : vector<32xf32> to vector<32x1xf32>
      %cst_9 = arith.constant 1.280000e+02 : f32
      %11 = vector.broadcast %cst_9 : f32 to vector<32x1xf32>
      %12 = arith.divf %10, %11 : vector<32x1xf32>
      %cst_10 = arith.constant 1.1920929E-7 : f32
      %13 = vector.broadcast %cst_10 : f32 to vector<32x1xf32>
      %14 = arith.addf %12, %13 : vector<32x1xf32>
      %15 = math.rsqrt %14 : vector<32x1xf32>
      %16 = vector.broadcast %15 : vector<32x1xf32> to vector<32x128xf32>
      %17 = arith.mulf %7, %16 : vector<32x128xf32>
      %18 = arith.truncf %17 : vector<32x128xf32> to vector<32x128xbf16>
      %c0_11 = arith.constant 0 : index
      %c0_12 = arith.constant 0 : index
      %19 = vector.load %arg5[%c0_11, %c0_12] : memref<32x128xbf16, #tpu.memory_space<vmem>>, vector<32x128xbf16>
      tpu.vector_store %arg5[%c0_11, %c0_12], %18 {strides = array<i32>} : memref<32x128xbf16, #tpu.memory_space<vmem>>, vector<32x128xbf16>,
    } else {
    }
    %c0 = arith.constant 0 : index
    %c0_1 = arith.constant 0 : index
    %3 = vector.load %arg5[%c0, %c0_1] : memref<32x128xbf16, #tpu.memory_space<vmem>>, vector<32x128xbf16>
    %c0_2 = arith.constant 0 : index
    %c0_3 = arith.constant 0 : index
    %4 = vector.load %arg3[%c0_2, %c0_3] : memref<128x512xbf16, #tpu.memory_space<vmem>>, vector<128x512xbf16>
    %cst = arith.constant dense<0.000000e+00> : vector<32x512xf32>
    %5 = tpu.matmul %3, %4, %cst {dimension_numbers = #tpu.dot_dimension_numbers<[1], [0], [0], [1], [0, 0, 1, 1], [], []>} : vector<32x128xbf16>, vector<128x512xbf16>, vector<32x512xf32> -> vector<32x512xf32>
    %c0_4 = arith.constant 0 : index
    %c0_5 = arith.constant 0 : index
    %6 = vector.load %arg4[%c0_4, %c0_5] : memref<32x512xf32, #tpu.memory_space<vmem>>, vector<32x512xf32>
    tpu.vector_store %arg4[%c0_4, %c0_5], %5 {strides = array<i32>} : memref<32x512xf32, #tpu.memory_space<vmem>>, vector<32x512xf32>,
    return
  }
  func.func @transform_0(%arg0: i32, %arg1: i32) -> (i32, i32) {
    %c0_i32 = arith.constant 0 : i32
    %c0_i32_0 = arith.constant 0 : i32
    return %arg0, %c0_i32 : i32, i32
  }
  func.func @transform_1(%arg0: i32, %arg1: i32) -> (i32, i32) {
    %c0_i32 = arith.constant 0 : i32
    %c0_i32_0 = arith.constant 0 : i32
    return %c0_i32, %arg1 : i32, i32
  }
  func.func @transform_2(%arg0: i32, %arg1: i32) -> (i32, i32) {
    %c0_i32 = arith.constant 0 : i32
    return %arg0, %arg1 : i32, i32
  }
}

</mosaic_0001>

<bundles_post_ra>
// kernel: gpt_forward.11
= control target key start
LH: loop header
LB: loop body
LE: loop exit
PB: predicated region body
PF: predicated region fallthrough
CT: control target
= control target key end

     0   :  { %s303_s1 = inlined_call_operand.vmem [shape: bf16[128,128], index: 1, kind: input, shape index: {}]   ;;  %s304_s0 = inlined_call_operand.vmem [shape: bf16[32,128], index: 0, kind: input, shape index: {}]   ;;  %s305_s2 = inlined_call_operand.vmem [shape: f32[1,128], index: 2, kind: input, shape index: {}]   ;;  %s306_s3 = inlined_call_operand.vmem [shape: f32[32,128], index: 3, kind: input, shape index: {}]   ;;  %s307_s4 = inlined_call_operand.vmem [shape: f32[32,128], index: 4, kind: output, shape index: {}]  }
   0x1   :  { %v211_v0 = vld [vmem:[%s303_s1] sm:$0xff]   ;;  %v212_v1 = vld [vmem:[%s303_s1 + $0x8] sm:$0xff]   ;;  %v213_v2 = vld [vmem:[%s303_s1 + $0x10] sm:$0xff]  }
   0x2   :  { %191 = vmatprep.subr.bf16.mxu0 %v211_v0  ;;  %v214_v3 = vld [vmem:[%s303_s1 + $0x18] sm:$0xff]   ;;  %v219_v4 = vld [vmem:[%s304_s0] sm:$0xff]   ;;  %v216_v6 = vld [vmem:[%s303_s1 + $0x28] sm:$0xff]  }
   0x3   :  { %192 = vmatpush3.bf16.msra.mxu0 %v211_v0  ;;  %207 = vmatprep.mubr.bf16.mxu0 %v219_v4  ;;  %v215_v5 = vld [vmem:[%s303_s1 + $0x20] sm:$0xff]   ;;  %v217_v7 = vld [vmem:[%s303_s1 + $0x30] sm:$0xff]   ;;  %v218_v8 = vld [vmem:[%s303_s1 + $0x38] sm:$0xff]  }
   0x4   :  { %193 = vmatprep.subr.bf16.mxu0 %v212_v1  ;;  %v220_v9 = vld [vmem:[%s304_s0 + $0x8] sm:$0xff]   ;;  %v170_v10 = vld [vmem:[%s305_s2] ss:$0 sm:$0xff]  ;;  %v156_v12 = vld [vmem:[%s306_s3 + $0x10] sm:$0xff] }
   0x5   :  { %v154_v15 = vld [vmem:[%s306_s3] sm:$0xff]  ;;  %v157_v18 = vld [vmem:[%s306_s3 + $0x18] sm:$0xff]  ;;  %v155_v22 = vld [vmem:[%s306_s3 + $0x8] sm:$0xff] }
   0x7   :  { %194 = vmatpush3.bf16.msra.mxu0 %v212_v1 }
   0x8   :  { %195 = vmatprep.subr.bf16.mxu0 %v213_v2 }
   0xb   :  { %196 = vmatpush3.bf16.msra.mxu0 %v213_v2 }
   0xc   :  { %197 = vmatprep.subr.bf16.mxu0 %v214_v3 }
   0xf   :  { %198 = vmatpush3.bf16.msra.mxu0 %v214_v3 }
  0x10   :  { %199 = vmatprep.subr.bf16.mxu0 %v215_v5 }
  0x13   :  { %200 = vmatpush3.bf16.msra.mxu0 %v215_v5 }
  0x14   :  { %201 = vmatprep.subr.bf16.mxu0 %v216_v6 }
  0x17   :  { %202 = vmatpush3.bf16.msra.mxu0 %v216_v6 }
  0x18   :  { %203 = vmatprep.subr.bf16.mxu0 %v217_v7 }
  0x1b   :  { %204 = vmatpush3.bf16.msra.mxu0 %v217_v7 }
  0x1c   :  { %205 = vmatprep.subr.bf16.mxu0 %v218_v8 }
  0x1f   :  { %206 = vmatpush3.bf16.msra.mxu0 %v218_v8 }
  0x22   :  { %208 = vmatmul.mubr.bf16.vlgmr.msra.gmra.mrb[0].mxu0 %v220_v9 }
  0xf5   :  { %v209_v11 = vpop.f32.mrb[0].mxu0 }
  0xf6   :  { %v148_v13 = vadd.f32 %v209_v11, %v170_v10  ;;  %v139_v14 = vpop.f32.mrb[1].mxu0 }
  0xf7   :  { %v140_v16 = vadd.f32 %v170_v10, %v139_v14  ;;  %v210_v17 = vpop.f32.mrb[2].mxu0 }
  0xf8   :  { %v160_v19 = vadd.f32 %v156_v12, %v148_v13  ;;  %v151_v20 = vadd.f32 %v210_v17, %v170_v10  ;;  %v142_v21 = vpop.f32.mrb[3].mxu0 }
  0xf9   :  { %v158_v23 = vadd.f32 %v154_v15, %v140_v16  ;;  %v143_v24 = vadd.f32 %v170_v10, %v142_v21 }
  0xfa   :  { %164 = vst [vmem:[%s307_s4 + $0x10] sm:$0xff] %v160_v19  ;;  %v161_v25 = vadd.f32 %v157_v18, %v151_v20 }
  0xfb   :  { %162 = vst [vmem:[%s307_s4] sm:$0xff] %v158_v23  ;;  %v159_v26 = vadd.f32 %v155_v22, %v143_v24 }
  0xfc   :  { %165 = vst [vmem:[%s307_s4 + $0x18] sm:$0xff] %v161_v25 }
  0xfd   :  { %163 = vst [vmem:[%s307_s4 + $0x8] sm:$0xff] %v159_v26 }

// kernel: gpt_forward.12
= control target key start
LH: loop header
LB: loop body
LE: loop exit
PB: predicated region body
PF: predicated region fallthrough
CT: control target
= control target key end

     0   :  { %v999_v38 = vmov 0   ;;  %s1276_s0 = inlined_call_operand.vmem [shape: f32[32,128], index: 0, kind: input, shape index: {}]   ;;  %s1277_s1 = inlined_call_operand.vmem [shape: bf16[128,512], index: 1, kind: input, shape index: {}]   ;;  %s1278_s3 = inlined_call_operand.vmem [shape: bf16[512,128], index: 3, kind: input, shape index: {}]   ;;  %s1279_s2 = inlined_call_operand.vmem [shape: f32[1,512], index: 2, kind: input, shape index: {}]   ;;  %s1280_s4 = inlined_call_operand.vmem [shape: f32[1,128], index: 4, kind: input, shape index: {}]   ;;  %s1281_s5 = inlined_call_operand.vmem [shape: f32[32,128], index: 5, kind: output, shape index: {}]  }
   0x1   :  { %v1033_v0 = vld [vmem:[%s1276_s0] sm:$0xff]  ;;  %v1038_v1 = vld [vmem:[%s1276_s0 + $0x10] sm:$0xff]  ;;  %v1043_v2 = vld [vmem:[%s1276_s0 + $0x8] sm:$0xff]  ;;  %302 = vmatprep.mubr.bf16.mxu0 %v999_v38  ;;  %355 = vmatprep.mubr.bf16.mxu1 %v999_v38 }
   0x2   :  { %v25_v3 = vmul.f32 %v1033_v0, %v1033_v0  ;;  %v27_v4 = vmul.f32 %v1038_v1, %v1038_v1  ;;  %v1052_v5 = vld [vmem:[%s1276_s0 + $0x18] sm:$0xff]  ;;  %v911_v6 = vld [vmem:[%s1277_s1 + $0x4] ss:$16 sps:$4 sm:$0xff]   ;;  %v26_v7 = vmul.f32 %v1043_v2, %v1043_v2  ;;  %v915_v10 = vld [vmem:[%s1277_s1] ss:$16 sps:$4 sm:$0xff]  }
   0x3   :  { %v28_v8 = vmul.f32 %v1052_v5, %v1052_v5  ;;  %v913_v9 = vld [vmem:[%s1277_s1 + $0xc] ss:$16 sps:$4 sm:$0xff]   ;;  %v916_v11 = vld [vmem:[%s1277_s1 + $0x8] ss:$16 sps:$4 sm:$0xff]   ;;  %270 = vmatprep.subr.bf16.mxu0 %v911_v6  ;;  %v917_v12 = vld [vmem:[%s1277_s1 + $0x24] ss:$16 sps:$4 sm:$0xff]  }
   0x4   :  { %29 = vadd.xlane.f32.xlu0 %v25_v3  ;;  %33 = vadd.xlane.f32.xlu1 %v27_v4  ;;  %v919_v13 = vld [vmem:[%s1277_s1 + $0x2c] ss:$16 sps:$4 sm:$0xff]   ;;  %v921_v14 = vld [vmem:[%s1277_s1 + $0x20] ss:$16 sps:$4 sm:$0xff]   ;;  %v922_v15 = vld [vmem:[%s1277_s1 + $0x28] ss:$16 sps:$4 sm:$0xff]  }
   0x5   :  { %323 = vmatprep.subr.bf16.mxu1 %v913_v9  ;;  %271 = vmatpush1.bf16.msra.mxu0 %v915_v10  ;;  %v923_v16 = vld [vmem:[%s1277_s1 + $0x44] ss:$16 sps:$4 sm:$0xff]   ;;  %v925_v17 = vld [vmem:[%s1277_s1 + $0x4c] ss:$16 sps:$4 sm:$0xff]   ;;  %v927_v18 = vld [vmem:[%s1277_s1 + $0x40] ss:$16 sps:$4 sm:$0xff]  }
   0x6   :  { %324 = vmatpush1.bf16.msra.mxu1 %v916_v11  ;;  %272 = vmatprep.subr.bf16.mxu0 %v917_v12  ;;  %v928_v19 = vld [vmem:[%s1277_s1 + $0x48] ss:$16 sps:$4 sm:$0xff]   ;;  %v929_v20 = vld [vmem:[%s1277_s1 + $0x64] ss:$16 sps:$4 sm:$0xff]   ;;  %v931_v21 = vld [vmem:[%s1277_s1 + $0x6c] ss:$16 sps:$4 sm:$0xff]  }
   0x7   :  { %325 = vmatprep.subr.bf16.mxu1 %v919_v13  ;;  %v933_v22 = vld [vmem:[%s1277_s1 + $0x60] ss:$16 sps:$4 sm:$0xff]   ;;  %v934_v23 = vld [vmem:[%s1277_s1 + $0x68] ss:$16 sps:$4 sm:$0xff]   ;;  %v935_v24 = vld [vmem:[%s1277_s1 + $0x84] ss:$16 sps:$4 sm:$0xff]  }
   0x8   :  { %31 = vadd.xlane.f32.xlu0 %v26_v7  ;;  %35 = vadd.xlane.f32.xlu1 %v28_v8  ;;  %v937_v25 = vld [vmem:[%s1277_s1 + $0x8c] ss:$16 sps:$4 sm:$0xff]   ;;  %v939_v26 = vld [vmem:[%s1277_s1 + $0x80] ss:$16 sps:$4 sm:$0xff]   ;;  %v940_v27 = vld [vmem:[%s1277_s1 + $0x88] ss:$16 sps:$4 sm:$0xff]  }
   0x9   :  { %273 = vmatpush1.bf16.msra.mxu0 %v921_v14  ;;  %v941_v28 = vld [vmem:[%s1277_s1 + $0xa4] ss:$16 sps:$4 sm:$0xff]   ;;  %v943_v29 = vld [vmem:[%s1277_s1 + $0xac] ss:$16 sps:$4 sm:$0xff]   ;;  %v945_v30 = vld [vmem:[%s1277_s1 + $0xa0] ss:$16 sps:$4 sm:$0xff]  }
   0xa   :  { %326 = vmatpush1.bf16.msra.mxu1 %v922_v15  ;;  %274 = vmatprep.subr.bf16.mxu0 %v923_v16  ;;  %v946_v31 = vld [vmem:[%s1277_s1 + $0xa8] ss:$16 sps:$4 sm:$0xff]   ;;  %v947_v32 = vld [vmem:[%s1277_s1 + $0xc4] ss:$16 sps:$4 sm:$0xff]   ;;  %v949_v33 = vld [vmem:[%s1277_s1 + $0xcc] ss:$16 sps:$4 sm:$0xff]  }
   0xb   :  { %327 = vmatprep.subr.bf16.mxu1 %v925_v17  ;;  %v951_v34 = vld [vmem:[%s1277_s1 + $0xc0] ss:$16 sps:$4 sm:$0xff]   ;;  %v952_v35 = vld [vmem:[%s1277_s1 + $0xc8] ss:$16 sps:$4 sm:$0xff]   ;;  %v953_v36 = vld [vmem:[%s1277_s1 + $0xe4] ss:$16 sps:$4 sm:$0xff]  }
   0xc   :  { %v955_v37 = vld [vmem:[%s1277_s1 + $0xec] ss:$16 sps:$4 sm:$0xff]   ;;  %v957_v39 = vld [vmem:[%s1277_s1 + $0xe0] ss:$16 sps:$4 sm:$0xff]   ;;  %v958_v40 = vld [vmem:[%s1277_s1 + $0xe8] ss:$16 sps:$4 sm:$0xff]  }
   0xd   :  { %275 = vmatpush1.bf16.msra.mxu0 %v927_v18  ;;  %v959_v41 = vld [vmem:[%s1278_s3 + $0x40] sm:$0xff]   ;;  %v963_v3 = vld [vmem:[%s1278_s3 + $0x48] sm:$0xff]   ;;  %v967_v10 = vld [vmem:[%s1278_s3 + $0x50] sm:$0xff]  }
   0xe   :  { %328 = vmatpush1.bf16.msra.mxu1 %v928_v19  ;;  %276 = vmatprep.subr.bf16.mxu0 %v929_v20  ;;  %v960_v42 = vld [vmem:[%s1278_s3 + $0xc0] sm:$0xff]   ;;  %v964_v4 = vld [vmem:[%s1278_s3 + $0xc8] sm:$0xff]   ;;  %v968_v11 = vld [vmem:[%s1278_s3 + $0xd0] sm:$0xff]  }
   0xf   :  { %329 = vmatprep.subr.bf16.mxu1 %v931_v21  ;;  %v961_v61 = vld [vmem:[%s1278_s3] sm:$0xff]   ;;  %v965_v8 = vld [vmem:[%s1278_s3 + $0x8] sm:$0xff]   ;;  %v969_v13 = vld [vmem:[%s1278_s3 + $0x10] sm:$0xff]  }
  0x10   :  { %v962_v62 = vld [vmem:[%s1278_s3 + $0x80] sm:$0xff]   ;;  %v966_v9 = vld [vmem:[%s1278_s3 + $0x88] sm:$0xff]   ;;  %v970_v14 = vld [vmem:[%s1278_s3 + $0x90] sm:$0xff]  }
  0x11   :  { %277 = vmatpush1.bf16.msra.mxu0 %v933_v22  ;;  %v971_v15 = vld [vmem:[%s1278_s3 + $0x58] sm:$0xff]   ;;  %v975_v19 = vld [vmem:[%s1278_s3 + $0x60] sm:$0xff]  }
  0x12   :  { %330 = vmatpush1.bf16.msra.mxu1 %v934_v23  ;;  %278 = vmatprep.subr.bf16.mxu0 %v935_v24  ;;  %v972_v16 = vld [vmem:[%s1278_s3 + $0xd8] sm:$0xff]   ;;  %v976_v20 = vld [vmem:[%s1278_s3 + $0xe0] sm:$0xff]   ;;  %v979_v23 = vld [vmem:[%s1278_s3 + $0x68] sm:$0xff]  }
  0x13   :  { %331 = vmatprep.subr.bf16.mxu1 %v937_v25  ;;  %v973_v17 = vld [vmem:[%s1278_s3 + $0x18] sm:$0xff]   ;;  %v977_v21 = vld [vmem:[%s1278_s3 + $0x20] sm:$0xff]   ;;  %v980_v24 = vld [vmem:[%s1278_s3 + $0xe8] sm:$0xff]  }
  0x14   :  { %v974_v18 = vld [vmem:[%s1278_s3 + $0x98] sm:$0xff]   ;;  %v978_v22 = vld [vmem:[%s1278_s3 + $0xa0] sm:$0xff]   ;;  %v981_v25 = vld [vmem:[%s1278_s3 + $0x28] sm:$0xff]  }
  0x15   :  { %279 = vmatpush1.bf16.msra.mxu0 %v939_v26  ;;  %v982_v26 = vld [vmem:[%s1278_s3 + $0xa8] sm:$0xff]  }
  0x16   :  { %332 = vmatpush1.bf16.msra.mxu1 %v940_v27  ;;  %280 = vmatprep.subr.bf16.mxu0 %v941_v28  ;;  %v983_v27 = vld [vmem:[%s1278_s3 + $0x70] sm:$0xff]  }
  0x17   :  { %333 = vmatprep.subr.bf16.mxu1 %v943_v29  ;;  %v984_v28 = vld [vmem:[%s1278_s3 + $0xf0] sm:$0xff]  }
  0x18   :  { %v985_v29 = vld [vmem:[%s1278_s3 + $0x30] sm:$0xff]  }
  0x19   :  { %281 = vmatpush1.bf16.msra.mxu0 %v945_v30  ;;  %v986_v30 = vld [vmem:[%s1278_s3 + $0xb0] sm:$0xff]  }
  0x1a   :  { %334 = vmatpush1.bf16.msra.mxu1 %v946_v31  ;;  %282 = vmatprep.subr.bf16.mxu0 %v947_v32  ;;  %v987_v31 = vld [vmem:[%s1278_s3 + $0x78] sm:$0xff]  }
  0x1b   :  { %335 = vmatprep.subr.bf16.mxu1 %v949_v33  ;;  %v988_v32 = vld [vmem:[%s1278_s3 + $0xf8] sm:$0xff]  }
  0x1c   :  { %v989_v33 = vld [vmem:[%s1278_s3 + $0x38] sm:$0xff]  }
  0x1d   :  { %283 = vmatpush1.bf16.msra.mxu0 %v951_v34  ;;  %v990_v34 = vld [vmem:[%s1278_s3 + $0xb8] sm:$0xff]  }
  0x1e   :  { %336 = vmatpush1.bf16.msra.mxu1 %v952_v35  ;;  %284 = vmatprep.subr.bf16.mxu0 %v953_v36  ;;  %v90_v35 = vlaneseq }
  0x1f   :  { %337 = vmatprep.subr.bf16.mxu1 %v955_v37 }
  0x20   :  { %v91_v36 = vshrl.u32 %v90_v35, 7 }
  0x21   :  { %285 = vmatpush1.bf16.msra.mxu0 %v957_v39  ;;  %v88_v39 = vld [vmem:[%s1279_s2] sm:$0xf] }
  0x22   :  { %338 = vmatpush1.bf16.msra.mxu1 %v958_v40  ;;  %854 = vmatprep.subr.bf16.mxu0 %v959_v41  ;;  %v92_v37 = vsub.s32 0, %v91_v36  ;;  %v96_v40 = vsub.s32 1, %v91_v36  ;;  %v104_v41 = vsub.s32 3, %v91_v36 }
  0x23   :  { %882 = vmatprep.subr.bf16.mxu1 %v960_v42 }
  0x24   :  { %v93_v42 = vrot.slane %v88_v39, %v92_v37 }
  0x91   :  { %v30_v43 = vpop.xlane.xlu0 %29  ;;  %v34_v44 = vpop.xlane.xlu1 %33 }
  0x92   :  { %v38_v45 = vmul.f32 0.0078125, %v30_v43  ;;  %v40_v47 = vmul.f32 0.0078125, %v34_v44  ;;  %v97_v44 = vrot.slane %v88_v39, %v96_v40 }
  0x94   :  { %v42_v46 = vadd.f32 1.1920929e-07, %v38_v45  ;;  %v44_v53 = vadd.f32 1.1920929e-07, %v40_v47  ;;  %v105_v45 = vrot.slane %v88_v39, %v104_v41 }
  0x95   :  { %v32_v48 = vpop.xlane.xlu0 %31  ;;  %v36_v49 = vpop.xlane.xlu1 %35 }
  0x96   :  { %v39_v50 = vmul.f32 0.0078125, %v32_v48  ;;  %v41_v51 = vmul.f32 0.0078125, %v36_v49  ;;  %991 = vrsqrt.f32 %v42_v46 }
  0x98   :  { %v43_v52 = vadd.f32 1.1920929e-07, %v39_v50  ;;  %v45_v54 = vadd.f32 1.1920929e-07, %v41_v51 }
  0x9a   :  { %993 = vrsqrt.f32 %v43_v52 }
  0x9b   :  { %995 = vrsqrt.f32 %v44_v53 }
  0x9c   :  { %997 = vrsqrt.f32 %v45_v54 }
  0xa0   :  { %v992_v55 = vpop.eup %991 }
  0xa1   :  { %v50_v57 = vmul.f32 %v992_v55, %v1033_v0 }
  0xa4   :  { %v994_v56 = vpop.eup %993 }
  0xa5   :  { %v51_v58 = vmul.f32 %v994_v56, %v1043_v2  ;;  %v996_v59 = vpop.eup %995 }
  0xa6   :  { %v998_v63 = vpop.eup %997  ;;  %v52_v6 = vmul.f32 %v996_v59, %v1038_v1 }
  0xa7   :  { %v54_v60 = vpack.c.bf16 %v51_v58, %v50_v57  ;;  %v53_v7 = vmul.f32 %v998_v63, %v1052_v5 }
  0xa9   :  { %303 = vmatmul.mubr.bf16.vlgmr.msra.gmra.mrb[0].mxu0 %v54_v60  ;;  %356 = vmatmul.mubr.bf16.vlgmr.msra.gmra.mrb[0].mxu1 %v54_v60  ;;  %v55_v12 = vpack.c.bf16 %v53_v7, %v52_v6 }
  0xaa   :  { %312 = vmatprep.mubr.bf16.mxu0 %v999_v38  ;;  %365 = vmatprep.mubr.bf16.mxu1 %v999_v38  ;;  %v100_v38 = vsub.s32 2, %v91_v36 }
  0xab   :  { %855 = vmatpush3.bf16.msra.mxu0 %v961_v61  ;;  %883 = vmatpush3.bf16.msra.mxu1 %v962_v62 }
  0xac   :  { %856 = vmatprep.subr.bf16.mxu0 %v963_v3  ;;  %884 = vmatprep.subr.bf16.mxu1 %v964_v4  ;;  %v101_v43 = vrot.slane %v88_v39, %v100_v38 }
  0xaf   :  { %857 = vmatpush3.bf16.msra.mxu0 %v965_v8  ;;  %885 = vmatpush3.bf16.msra.mxu1 %v966_v9 }
  0xb0   :  { %858 = vmatprep.subr.bf16.mxu0 %v967_v10  ;;  %886 = vmatprep.subr.bf16.mxu1 %v968_v11 }
  0xb1   :  { %313 = vmatmul.mubr.bf16.gmra.mrb[4].mxu0 %v55_v12  ;;  %366 = vmatmul.mubr.bf16.gmra.mrb[4].mxu1 %v55_v12 }
  0xb3   :  { %859 = vmatpush3.bf16.msra.mxu0 %v969_v13  ;;  %887 = vmatpush3.bf16.msra.mxu1 %v970_v14 }
  0xb4   :  { %860 = vmatprep.subr.bf16.mxu0 %v971_v15  ;;  %888 = vmatprep.subr.bf16.mxu1 %v972_v16 }
  0xb7   :  { %861 = vmatpush3.bf16.msra.mxu0 %v973_v17  ;;  %889 = vmatpush3.bf16.msra.mxu1 %v974_v18 }
  0xb8   :  { %862 = vmatprep.subr.bf16.mxu0 %v975_v19  ;;  %890 = vmatprep.subr.bf16.mxu1 %v976_v20 }
  0xbb   :  { %863 = vmatpush3.bf16.msra.mxu0 %v977_v21  ;;  %891 = vmatpush3.bf16.msra.mxu1 %v978_v22 }
  0xbc   :  { %864 = vmatprep.subr.bf16.mxu0 %v979_v23  ;;  %892 = vmatprep.subr.bf16.mxu1 %v980_v24 }
  0xbf   :  { %865 = vmatpush3.bf16.msra.mxu0 %v981_v25  ;;  %893 = vmatpush3.bf16.msra.mxu1 %v982_v26 }
  0xc0   :  { %866 = vmatprep.subr.bf16.mxu0 %v983_v27  ;;  %894 = vmatprep.subr.bf16.mxu1 %v984_v28 }
  0xc3   :  { %867 = vmatpush3.bf16.msra.mxu0 %v985_v29  ;;  %895 = vmatpush3.bf16.msra.mxu1 %v986_v30 }
  0xc4   :  { %868 = vmatprep.subr.bf16.mxu0 %v987_v31  ;;  %896 = vmatprep.subr.bf16.mxu1 %v988_v32 }
  0xc7   :  { %869 = vmatpush3.bf16.msra.mxu0 %v989_v33  ;;  %897 = vmatpush3.bf16.msra.mxu1 %v990_v34 }
 0x17c   :  { %v304_v46 = vpop.f32.mrb[0].mxu0  ;;  %v357_v47 = vpop.f32.mrb[0].mxu1 }
 0x17d   :  { %v305_v48 = vadd.f32 %v304_v46, %v93_v42  ;;  %v358_v49 = vadd.f32 %v357_v47, %v101_v43  ;;  %v306_v50 = vpop.f32.mrb[1].mxu0  ;;  %v359_v51 = vpop.f32.mrb[1].mxu1 }
 0x17e   :  { %v307_v52 = vadd.f32 %v306_v50, %v97_v44  ;;  %v360_v53 = vadd.f32 %v359_v51, %v105_v45  ;;  %v308_v54 = vpop.f32.mrb[2].mxu0  ;;  %v361_v55 = vpop.f32.mrb[2].mxu1 }
 0x17f   :  { %v376_v56 = vmax.f32 %v305_v48, 0.0  ;;  %v378_v57 = vmax.f32 %v358_v49, 0.0  ;;  %v309_v58 = vadd.f32 %v308_v54, %v93_v42  ;;  %v362_v59 = vadd.f32 %v361_v55, %v101_v43  ;;  %v310_v60 = vpop.f32.mrb[3].mxu0  ;;  %v363_v61 = vpop.f32.mrb[3].mxu1 }
 0x180   :  { %v377_v62 = vmax.f32 %v307_v52, 0.0  ;;  %v379_v63 = vmax.f32 %v360_v53, 0.0  ;;  %v311_v3 = vadd.f32 %v310_v60, %v97_v44  ;;  %v364_v4 = vadd.f32 %v363_v61, %v105_v45  ;;  %v821_v60 = vld [vmem:[%s1280_s4] ss:$0 sm:$0xff] }
 0x181   :  { %v380_v6 = vmax.f32 %v309_v58, 0.0  ;;  %v382_v7 = vmax.f32 %v362_v59, 0.0  ;;  %v392_v10 = vmul.f32 %v376_v56, %v376_v56  ;;  %v394_v11 = vmul.f32 %v378_v57, %v378_v57 }
 0x182   :  { %v381_v8 = vmax.f32 %v311_v3, 0.0  ;;  %v383_v9 = vmax.f32 %v364_v4, 0.0  ;;  %v393_v14 = vmul.f32 %v377_v62, %v377_v62  ;;  %v395_v15 = vmul.f32 %v379_v63, %v379_v63 }
 0x183   :  { %v396_v12 = vmul.f32 %v380_v6, %v380_v6  ;;  %v398_v13 = vmul.f32 %v382_v7, %v382_v7 }
 0x184   :  { %v397_v16 = vmul.f32 %v381_v8, %v381_v8  ;;  %v399_v17 = vmul.f32 %v383_v9, %v383_v9  ;;  %v314_v18 = vpop.f32.mrb[4].mxu0  ;;  %v367_v19 = vpop.f32.mrb[4].mxu1 }
 0x185   :  { %v408_v20 = vpack.c.bf16 %v396_v12, %v392_v10  ;;  %v410_v21 = vpack.c.bf16 %v398_v13, %v394_v11  ;;  %v315_v22 = vadd.f32 %v314_v18, %v93_v42  ;;  %v368_v23 = vadd.f32 %v367_v19, %v101_v43  ;;  %v316_v24 = vpop.f32.mrb[5].mxu0  ;;  %v369_v25 = vpop.f32.mrb[5].mxu1 }
 0x186   :  { %v409_v26 = vpack.c.bf16 %v397_v16, %v393_v14  ;;  %v411_v27 = vpack.c.bf16 %v399_v17, %v395_v15  ;;  %v317_v28 = vadd.f32 %v316_v24, %v97_v44  ;;  %v370_v29 = vadd.f32 %v369_v25, %v105_v45  ;;  %v318_v30 = vpop.f32.mrb[6].mxu0  ;;  %v371_v31 = vpop.f32.mrb[6].mxu1 }
 0x187   :  { %v384_v32 = vmax.f32 %v315_v22, 0.0  ;;  %v386_v33 = vmax.f32 %v368_v23, 0.0  ;;  %v319_v34 = vadd.f32 %v318_v30, %v93_v42  ;;  %v372_v35 = vadd.f32 %v371_v31, %v101_v43  ;;  %v320_v36 = vpop.f32.mrb[7].mxu0  ;;  %v373_v37 = vpop.f32.mrb[7].mxu1 }
 0x188   :  { %v385_v38 = vmax.f32 %v317_v28, 0.0  ;;  %v387_v39 = vmax.f32 %v370_v29, 0.0  ;;  %v321_v40 = vadd.f32 %v320_v36, %v97_v44  ;;  %v374_v41 = vadd.f32 %v373_v37, %v105_v45  ;;  %711 = vmatprep.mubr.bf16.mxu0 %v409_v26  ;;  %760 = vmatprep.mubr.bf16.mxu1 %v411_v27 }
 0x189   :  { %v388_v46 = vmax.f32 %v319_v34, 0.0  ;;  %v390_v47 = vmax.f32 %v372_v35, 0.0  ;;  %712 = vmatmul.mubr.bf16.vlgmr.msra.gmra.mrb[8].mxu0 %v408_v20  ;;  %761 = vmatmul.mubr.bf16.vlgmr.msra.gmra.mrb[8].mxu1 %v410_v21  ;;  %v400_v50 = vmul.f32 %v384_v32, %v384_v32  ;;  %v402_v51 = vmul.f32 %v386_v33, %v386_v33 }
 0x18a   :  { %v389_v48 = vmax.f32 %v321_v40, 0.0  ;;  %v391_v49 = vmax.f32 %v374_v41, 0.0  ;;  %v401_v42 = vmul.f32 %v385_v38, %v385_v38  ;;  %v403_v43 = vmul.f32 %v387_v39, %v387_v39 }
 0x18b   :  { %v404_v52 = vmul.f32 %v388_v46, %v388_v46  ;;  %v406_v53 = vmul.f32 %v390_v47, %v390_v47 }
 0x18c   :  { %v405_v54 = vmul.f32 %v389_v48, %v389_v48  ;;  %v407_v55 = vmul.f32 %v391_v49, %v391_v49 }
 0x18d   :  { %v412_v56 = vpack.c.bf16 %v404_v52, %v400_v50  ;;  %v414_v57 = vpack.c.bf16 %v406_v53, %v402_v51 }
 0x18e   :  { %v413_v44 = vpack.c.bf16 %v405_v54, %v401_v42  ;;  %v415_v45 = vpack.c.bf16 %v407_v55, %v403_v43 }
 0x190   :  { %719 = vmatprep.mubr.bf16.mxu0 %v413_v44  ;;  %768 = vmatprep.mubr.bf16.mxu1 %v415_v45 }
 0x191   :  { %720 = vmatmul.mubr.bf16.gmra.mrb[12].mxu0 %v412_v56  ;;  %769 = vmatmul.mubr.bf16.gmra.mrb[12].mxu1 %v414_v57 }
 0x25c   :  { %v870_v58 = vpop.f32.mrb[8].mxu0  ;;  %v898_v59 = vpop.f32.mrb[8].mxu1 }
 0x25d   :  { %v871_v61 = vpop.f32.mrb[9].mxu0  ;;  %v899_v62 = vpop.f32.mrb[9].mxu1 }
 0x25e   :  { %v872_v63 = vadd.f32 %v871_v61, %v870_v58  ;;  %v900_v3 = vadd.f32 %v899_v62, %v898_v59  ;;  %v873_v4 = vpop.f32.mrb[10].mxu0  ;;  %v901_v6 = vpop.f32.mrb[10].mxu1 }
 0x25f   :  { %v874_v7 = vpop.f32.mrb[11].mxu0  ;;  %v902_v8 = vpop.f32.mrb[11].mxu1 }
 0x260   :  { %v714_v9 = vadd.f32 %v872_v63, %v821_v60  ;;  %v875_v10 = vadd.f32 %v874_v7, %v873_v4  ;;  %v903_v11 = vadd.f32 %v902_v8, %v901_v6 }
 0x262   :  { %v763_v12 = vadd.f32 %v900_v3, %v714_v9  ;;  %v717_v13 = vadd.f32 %v875_v10, %v821_v60 }
 0x264   :  { %v777_v14 = vadd.f32 %v763_v12, %v1033_v0  ;;  %v766_v15 = vadd.f32 %v903_v11, %v717_v13  ;;  %v876_v16 = vpop.f32.mrb[12].mxu0  ;;  %v904_v17 = vpop.f32.mrb[12].mxu1 }
 0x265   :  { %v877_v18 = vpop.f32.mrb[13].mxu0  ;;  %v905_v19 = vpop.f32.mrb[13].mxu1 }
 0x266   :  { %781 = vst [vmem:[%s1281_s5] sm:$0xff] %v777_v14  ;;  %v778_v20 = vadd.f32 %v766_v15, %v1043_v2  ;;  %v878_v21 = vadd.f32 %v877_v18, %v876_v16  ;;  %v906_v22 = vadd.f32 %v905_v19, %v904_v17  ;;  %v879_v23 = vpop.f32.mrb[14].mxu0  ;;  %v907_v24 = vpop.f32.mrb[14].mxu1 }
 0x267   :  { %v880_v25 = vpop.f32.mrb[15].mxu0  ;;  %v908_v26 = vpop.f32.mrb[15].mxu1 }
 0x268   :  { %782 = vst [vmem:[%s1281_s5 + $0x8] sm:$0xff] %v778_v20  ;;  %v722_v0 = vadd.f32 %v878_v21, %v821_v60  ;;  %v881_v27 = vadd.f32 %v880_v25, %v879_v23  ;;  %v909_v28 = vadd.f32 %v908_v26, %v907_v24 }
 0x26a   :  { %v771_v29 = vadd.f32 %v906_v22, %v722_v0  ;;  %v725_v30 = vadd.f32 %v881_v27, %v821_v60 }
 0x26c   :  { %v779_v31 = vadd.f32 %v771_v29, %v1038_v1  ;;  %v774_v32 = vadd.f32 %v909_v28, %v725_v30 }
 0x26e   :  { %783 = vst [vmem:[%s1281_s5 + $0x10] sm:$0xff] %v779_v31  ;;  %v780_v2 = vadd.f32 %v774_v32, %v1052_v5 }
 0x270   :  { %784 = vst [vmem:[%s1281_s5 + $0x18] sm:$0xff] %v780_v2 }

// kernel: gpt_forward.9
= control target key start
LH: loop header
LB: loop body
LE: loop exit
PB: predicated region body
PF: predicated region fallthrough
CT: control target
= control target key end

     0   :  { %v1143_v21 = vmov 0   ;;  %v90_v55 = vlaneseq  ;;  %vm361_vm0 = vcmask 523264   ;;  %s1145_s7 = smov 32   ;;  %s1146_s8 = smov 96   ;;  %vm447_vm1 = vcmask 257024   ;;  %s1728_s0 = inlined_call_operand.vmem [shape: f32[32,128], index: 0, kind: input, shape index: {}]   ;;  %s1729_s1 = inlined_call_operand.vmem [shape: bf16[128,384], index: 1, kind: input, shape index: {}]   ;;  %s1730_s2 = inlined_call_operand.vmem [shape: f32[1,384], index: 2, kind: input, shape index: {}]   ;;  %s1731_s5 = inlined_call_operand.vmem [shape: bf16[32,384], index: 5, kind: output, shape index: {}]   ;;  %s1732_s4 = inlined_call_operand.vmem [shape: f32[2,32], index: 4, kind: input, shape index: {}]   ;;  %s1733_s3 = inlined_call_operand.vmem [shape: f32[2,32], index: 3, kind: input, shape index: {}]  }
   0x1   :  { %v1180_v0 = vld [vmem:[%s1728_s0] sm:$0xff]  ;;  %v1185_v1 = vld [vmem:[%s1728_s0 + $0x8] sm:$0xff]  ;;  %v1190_v2 = vld [vmem:[%s1728_s0 + $0x10] sm:$0xff]  ;;  %265 = vmatprep.mubr.bf16.mxu0 %v1143_v21  ;;  %vm500_vm2 = vcmask 519424   ;;  %vm737_vm3 = vcmask 781824   ;;  %vm792_vm4 = vcmask 1044224  }
   0x2   :  { %v25_v3 = vmul.f32 %v1180_v0, %v1180_v0  ;;  %v27_v4 = vmul.f32 %v1190_v2, %v1190_v2  ;;  %v1199_v5 = vld [vmem:[%s1728_s0 + $0x18] sm:$0xff]  ;;  %v1071_v6 = vld [vmem:[%s1729_s1 + $0x4] ss:$12 sps:$4 sm:$0xff]   ;;  %v1073_v7 = vld [vmem:[%s1729_s1] ss:$12 sps:$4 sm:$0xff]   ;;  %v26_v8 = vmul.f32 %v1185_v1, %v1185_v1  ;;  %v91_v56 = vshrl.u32 %v90_v55, 7 }
   0x3   :  { %v28_v9 = vmul.f32 %v1199_v5, %v1199_v5  ;;  %v1074_v10 = vld [vmem:[%s1729_s1 + $0x1c] ss:$12 sps:$4 sm:$0xff]   ;;  %v1076_v11 = vld [vmem:[%s1729_s1 + $0x18] ss:$12 sps:$4 sm:$0xff]   ;;  %233 = vmatprep.subr.bf16.mxu0 %v1071_v6  ;;  %v1077_v12 = vld [vmem:[%s1729_s1 + $0x34] ss:$12 sps:$4 sm:$0xff]  }
   0x4   :  { %29 = vadd.xlane.f32.xlu0 %v25_v3  ;;  %33 = vadd.xlane.f32.xlu1 %v27_v4  ;;  %v1079_v13 = vld [vmem:[%s1729_s1 + $0x30] ss:$12 sps:$4 sm:$0xff]   ;;  %v1080_v14 = vld [vmem:[%s1729_s1 + $0x4c] ss:$12 sps:$4 sm:$0xff]   ;;  %v1082_v15 = vld [vmem:[%s1729_s1 + $0x48] ss:$12 sps:$4 sm:$0xff]  }
   0x5   :  { %234 = vmatpush1.bf16.msra.mxu0 %v1073_v7  ;;  %v1083_v16 = vld [vmem:[%s1729_s1 + $0x64] ss:$12 sps:$4 sm:$0xff]   ;;  %v1085_v17 = vld [vmem:[%s1729_s1 + $0x60] ss:$12 sps:$4 sm:$0xff]   ;;  %v1086_v18 = vld [vmem:[%s1729_s1 + $0x7c] ss:$12 sps:$4 sm:$0xff]  }
   0x6   :  { %235 = vmatprep.subr.bf16.mxu0 %v1074_v10  ;;  %v1088_v19 = vld [vmem:[%s1729_s1 + $0x78] ss:$12 sps:$4 sm:$0xff]   ;;  %v1089_v20 = vld [vmem:[%s1729_s1 + $0x94] ss:$12 sps:$4 sm:$0xff]   ;;  %v1091_v22 = vld [vmem:[%s1729_s1 + $0x90] ss:$12 sps:$4 sm:$0xff]  }
   0x7   :  { %v1092_v23 = vld [vmem:[%s1729_s1 + $0xac] ss:$12 sps:$4 sm:$0xff]   ;;  %v1094_v24 = vld [vmem:[%s1729_s1 + $0xa8] ss:$12 sps:$4 sm:$0xff]   ;;  %v1098_v28 = vld [vmem:[%s1729_s1 + $0x50] ss:$12 sps:$4 sm:$0xff]  }
   0x8   :  { %31 = vadd.xlane.f32.xlu0 %v26_v8  ;;  %35 = vadd.xlane.f32.xlu1 %v28_v9  ;;  %v1095_v25 = vld [vmem:[%s1729_s1 + $0x8] ss:$12 sps:$4 sm:$0xff]   ;;  %v1096_v26 = vld [vmem:[%s1729_s1 + $0x20] ss:$12 sps:$4 sm:$0xff]   ;;  %v1097_v27 = vld [vmem:[%s1729_s1 + $0x38] ss:$12 sps:$4 sm:$0xff]  }
   0x9   :  { %236 = vmatpush1.bf16.msra.mxu0 %v1076_v11  ;;  %1047 = vmatprep.subr.bf16.mxu1 %v1095_v25  ;;  %v1099_v29 = vld [vmem:[%s1729_s1 + $0x68] ss:$12 sps:$4 sm:$0xff]   ;;  %v1100_v30 = vld [vmem:[%s1729_s1 + $0x80] ss:$12 sps:$4 sm:$0xff]   ;;  %v1101_v31 = vld [vmem:[%s1729_s1 + $0x98] ss:$12 sps:$4 sm:$0xff]  }
   0xa   :  { %237 = vmatprep.subr.bf16.mxu0 %v1077_v12  ;;  %1048 = vmatpush3.bf16.msra.mxu1 %v1095_v25  ;;  %v1102_v32 = vld [vmem:[%s1729_s1 + $0xb0] ss:$12 sps:$4 sm:$0xff]   ;;  %v1281_v57 = vsub.s32 0, %v91_v56  ;;  %v88_v58 = vld [vmem:[%s1730_s2] sm:$0x7]  ;;  %v100_v59 = vsub.s32 2, %v91_v56 }
   0xb   :  { %1049 = vmatprep.subr.bf16.mxu1 %v1096_v26  ;;  %v1286_v60 = vsub.s32 1, %v91_v56  ;;  %s1144_s2 = smov 64  }
   0xc   :  { %v93_v61 = vrot.slane %v88_v58, %v1281_v57  ;;  %v101_v62 = vrot.slane %v88_v58, %v100_v59 }
   0xd   :  { %238 = vmatpush1.bf16.msra.mxu0 %v1079_v13  ;;  %v97_v63 = vrot.slane %v88_v58, %v1286_v60 }
   0xe   :  { %239 = vmatprep.subr.bf16.mxu0 %v1080_v14  ;;  %1050 = vmatpush3.bf16.msra.mxu1 %v1096_v26 }
   0xf   :  { %1051 = vmatprep.subr.bf16.mxu1 %v1097_v27 }
  0x11   :  { %240 = vmatpush1.bf16.msra.mxu0 %v1082_v15 }
  0x12   :  { %241 = vmatprep.subr.bf16.mxu0 %v1083_v16  ;;  %1052 = vmatpush3.bf16.msra.mxu1 %v1097_v27 }
  0x13   :  { %1053 = vmatprep.subr.bf16.mxu1 %v1098_v28 }
  0x15   :  { %242 = vmatpush1.bf16.msra.mxu0 %v1085_v17 }
  0x16   :  { %243 = vmatprep.subr.bf16.mxu0 %v1086_v18  ;;  %1054 = vmatpush3.bf16.msra.mxu1 %v1098_v28 }
  0x17   :  { %1055 = vmatprep.subr.bf16.mxu1 %v1099_v29 }
  0x19   :  { %244 = vmatpush1.bf16.msra.mxu0 %v1088_v19 }
  0x1a   :  { %245 = vmatprep.subr.bf16.mxu0 %v1089_v20  ;;  %1056 = vmatpush3.bf16.msra.mxu1 %v1099_v29 }
  0x1b   :  { %1057 = vmatprep.subr.bf16.mxu1 %v1100_v30 }
  0x1d   :  { %246 = vmatpush1.bf16.msra.mxu0 %v1091_v22 }
  0x1e   :  { %247 = vmatprep.subr.bf16.mxu0 %v1092_v23  ;;  %1058 = vmatpush3.bf16.msra.mxu1 %v1100_v30 }
  0x1f   :  { %1059 = vmatprep.subr.bf16.mxu1 %v1101_v31 }
  0x21   :  { %248 = vmatpush1.bf16.msra.mxu0 %v1094_v24 }
  0x22   :  { %1060 = vmatpush3.bf16.msra.mxu1 %v1101_v31 }
  0x23   :  { %1061 = vmatprep.subr.bf16.mxu1 %v1102_v32 }
  0x26   :  { %1062 = vmatpush3.bf16.msra.mxu1 %v1102_v32 }
  0x91   :  { %v30_v33 = vpop.xlane.xlu0 %29  ;;  %v34_v34 = vpop.xlane.xlu1 %33 }
  0x92   :  { %v38_v35 = vmul.f32 0.0078125, %v30_v33  ;;  %v40_v36 = vmul.f32 0.0078125, %v34_v34 }
  0x94   :  { %v42_v37 = vadd.f32 1.1920929e-07, %v38_v35  ;;  %v44_v38 = vadd.f32 1.1920929e-07, %v40_v36 }
  0x95   :  { %v32_v39 = vpop.xlane.xlu0 %31  ;;  %v36_v40 = vpop.xlane.xlu1 %35 }
  0x96   :  { %v39_v41 = vmul.f32 0.0078125, %v32_v39  ;;  %v41_v42 = vmul.f32 0.0078125, %v36_v40  ;;  %1103 = vrsqrt.f32 %v44_v38  ;;  %v356_v38 = vld [vmem:[%s1732_s4] sm:$0x3] }
  0x97   :  { %1105 = vrsqrt.f32 %v42_v37  ;;  %v1344_v39 = vrot.slane %v356_v38, %v1281_v57  ;;  %v692_v40 = vrot.slane %v356_v38, %v1286_v60 }
  0x98   :  { %v43_v43 = vadd.f32 1.1920929e-07, %v39_v41  ;;  %v45_v44 = vadd.f32 1.1920929e-07, %v41_v42  ;;  %v355_v41 = vld [vmem:[%s1733_s3] sm:$0x3] }
  0x99   :  { %v1354_v42 = vrot.slane %v355_v41, %v1281_v57  ;;  %v680_v59 = vrot.slane %v355_v41, %v1286_v60 }
  0x9a   :  { %1107 = vrsqrt.f32 %v43_v43 }
  0x9b   :  { %1109 = vrsqrt.f32 %v45_v44 }
  0xa0   :  { %v1104_v45 = vpop.eup %1103 }
  0xa1   :  { %v1106_v46 = vpop.eup %1105  ;;  %v52_v48 = vmul.f32 %v1104_v45, %v1190_v2 }
  0xa2   :  { %v50_v50 = vmul.f32 %v1106_v46, %v1180_v0 }
  0xa4   :  { %v1108_v47 = vpop.eup %1107 }
  0xa5   :  { %v1110_v49 = vpop.eup %1109  ;;  %v51_v51 = vmul.f32 %v1108_v47, %v1185_v1 }
  0xa6   :  { %v53_v52 = vmul.f32 %v1110_v49, %v1199_v5 }
  0xa7   :  { %v54_v53 = vpack.c.bf16 %v51_v51, %v50_v50 }
  0xa8   :  { %v55_v54 = vpack.c.bf16 %v53_v52, %v52_v48 }
  0xa9   :  { %266 = vmatmul.mubr.bf16.vlgmr.msra.gmra.mrb[0].mxu0 %v54_v53  ;;  %1063 = vmatprep.mubr.bf16.mxu1 %v54_v53 }
  0xaa   :  { %275 = vmatprep.mubr.bf16.mxu0 %v1143_v21  ;;  %1064 = vmatmul.mubr.bf16.vlgmr.msra.gmra.mrb[0].mxu1 %v55_v54 }
  0xb1   :  { %276 = vmatmul.mubr.bf16.gmra.mrb[4].mxu0 %v55_v54 }
 0x17c   :  { %v267_v0 = vpop.f32.mrb[0].mxu0 }
 0x17d   :  { %v1290_v1 = vadd.f32 %v267_v0, %v93_v61  ;;  %v269_v2 = vpop.f32.mrb[1].mxu0  ;;  %v1065_v3 = vpop.f32.mrb[0].mxu1 }
 0x17e   :  { %v271_v4 = vpop.f32.mrb[2].mxu0  ;;  %v329_v5 = vadd.f32 %v1065_v3, %v101_v62  ;;  %v320_v6 = vpop.f32.mrb[1].mxu1  ;;  %v1292_v7 = vadd.f32 %v269_v2, %v97_v63 }
 0x17f   :  { %v1294_v8 = vadd.f32 %v271_v4, %v93_v61  ;;  %v273_v9 = vpop.f32.mrb[3].mxu0  ;;  %v357_v10 = vmul.f32 %v1290_v1, %v1290_v1  ;;  %v321_v11 = vadd.f32 %v320_v6, %v101_v62  ;;  %v1066_v12 = vpop.f32.mrb[2].mxu1 }
 0x180   :  { %v1003_v13 = vpack.c.bf16 %v329_v5, %v329_v5  ;;  %v332_v14 = vadd.f32 %v1066_v12, %v101_v62  ;;  %v323_v15 = vpop.f32.mrb[3].mxu1  ;;  %v1298_v16 = vadd.f32 %v273_v9, %v97_v63  ;;  %v505_v21 = vmul.f32 %v1292_v7, %v1292_v7 }
 0x181   :  { %637 = vrot.lane.b32.xlu0 %v357_v10, %s1144_s2  ;;  %v358_v17 = vmul.f32 %v1294_v8, %v1294_v8  ;;  %v1001_v18 = vpack.c.bf16 %v321_v11, %v321_v11  ;;  %v324_v19 = vadd.f32 %v323_v15, %v101_v62  ;;  %v362_v30 = vsel %vm361_vm0, %v357_v10, 0.0 }
 0x182   :  { %353 = vst [vmem:[%s1731_s5 + $0x20] sm:$0xf] %v1003_v13  ;;  %v1004_v20 = vpack.c.bf16 %v332_v14, %v332_v14  ;;  %v506_v24 = vmul.f32 %v1298_v16, %v1298_v16  ;;  %v509_v36 = vsel %vm361_vm0, %v505_v21, 0.0 }
 0x183   :  { %639 = vrot.lane.b32.xlu1 %v358_v17, %s1144_s2  ;;  %351 = vst [vmem:[%s1731_s5 + $0x8] sm:$0xf] %v1001_v18  ;;  %v1002_v22 = vpack.c.bf16 %v324_v19, %v324_v19  ;;  %v365_v31 = vsel %vm361_vm0, %v358_v17, 0.0 }
 0x184   :  { %v277_v23 = vpop.f32.mrb[4].mxu0  ;;  %354 = vst [vmem:[%s1731_s5 + $0x2c] sm:$0xf] %v1004_v20  ;;  %v512_v37 = vsel %vm361_vm0, %v506_v24, 0.0 }
 0x185   :  { %801 = vrot.lane.b32.xlu0 %v505_v21, %s1144_s2  ;;  %v279_v25 = vpop.f32.mrb[5].mxu0  ;;  %352 = vst [vmem:[%s1731_s5 + $0x14] sm:$0xf] %v1002_v22  ;;  %v1330_v33 = vadd.f32 %v277_v23, %v93_v61 }
 0x186   :  { %v281_v26 = vpop.f32.mrb[6].mxu0  ;;  %v1328_v32 = vadd.f32 %v279_v25, %v97_v63 }
 0x187   :  { %803 = vrot.lane.b32.xlu1 %v506_v24, %s1144_s2  ;;  %v1322_v27 = vadd.f32 %v281_v26, %v93_v61  ;;  %v283_v28 = vpop.f32.mrb[7].mxu0  ;;  %v359_v35 = vmul.f32 %v1330_v33, %v1330_v33 }
 0x188   :  { %v1324_v29 = vadd.f32 %v283_v28, %v97_v63  ;;  %v507_v34 = vmul.f32 %v1328_v32, %v1328_v32 }
 0x189   :  { %v360_v43 = vmul.f32 %v1322_v27, %v1322_v27  ;;  %v368_v45 = vsel %vm361_vm0, %v359_v35, 0.0 }
 0x18a   :  { %v508_v44 = vmul.f32 %v1324_v29, %v1324_v29  ;;  %v515_v46 = vsel %vm361_vm0, %v507_v34, 0.0 }
 0x18b   :  { %v371_v48 = vsel %vm361_vm0, %v360_v43, 0.0 }
 0x18c   :  { %v518_v53 = vsel %vm361_vm0, %v508_v44, 0.0 }
 0x1a4   :  { %363 = vadd.xlane.f32.xlu0 %v362_v30 }
 0x1ab   :  { %366 = vadd.xlane.f32.xlu1 %v365_v31 }
 0x1ba   :  { %805 = vrot.lane.b32.xlu0 %v507_v34, %s1144_s2 }
 0x1bc   :  { %641 = vrot.lane.b32.xlu1 %v359_v35, %s1144_s2 }
 0x1d9   :  { %510 = vadd.xlane.f32.xlu0 %v509_v36 }
 0x1e0   :  { %513 = vadd.xlane.f32.xlu1 %v512_v37 }
 0x1ef   :  { %404 = vrot.lane.b32.xlu0 %v1344_v39, %s1145_s7 }
 0x1f1   :  { %694 = vrot.lane.b32.xlu1 %v692_v40, %s1146_s8 }
 0x1f3   :  { %v638_v47 = vpop.permute.xlu0 %637 }
 0x1f4   :  { %v649_v49 = vsel %vm361_vm0, %v638_v47, 0.0 }
 0x1f5   :  { %749 = vrot.lane.b32.xlu1 %v692_v40, %s1144_s2  ;;  %v640_v52 = vpop.permute.xlu1 %639 }
 0x1f6   :  { %v652_v54 = vsel %vm361_vm0, %v640_v52, 0.0 }
 0x1f7   :  { %v802_v50 = vpop.permute.xlu0 %801 }
 0x1f8   :  { %v813_v51 = vsel %vm361_vm0, %v802_v50, 0.0 }
 0x1f9   :  { %453 = vrot.lane.b32.xlu1 %v1354_v42, %s1145_s7  ;;  %v804_v55 = vpop.permute.xlu1 %803 }
 0x1fa   :  { %v816_v56 = vsel %vm361_vm0, %v804_v55, 0.0 }
 0x1fd   :  { %643 = vrot.lane.b32.xlu1 %v360_v43, %s1144_s2 }
 0x201   :  { %807 = vrot.lane.b32.xlu1 %v508_v44, %s1144_s2 }
 0x20e   :  { %369 = vadd.xlane.f32.xlu0 %v368_v45 }
 0x212   :  { %516 = vadd.xlane.f32.xlu0 %v515_v46 }
 0x216   :  { %372 = vadd.xlane.f32.xlu0 %v371_v48 }
 0x21a   :  { %650 = vadd.xlane.f32.xlu0 %v649_v49 }
 0x21e   :  { %814 = vadd.xlane.f32.xlu0 %v813_v51 }
 0x225   :  { %519 = vadd.xlane.f32.xlu1 %v518_v53 }
 0x229   :  { %653 = vadd.xlane.f32.xlu1 %v652_v54 }
 0x22d   :  { %817 = vadd.xlane.f32.xlu1 %v816_v56 }
 0x231   :  { %v364_v57 = vpop.xlane.xlu0 %363 }
 0x232   :  { %v375_v0 = vmul.f32 0.015625, %v364_v57 }
 0x234   :  { %v379_v3 = vadd.f32 1.1920929e-07, %v375_v0 }
 0x235   :  { %v806_v63 = vpop.permute.xlu0 %805 }
 0x236   :  { %v819_v2 = vsel %vm361_vm0, %v806_v63, 0.0  ;;  %1111 = vrsqrt.f32 %v379_v3 }
 0x238   :  { %v367_v58 = vpop.xlane.xlu1 %366 }
 0x239   :  { %v376_v10 = vmul.f32 0.015625, %v367_v58 }
 0x23b   :  { %v380_v12 = vadd.f32 1.1920929e-07, %v376_v10 }
 0x23c   :  { %v642_v61 = vpop.permute.xlu1 %641 }
 0x23d   :  { %v655_v62 = vsel %vm361_vm0, %v642_v61, 0.0 }
 0x23e   :  { %656 = vadd.xlane.f32.xlu0 %v655_v62  ;;  %742 = vrot.lane.b32.xlu1 %v680_v59, %s1146_s8 }
 0x240   :  { %v1112_v4 = vpop.eup %1111 }
 0x241   :  { %v1378_v5 = vmul.f32 %v1112_v4, %v1290_v1 }
 0x242   :  { %820 = vadd.xlane.f32.xlu0 %v819_v2 }
 0x243   :  { %v460_v60 = vmul.f32 %v1344_v39, %v1378_v5 }
 0x258   :  { %682 = vrot.lane.b32.xlu0 %v680_v59, %s1144_s2 }
 0x25c   :  { %468 = vrot.lane.b32.xlu0 %v460_v60, %s1145_s7 }
 0x266   :  { %v511_v6 = vpop.xlane.xlu0 %510 }
 0x267   :  { %v521_v9 = vmul.f32 0.015625, %v511_v6 }
 0x269   :  { %v525_v11 = vadd.f32 1.1920929e-07, %v521_v9 }
 0x26a   :  { %v1391_v19 = vpop.permute.xlu0 %404 }
 0x26b   :  { %1113 = vrsqrt.f32 %v525_v11  ;;  %v407_v36 = vmul.f32 %v1391_v19, %v1378_v5 }
 0x26c   :  { %1115 = vrsqrt.f32 %v380_v12 }
 0x26d   :  { %v514_v13 = vpop.xlane.xlu1 %513 }
 0x26e   :  { %v522_v30 = vmul.f32 0.015625, %v514_v13 }
 0x270   :  { %v526_v35 = vadd.f32 1.1920929e-07, %v522_v30 }
 0x271   :  { %v1384_v14 = vpop.permute.xlu1 %694 }
 0x272   :  { %1117 = vrsqrt.f32 %v526_v35 }
 0x275   :  { %v1114_v15 = vpop.eup %1113  ;;  %v1386_v17 = vpop.permute.xlu1 %749 }
 0x276   :  { %v1389_v18 = vmul.f32 %v1114_v15, %v1292_v7  ;;  %v1116_v22 = vpop.eup %1115 }
 0x277   :  { %v1403_v26 = vmul.f32 %v1116_v22, %v1294_v8 }
 0x278   :  { %v541_v20 = vmul.f32 %v1389_v18, %v1391_v19  ;;  %v589_v23 = vmul.f32 %v1389_v18, %v1344_v39 }
 0x279   :  { %v1395_v21 = vpop.permute.xlu1 %453  ;;  %v408_v28 = vmul.f32 %v1391_v19, %v1403_v26  ;;  %v461_v38 = vmul.f32 %v1344_v39, %v1403_v26 }
 0x27a   :  { %549 = vrot.lane.b32.xlu0 %v541_v20, %s1146_s8 }
 0x27c   :  { %v1118_v37 = vpop.eup %1117 }
 0x27d   :  { %v644_v24 = vpop.permute.xlu1 %643  ;;  %v1415_v40 = vmul.f32 %v1118_v37, %v1298_v16 }
 0x27e   :  { %597 = vrot.lane.b32.xlu0 %v589_v23, %s1145_s7  ;;  %v658_v25 = vsel %vm361_vm0, %v644_v24, 0.0 }
 0x27f   :  { %659 = vadd.xlane.f32.xlu1 %v658_v25  ;;  %v542_v41 = vmul.f32 %v1415_v40, %v1391_v19  ;;  %v590_v46 = vmul.f32 %v1415_v40, %v1344_v39 }
 0x281   :  { %v808_v31 = vpop.permute.xlu1 %807 }
 0x282   :  { %417 = vrot.lane.b32.xlu0 %v408_v28, %s1146_s8  ;;  %v822_v34 = vsel %vm361_vm0, %v808_v31, 0.0 }
 0x283   :  { %823 = vadd.xlane.f32.xlu1 %v822_v34 }
 0x294   :  { %415 = vrot.lane.b32.xlu1 %v407_v36, %s1146_s8 }
 0x298   :  { %470 = vrot.lane.b32.xlu1 %v461_v38, %s1145_s7 }
 0x29b   :  { %v370_v43 = vpop.xlane.xlu0 %369 }
 0x29c   :  { %v377_v44 = vmul.f32 0.015625, %v370_v43  ;;  %551 = vrot.lane.b32.xlu1 %v542_v41, %s1146_s8 }
 0x29e   :  { %v381_v45 = vadd.f32 1.1920929e-07, %v377_v44 }
 0x29f   :  { %v517_v47 = vpop.xlane.xlu0 %516 }
 0x2a0   :  { %1119 = vrsqrt.f32 %v381_v45  ;;  %v523_v48 = vmul.f32 0.015625, %v517_v47  ;;  %599 = vrot.lane.b32.xlu1 %v590_v46, %s1145_s7 }
 0x2a2   :  { %v527_v49 = vadd.f32 1.1920929e-07, %v523_v48 }
 0x2a3   :  { %v373_v50 = vpop.xlane.xlu0 %372 }
 0x2a4   :  { %1121 = vrsqrt.f32 %v527_v49  ;;  %v378_v51 = vmul.f32 0.015625, %v373_v50 }
 0x2a6   :  { %v382_v52 = vadd.f32 1.1920929e-07, %v378_v51 }
 0x2a7   :  { %v651_v53 = vpop.xlane.xlu0 %650 }
 0x2a8   :  { %1123 = vrsqrt.f32 %v382_v52  ;;  %v661_v54 = vmul.f32 0.015625, %v651_v53 }
 0x2aa   :  { %v1120_v55 = vpop.eup %1119  ;;  %v665_v56 = vadd.f32 1.1920929e-07, %v661_v54 }
 0x2ab   :  { %v815_v57 = vpop.xlane.xlu0 %814  ;;  %v1425_v58 = vmul.f32 %v1120_v55, %v1330_v33 }
 0x2ac   :  { %1125 = vrsqrt.f32 %v665_v56  ;;  %v825_v59 = vmul.f32 0.015625, %v815_v57 }
 0x2ad   :  { %v462_v61 = vmul.f32 %v1344_v39, %v1425_v58  ;;  %v409_v62 = vmul.f32 %v1391_v19, %v1425_v58 }
 0x2ae   :  { %v1122_v63 = vpop.eup %1121  ;;  %v829_v0 = vadd.f32 1.1920929e-07, %v825_v59 }
 0x2af   :  { %472 = vrot.lane.b32.xlu0 %v462_v61, %s1145_s7  ;;  %419 = vrot.lane.b32.xlu1 %v409_v62, %s1146_s8  ;;  %v1434_v2 = vmul.f32 %v1122_v63, %v1328_v32 }
 0x2b0   :  { %1127 = vrsqrt.f32 %v829_v0  ;;  %v537_v0 = vmul.f32 %v1389_v18, %v1354_v42 }
 0x2b1   :  { %v543_v3 = vmul.f32 %v1434_v2, %v1391_v19  ;;  %v591_v11 = vmul.f32 %v1434_v2, %v1344_v39 }
 0x2b2   :  { %v1124_v4 = vpop.eup %1123  ;;  %v520_v60 = vpop.xlane.xlu1 %519 }
 0x2b3   :  { %v524_v6 = vmul.f32 0.015625, %v520_v60  ;;  %553 = vrot.lane.b32.xlu0 %v543_v3, %s1146_s8  ;;  %v1440_v9 = vmul.f32 %v1124_v4, %v1322_v27 }
 0x2b5   :  { %v528_v10 = vadd.f32 1.1920929e-07, %v524_v6  ;;  %v463_v12 = vmul.f32 %v1344_v39, %v1440_v9  ;;  %v410_v23 = vmul.f32 %v1391_v19, %v1440_v9  ;;  %v585_v6 = vmul.f32 %v1389_v18, %v1395_v21 }
 0x2b6   :  { %v1126_v13 = vpop.eup %1125  ;;  %v654_v15 = vpop.xlane.xlu1 %653 }
 0x2b7   :  { %1129 = vrsqrt.f32 %v528_v10  ;;  %v662_v20 = vmul.f32 0.015625, %v654_v15  ;;  %601 = vrot.lane.b32.xlu0 %v591_v11, %s1145_s7  ;;  %474 = vrot.lane.b32.xlu1 %v463_v12, %s1145_s7  ;;  %v1451_v24 = vmul.f32 %v1126_v13, %v1290_v1  ;;  %v396_v12 = vmul.f32 %v1354_v42, %v1403_v26 }
 0x2b9   :  { %v666_v22 = vadd.f32 1.1920929e-07, %v662_v20  ;;  %v752_v31 = vmul.f32 %v1386_v17, %v1451_v24  ;;  %v697_v47 = vmul.f32 %v1384_v14, %v1451_v24 }
 0x2ba   :  { %v1128_v25 = vpop.eup %1127  ;;  %v818_v28 = vpop.xlane.xlu1 %817 }
 0x2bb   :  { %1131 = vrsqrt.f32 %v666_v22  ;;  %v826_v30 = vmul.f32 0.015625, %v818_v28  ;;  %421 = vrot.lane.b32.xlu0 %v410_v23, %s1146_s8  ;;  %v1457_v34 = vmul.f32 %v1128_v25, %v1292_v7 }
 0x2bd   :  { %v830_v35 = vadd.f32 1.1920929e-07, %v826_v30  ;;  %v845_v1 = vmul.f32 %v1457_v34, %v1384_v14  ;;  %v893_v7 = vmul.f32 %v1457_v34, %v1386_v17 }
 0x2be   :  { %v1531_v20 = vpop.permute.xlu1 %742 }
 0x2bf   :  { %760 = vrot.lane.b32.xlu0 %v752_v31, %s1145_s7  ;;  %1133 = vrsqrt.f32 %v830_v35  ;;  %v456_v31 = vmul.f32 %v1395_v21, %v1378_v5 }
 0x2c1   :  { %v1130_v36 = vpop.eup %1129 }
 0x2c2   :  { %v1463_v37 = vmul.f32 %v1130_v36, %v1324_v29  ;;  %v395_v36 = vmul.f32 %v1354_v42, %v1378_v5 }
 0x2c3   :  { %853 = vrot.lane.b32.xlu0 %v845_v1, %s1146_s8 }
 0x2c4   :  { %v544_v38 = vmul.f32 %v1463_v37, %v1391_v19  ;;  %v592_v44 = vmul.f32 %v1463_v37, %v1344_v39 }
 0x2c5   :  { %v1132_v41 = vpop.eup %1131 }
 0x2c6   :  { %555 = vrot.lane.b32.xlu1 %v544_v38, %s1146_s8  ;;  %v1472_v43 = vmul.f32 %v1132_v41, %v1294_v8 }
 0x2c7   :  { %901 = vrot.lane.b32.xlu0 %v893_v7, %s1145_s7 }
 0x2c8   :  { %v698_v45 = vmul.f32 %v1384_v14, %v1472_v43  ;;  %v753_v39 = vmul.f32 %v1386_v17, %v1472_v43 }
 0x2c9   :  { %v1134_v48 = vpop.eup %1133 }
 0x2ca   :  { %603 = vrot.lane.b32.xlu1 %v592_v44, %s1145_s7  ;;  %v1487_v51 = vmul.f32 %v1134_v48, %v1298_v16  ;;  %v457_v44 = vmul.f32 %v1395_v21, %v1403_v26  ;;  %v538_v48 = vmul.f32 %v1415_v40, %v1354_v42 }
 0x2cb   :  { %707 = vrot.lane.b32.xlu0 %v698_v45, %s1146_s8  ;;  %v657_v19 = vpop.xlane.xlu0 %656 }
 0x2cc   :  { %v663_v46 = vmul.f32 0.015625, %v657_v19  ;;  %v846_v53 = vmul.f32 %v1487_v51, %v1384_v14  ;;  %v894_v54 = vmul.f32 %v1487_v51, %v1386_v17 }
 0x2ce   :  { %v667_v8 = vadd.f32 1.1920929e-07, %v663_v46  ;;  %705 = vrot.lane.b32.xlu1 %v697_v47, %s1146_s8 }
 0x2cf   :  { %v821_v49 = vpop.xlane.xlu0 %820 }
 0x2d0   :  { %1135 = vrsqrt.f32 %v667_v8  ;;  %v827_v50 = vmul.f32 0.015625, %v821_v49 }
 0x2d2   :  { %v831_v52 = vadd.f32 1.1920929e-07, %v827_v50  ;;  %762 = vrot.lane.b32.xlu1 %v753_v39, %s1145_s7 }
 0x2d3   :  { %v1510_v63 = vpop.permute.xlu0 %682 }
 0x2d4   :  { %1137 = vrsqrt.f32 %v831_v52 }
 0x2d6   :  { %855 = vrot.lane.b32.xlu1 %v846_v53, %s1146_s8 }
 0x2da   :  { %v1136_v55 = vpop.eup %1135  ;;  %903 = vrot.lane.b32.xlu1 %v894_v54, %s1145_s7  ;;  %v586_v54 = vmul.f32 %v1415_v40, %v1395_v21 }
 0x2db   :  { %v1497_v56 = vmul.f32 %v1136_v55, %v1330_v33  ;;  %v469_v33 = vpop.permute.xlu0 %468 }
 0x2dc   :  { %v480_v1 = vsub.f32 %v456_v31, %v469_v33 }
 0x2dd   :  { %v754_v16 = vmul.f32 %v1386_v17, %v1497_v56  ;;  %v699_v57 = vmul.f32 %v1384_v14, %v1497_v56 }
 0x2de   :  { %v1138_v59 = vpop.eup %1137  ;;  %v1009_v45 = vpack.c.bf16 %v480_v1, %v480_v1 }
 0x2df   :  { %764 = vrot.lane.b32.xlu0 %v754_v16, %s1145_s7  ;;  %709 = vrot.lane.b32.xlu1 %v699_v57, %s1146_s8  ;;  %v1506_v61 = vmul.f32 %v1138_v59, %v1328_v32  ;;  %v458_v59 = vmul.f32 %v1395_v21, %v1425_v58 }
 0x2e1   :  { %v847_v62 = vmul.f32 %v1506_v61, %v1384_v14 }
 0x2e3   :  { %857 = vrot.lane.b32.xlu0 %v847_v62, %s1146_s8  ;;  %v895_v62 = vmul.f32 %v1506_v61, %v1386_v17 }
 0x2ec   :  { %v550_v3 = vpop.permute.xlu0 %549 }
 0x2ed   :  { %v561_v4 = vadd.f32 %v550_v3, %v537_v0 }
 0x2ef   :  { %v1013_v60 = vpack.c.bf16 %v561_v4, %v561_v4  ;;  %v539_v4 = vmul.f32 %v1434_v2, %v1354_v42 }
 0x2f0   :  { %v598_v32 = vpop.permute.xlu0 %597 }
 0x2f1   :  { %581 = vst.msk [vmem:[%s1731_s5 + $0x4] sm:$0xf] %vm447_vm1, %v1013_v60  ;;  %v609_v10 = vsub.f32 %v585_v6, %v598_v32 }
 0x2f3   :  { %v1017_v11 = vpack.c.bf16 %v609_v10, %v609_v10 }
 0x2f4   :  { %v418_v13 = vpop.permute.xlu0 %417 }
 0x2f5   :  { %629 = vst.msk [vmem:[%s1731_s5 + $0x4] sm:$0xf] %vm500_vm2, %v1017_v11  ;;  %v428_v15 = vadd.f32 %v418_v13, %v396_v12  ;;  %v587_v12 = vmul.f32 %v1434_v2, %v1395_v21  ;;  %v459_v2 = vmul.f32 %v1395_v21, %v1440_v9 }
 0x2f7   :  { %v1006_v18 = vpack.c.bf16 %v428_v15, %v428_v15 }
 0x2f9   :  { %449 = vst.msk [vmem:[%s1731_s5 + $0xc] sm:$0xf] %vm447_vm1, %v1006_v18 }
 0x30c   :  { %v660_v22 = vpop.xlane.xlu1 %659 }
 0x30d   :  { %v664_v23 = vmul.f32 0.015625, %v660_v22  ;;  %v398_v22 = vmul.f32 %v1354_v42, %v1440_v9  ;;  %v841_v9 = vmul.f32 %v1457_v34, %v1510_v63 }
 0x30f   :  { %v668_v25 = vadd.f32 1.1920929e-07, %v664_v23 }
 0x310   :  { %v824_v28 = vpop.xlane.xlu1 %823 }
 0x311   :  { %1139 = vrsqrt.f32 %v668_v25  ;;  %v828_v30 = vmul.f32 0.015625, %v824_v28 }
 0x313   :  { %v832_v35 = vadd.f32 1.1920929e-07, %v828_v30 }
 0x314   :  { %v416_v38 = vpop.permute.xlu1 %415 }
 0x315   :  { %1141 = vrsqrt.f32 %v832_v35  ;;  %v427_v41 = vadd.f32 %v416_v38, %v395_v36  ;;  %v540_v38 = vmul.f32 %v1463_v37, %v1354_v42 }
 0x317   :  { %v1005_v7 = vpack.c.bf16 %v427_v41, %v427_v41 }
 0x318   :  { %v471_v19 = vpop.permute.xlu1 %470 }
 0x319   :  { %448 = vst.msk [vmem:[%s1731_s5] sm:$0xf] %vm447_vm1, %v1005_v7  ;;  %v481_v46 = vsub.f32 %v457_v44, %v471_v19  ;;  %v889_v44 = vmul.f32 %v1457_v34, %v1531_v20 }
 0x31a   :  { %501 = vst.msk [vmem:[%s1731_s5] sm:$0xf] %vm500_vm2, %v1009_v45 }
 0x31b   :  { %v1140_v5 = vpop.eup %1139  ;;  %v1010_v47 = vpack.c.bf16 %v481_v46, %v481_v46 }
 0x31c   :  { %v552_v8 = vpop.permute.xlu1 %551  ;;  %v1550_v26 = vmul.f32 %v1140_v5, %v1322_v27 }
 0x31d   :  { %502 = vst.msk [vmem:[%s1731_s5 + $0xc] sm:$0xf] %vm500_vm2, %v1010_v47  ;;  %v562_v49 = vadd.f32 %v552_v8, %v538_v48  ;;  %v588_v47 = vmul.f32 %v1463_v37, %v1395_v21  ;;  %v686_v8 = vmul.f32 %v1510_v63, %v1472_v43 }
 0x31e   :  { %v755_v50 = vmul.f32 %v1386_v17, %v1550_v26  ;;  %v700_v39 = vmul.f32 %v1384_v14, %v1550_v26 }
 0x31f   :  { %v1142_v52 = vpop.eup %1141  ;;  %v1014_v53 = vpack.c.bf16 %v562_v49, %v562_v49 }
 0x320   :  { %v600_v55 = vpop.permute.xlu1 %599  ;;  %766 = vrot.lane.b32.xlu1 %v755_v50, %s1145_s7  ;;  %711 = vrot.lane.b32.xlu0 %v700_v39, %s1146_s8  ;;  %v1565_v27 = vmul.f32 %v1142_v52, %v1324_v29  ;;  %v397_v29 = vmul.f32 %v1354_v42, %v1425_v58  ;;  %v745_v50 = vmul.f32 %v1531_v20, %v1451_v24 }
 0x321   :  { %582 = vst.msk [vmem:[%s1731_s5 + $0x10] sm:$0xf] %vm447_vm1, %v1014_v53  ;;  %v610_v16 = vsub.f32 %v586_v54, %v600_v55  ;;  %v473_v57 = vpop.permute.xlu0 %472  ;;  %v685_v39 = vmul.f32 %v1510_v63, %v1451_v24 }
 0x322   :  { %v848_v40 = vmul.f32 %v1565_v27, %v1384_v14  ;;  %v482_v0 = vsub.f32 %v458_v59, %v473_v57  ;;  %v896_v58 = vmul.f32 %v1565_v27, %v1386_v17  ;;  %v746_v57 = vmul.f32 %v1531_v20, %v1472_v43 }
 0x323   :  { %v1018_v33 = vpack.c.bf16 %v610_v16, %v610_v16 }
 0x324   :  { %v420_v3 = vpop.permute.xlu1 %419  ;;  %859 = vrot.lane.b32.xlu1 %v848_v40, %s1146_s8  ;;  %905 = vrot.lane.b32.xlu0 %v895_v62, %s1145_s7  ;;  %v1011_v10 = vpack.c.bf16 %v482_v0, %v482_v0 }
 0x325   :  { %630 = vst.msk [vmem:[%s1731_s5 + $0x10] sm:$0xf] %vm500_vm2, %v1018_v33  ;;  %v429_v14 = vadd.f32 %v420_v3, %v397_v29  ;;  %v554_v60 = vpop.permute.xlu0 %553  ;;  %v842_v33 = vmul.f32 %v1487_v51, %v1510_v63  ;;  %v890_v3 = vmul.f32 %v1487_v51, %v1531_v20 }
 0x326   :  { %v563_v6 = vadd.f32 %v554_v60, %v539_v4 }
 0x327   :  { %v1007_v32 = vpack.c.bf16 %v429_v14, %v429_v14 }
 0x328   :  { %v1015_v11 = vpack.c.bf16 %v563_v6, %v563_v6  ;;  %907 = vrot.lane.b32.xlu1 %v896_v58, %s1145_s7  ;;  %v687_v6 = vmul.f32 %v1510_v63, %v1497_v56  ;;  %v747_v58 = vmul.f32 %v1531_v20, %v1497_v56 }
 0x329   :  { %450 = vst.msk [vmem:[%s1731_s5 + $0x18] sm:$0xf] %vm447_vm1, %v1007_v32  ;;  %v602_v13 = vpop.permute.xlu0 %601  ;;  %v475_v17 = vpop.permute.xlu1 %474 }
 0x32a   :  { %503 = vst.msk [vmem:[%s1731_s5 + $0x18] sm:$0xf] %vm500_vm2, %v1011_v10  ;;  %v611_v15 = vsub.f32 %v587_v12, %v602_v13  ;;  %v483_v23 = vsub.f32 %v459_v2, %v475_v17  ;;  %v843_v17 = vmul.f32 %v1506_v61, %v1510_v63 }
 0x32b   :  { %583 = vst.msk [vmem:[%s1731_s5 + $0x1c] sm:$0xf] %vm447_vm1, %v1015_v11 }
 0x32c   :  { %v1019_v18 = vpack.c.bf16 %v611_v15, %v611_v15  ;;  %v1012_v31 = vpack.c.bf16 %v483_v23, %v483_v23 }
 0x32d   :  { %v422_v25 = vpop.permute.xlu0 %421 }
 0x32e   :  { %631 = vst.msk [vmem:[%s1731_s5 + $0x1c] sm:$0xf] %vm500_vm2, %v1019_v18  ;;  %v430_v28 = vadd.f32 %v422_v25, %v398_v22  ;;  %v748_v18 = vmul.f32 %v1531_v20, %v1550_v26  ;;  %v688_v22 = vmul.f32 %v1510_v63, %v1550_v26 }
 0x330   :  { %v1008_v30 = vpack.c.bf16 %v430_v28, %v430_v28 }
 0x331   :  { %v761_v35 = vpop.permute.xlu0 %760 }
 0x332   :  { %451 = vst.msk [vmem:[%s1731_s5 + $0x24] sm:$0xf] %vm447_vm1, %v1008_v30  ;;  %v772_v52 = vsub.f32 %v745_v50, %v761_v35 }
 0x333   :  { %504 = vst.msk [vmem:[%s1731_s5 + $0x24] sm:$0xf] %vm500_vm2, %v1012_v31 }
 0x334   :  { %v1025_v59 = vpack.c.bf16 %v772_v52, %v772_v52 }
 0x335   :  { %v854_v36 = vpop.permute.xlu0 %853 }
 0x336   :  { %v865_v1 = vadd.f32 %v854_v36, %v841_v9  ;;  %v844_v9 = vmul.f32 %v1565_v27, %v1510_v63  ;;  %v891_v36 = vmul.f32 %v1506_v61, %v1531_v20  ;;  %v892_v63 = vmul.f32 %v1565_v27, %v1531_v20 }
 0x338   :  { %v1029_v41 = vpack.c.bf16 %v865_v1, %v865_v1  ;;  %v556_v7 = vpop.permute.xlu1 %555 }
 0x339   :  { %v564_v45 = vadd.f32 %v556_v7, %v540_v38  ;;  %v902_v19 = vpop.permute.xlu0 %901 }
 0x33a   :  { %885 = vst.msk [vmem:[%s1731_s5 + $0x4] sm:$0xf] %vm737_vm3, %v1029_v41  ;;  %v913_v46 = vsub.f32 %v889_v44, %v902_v19 }
 0x33b   :  { %v1016_v5 = vpack.c.bf16 %v564_v45, %v564_v45 }
 0x33c   :  { %v1033_v48 = vpack.c.bf16 %v913_v46, %v913_v46  ;;  %v604_v42 = vpop.permute.xlu1 %603 }
 0x33d   :  { %584 = vst.msk [vmem:[%s1731_s5 + $0x28] sm:$0xf] %vm447_vm1, %v1016_v5  ;;  %v612_v34 = vsub.f32 %v588_v47, %v604_v42  ;;  %v708_v49 = vpop.permute.xlu0 %707 }
 0x33e   :  { %933 = vst.msk [vmem:[%s1731_s5 + $0x4] sm:$0xf] %vm792_vm4, %v1033_v48  ;;  %v718_v21 = vadd.f32 %v708_v49, %v686_v8 }
 0x33f   :  { %v1020_v37 = vpack.c.bf16 %v612_v34, %v612_v34 }
 0x340   :  { %v1022_v53 = vpack.c.bf16 %v718_v21, %v718_v21  ;;  %v706_v54 = vpop.permute.xlu1 %705 }
 0x341   :  { %632 = vst.msk [vmem:[%s1731_s5 + $0x28] sm:$0xf] %vm500_vm2, %v1020_v37  ;;  %v717_v55 = vadd.f32 %v706_v54, %v685_v39 }
 0x342   :  { %739 = vst.msk [vmem:[%s1731_s5 + $0xc] sm:$0xf] %vm737_vm3, %v1022_v53 }
 0x343   :  { %v1021_v16 = vpack.c.bf16 %v717_v55, %v717_v55 }
 0x344   :  { %v763_v24 = vpop.permute.xlu1 %762 }
 0x345   :  { %738 = vst.msk [vmem:[%s1731_s5] sm:$0xf] %vm737_vm3, %v1021_v16  ;;  %v773_v40 = vsub.f32 %v746_v57, %v763_v24 }
 0x346   :  { %793 = vst.msk [vmem:[%s1731_s5] sm:$0xf] %vm792_vm4, %v1025_v59 }
 0x347   :  { %v1026_v62 = vpack.c.bf16 %v773_v40, %v773_v40 }
 0x348   :  { %v856_v29 = vpop.permute.xlu1 %855 }
 0x349   :  { %794 = vst.msk [vmem:[%s1731_s5 + $0xc] sm:$0xf] %vm792_vm4, %v1026_v62  ;;  %v866_v43 = vadd.f32 %v856_v29, %v842_v33 }
 0x34b   :  { %v1030_v0 = vpack.c.bf16 %v866_v43, %v866_v43 }
 0x34c   :  { %v904_v4 = vpop.permute.xlu1 %903 }
 0x34d   :  { %886 = vst.msk [vmem:[%s1731_s5 + $0x10] sm:$0xf] %vm737_vm3, %v1030_v0  ;;  %v914_v14 = vsub.f32 %v890_v3, %v904_v4 }
 0x34f   :  { %v1034_v60 = vpack.c.bf16 %v914_v14, %v914_v14 }
 0x351   :  { %934 = vst.msk [vmem:[%s1731_s5 + $0x10] sm:$0xf] %vm792_vm4, %v1034_v60  ;;  %v710_v51 = vpop.permute.xlu1 %709  ;;  %v765_v32 = vpop.permute.xlu0 %764 }
 0x352   :  { %v719_v10 = vadd.f32 %v710_v51, %v687_v6  ;;  %v774_v11 = vsub.f32 %v747_v58, %v765_v32 }
 0x354   :  { %v1023_v12 = vpack.c.bf16 %v719_v10, %v719_v10  ;;  %v1027_v13 = vpack.c.bf16 %v774_v11, %v774_v11 }
 0x355   :  { %v858_v15 = vpop.permute.xlu0 %857 }
 0x356   :  { %740 = vst.msk [vmem:[%s1731_s5 + $0x18] sm:$0xf] %vm737_vm3, %v1023_v12  ;;  %v867_v56 = vadd.f32 %v858_v15, %v843_v17 }
 0x357   :  { %795 = vst.msk [vmem:[%s1731_s5 + $0x18] sm:$0xf] %vm792_vm4, %v1027_v13 }
 0x358   :  { %v1031_v2 = vpack.c.bf16 %v867_v56, %v867_v56 }
 0x35a   :  { %887 = vst.msk [vmem:[%s1731_s5 + $0x1c] sm:$0xf] %vm737_vm3, %v1031_v2 }
 0x392   :  { %v767_v23 = vpop.permute.xlu1 %766  ;;  %v712_v25 = vpop.permute.xlu0 %711 }
 0x393   :  { %v775_v28 = vsub.f32 %v748_v18, %v767_v23  ;;  %v720_v30 = vadd.f32 %v712_v25, %v688_v22 }
 0x395   :  { %v1028_v31 = vpack.c.bf16 %v775_v28, %v775_v28  ;;  %v1024_v35 = vpack.c.bf16 %v720_v30, %v720_v30 }
 0x396   :  { %v860_v1 = vpop.permute.xlu1 %859  ;;  %v906_v38 = vpop.permute.xlu0 %905 }
 0x397   :  { %741 = vst.msk [vmem:[%s1731_s5 + $0x24] sm:$0xf] %vm737_vm3, %v1024_v35  ;;  %v868_v26 = vadd.f32 %v860_v1, %v844_v9  ;;  %v915_v41 = vsub.f32 %v891_v36, %v906_v38 }
 0x398   :  { %796 = vst.msk [vmem:[%s1731_s5 + $0x24] sm:$0xf] %vm792_vm4, %v1028_v31 }
 0x399   :  { %v1032_v7 = vpack.c.bf16 %v868_v26, %v868_v26  ;;  %v1035_v44 = vpack.c.bf16 %v915_v41, %v915_v41 }
 0x39a   :  { %v908_v61 = vpop.permute.xlu1 %907 }
 0x39b   :  { %888 = vst.msk [vmem:[%s1731_s5 + $0x28] sm:$0xf] %vm737_vm3, %v1032_v7  ;;  %v916_v45 = vsub.f32 %v892_v63, %v908_v61 }
 0x39c   :  { %935 = vst.msk [vmem:[%s1731_s5 + $0x1c] sm:$0xf] %vm792_vm4, %v1035_v44 }
 0x39d   :  { %v1036_v19 = vpack.c.bf16 %v916_v45, %v916_v45 }
 0x39f   :  { %936 = vst.msk [vmem:[%s1731_s5 + $0x28] sm:$0xf] %vm792_vm4, %v1036_v19 }

// kernel: gpt_forward.10
= control target key start
LH: loop header
LB: loop body
LE: loop exit
PB: predicated region body
PF: predicated region fallthrough
CT: control target
= control target key end

     0   :  { %s1624_s12 = smov 0   ;;  %s1626_s13 = smov 0   ;;  %s1841_s0 = inlined_call_operand.vmem [shape: bf16[2,16,384], index: 0, kind: input, shape index: {}, may-alias: {0,1,2}]   ;;  %s1842_s1 = inlined_call_operand.vmem [shape: bf16[2,16,384], index: 1, kind: input, shape index: {}, may-alias: {0,1,2}]   ;;  %s1843_s2 = inlined_call_operand.vmem [shape: bf16[2,16,384], index: 2, kind: input, shape index: {}, may-alias: {0,1,2}]   ;;  %s1844_s3 = inlined_call_operand.vmem [shape: bf16[2,16,128], index: 3, kind: output, shape index: {}]  }
   0x1   :  { %s1628_s14 = smov 0   ;;  %s1630_s15 = smov 0  }
   0x2   :  { %s1632_s16 = smov 0  }
   0x3 LB: > { %s32_s17 = sadd.s32 1, %s1593_s15  ;;  %p48_p1 = scmp.ne.s32.totalorder %s1585_s13, %s1581_s12  ;;  %s1597_s16 = sphi %s1632_s16, %s13_s16   ;;  %s1593_s15 = sphi %s1630_s15, %s1849_s15   ;;  %s1589_s14 = sphi %s1628_s14, %s1848_s14   ;;  %s1585_s13 = sphi %s1626_s13, %s1847_s13   ;;  %s1581_s12 = sphi %s1624_s12, %s1846_s12  }
   0x4   : > { %p34_p0 = scmp.ge.s32.totalorder %s32_s17, 2  ;;  %p49_p2 = scmp.eq.s32.totalorder %s1597_s16, 0 }
   0x5   : > { %s41_s20 = sadd.s32 1, %s1585_s13  ;;  %p1400_p5 = scmp.ge.s32.totalorder %s1597_s16, 2 }
   0x6   : > { %s1851_s17 = smov (%p34_p0, %s32_s17), 0  ;;  %p1655_p3 = por %p49_p2, %p48_p1 }
   0x7   : > { %s36_s19 = ssub.s32 %s1593_s15, %s1851_s17  ;;  %158 = sbr.rel (%p1400_p5) target bundleno = 35 (0x23), region = 16 }
   0x8   : > { %p39_p4 = scmp.eq.s32.totalorder %s36_s19, 0 }
   0xa   : > { %s1663_s21 = scalar_select %p39_p4, %s1585_s13, %s41_s20  }
   0xe   : > { %161 = sbr.rel (!%p1655_p3) target bundleno = 21 (0x15), region = 20  ;;  %s163_s22 = sand.u32 (%p1655_p3), 1, %s1585_s13  }
   0xf   : > { %s1481_s23 = smul.u32 (%p1655_p3), 24, %s1593_s15  ;;  %s1401_s24 = sshll.u32 (%p1655_p3), %s163_s22, 3 }
  0x10   : > { %s165_s28 = scalar_lea.vmem (%p1655_p3), [#allocation5], %s1401_s24 }
  0x11   : > { %s171_s27 = scalar_lea.vmem (%p1655_p3), %s1841_s0, %s1481_s23 }
  0x12   : > { %v187_v0 = vld [vmem:[%s171_s27] sm:$0xf] (%p1655_p3)  ;;  %v189_v1 = vld [vmem:[%s171_s27 + $0xc] sm:$0xf] (%p1655_p3) }
  0x13   : > { %188 = vst [vmem:[%s165_s28] sm:$0xf] (%p1655_p3), %v187_v0  ;;  %190 = vst [vmem:[%s165_s28 + $0x4] sm:$0xf] (%p1655_p3), %v189_v1 }
  0x15 PF: > { %217 = sbr.rel (!%p1655_p3) target bundleno = 28 (0x1c), region = 61  ;;  %s219_s29 = sand.u32 (%p1655_p3), 1, %s1585_s13  }
  0x16   : > { %s1404_s30 = smul.u32 (%p1655_p3), 24, %s1593_s15  ;;  %s1403_s4 = sshll.u32 (%p1655_p3), %s219_s29, 3 }
  0x17   : > { %s221_s8 = scalar_lea.vmem (%p1655_p3), [#allocation6], %s1403_s4 }
  0x18   : > { %s1303_s7 = scalar_lea.vmem (%p1655_p3), %s1842_s1, %s1404_s30 }
  0x19   : > { %v1405_v2 = vld [vmem:[%s1303_s7 + $0x4] sm:$0xf] (%p1655_p3)  ;;  %v1406_v3 = vld [vmem:[%s1303_s7 + $0x10] sm:$0xf] (%p1655_p3) }
  0x1a   : > { %245 = vst [vmem:[%s221_s8] sm:$0xf] (%p1655_p3), %v1405_v2  ;;  %247 = vst [vmem:[%s221_s8 + $0x4] sm:$0xf] (%p1655_p3), %v1406_v3 }
  0x1c PF: > { %274 = sbr.rel (!%p1655_p3) target bundleno = 35 (0x23), region = 102  ;;  %s276_s9 = sand.u32 (%p1655_p3), 1, %s1585_s13  }
  0x1d   : > { %s1408_s10 = smul.u32 (%p1655_p3), 24, %s1593_s15  ;;  %s1407_s11 = sshll.u32 (%p1655_p3), %s276_s9, 3 }
  0x1e   : > { %s278_s23 = scalar_lea.vmem (%p1655_p3), [#allocation7], %s1407_s11 }
  0x1f   : > { %s1311_s22 = scalar_lea.vmem (%p1655_p3), %s1843_s2, %s1408_s10 }
  0x20   : > { %v1409_v4 = vld [vmem:[%s1311_s22 + $0x8] sm:$0xf] (%p1655_p3)  ;;  %v1410_v5 = vld [vmem:[%s1311_s22 + $0x14] sm:$0xf] (%p1655_p3) }
  0x21   : > { %302 = vst [vmem:[%s278_s23] sm:$0xf] (%p1655_p3), %v1409_v4  ;;  %304 = vst [vmem:[%s278_s23 + $0x4] sm:$0xf] (%p1655_p3), %v1410_v5 }
  0x23 PF: > { %p1411_p6 = scmp.ge.s32.totalorder %s1597_s16, 1  ;;  %p330_p7 = scmp.lt.s32.totalorder %s1597_s16, 3 }
  0x25   : > { %p331_p8 = pnand %p1411_p6, %p330_p7 }
  0x26   : > { %s337_s18 = sand.u32 (!%p331_p8), 1, %s1581_s12   ;;  %v1599_v6 = vmov (!%p331_p8), 0.0   ;;  %vm1600_vm0 = vmmov (!%p331_p8), 0   ;;  %vm828_vm1 = vcmask (!%p331_p8), 523264   ;;  %vm404_vm2 = vcmask (!%p331_p8), 7168   ;;  %s1603_s26 = smov (!%p331_p8), 64  }
  0x27   : > { %334 = sbr.rel (%p331_p8) target bundleno = 1445 (0x5a5), region = 143  ;;  %1457 = vmatprep.subr.bf16.mxu0 (!%p331_p8), %v1599_v6  ;;  %413 = vst [vmem:[#allocation2] sm:$0xff] (!%p331_p8), %v1599_v6  ;;  %414 = vst [vmem:[#allocation2 + $0x8] sm:$0xff] (!%p331_p8), %v1599_v6  ;;  %s1693_s24 = sshll.u32 (!%p331_p8), %s337_s18, 3  ;;  %1459 = vmatprep.mubr.msk.bf16.mxu0 (!%p331_p8), %vm1600_vm0, %v1599_v6  ;;  %v1601_v10 = vmov (!%p331_p8), -1e+30   ;;  %v807_v11 = vlaneseq (!%p331_p8) }
  0x28   : > { %1463 = vmatprep.subr.bf16.mxu1 (!%p331_p8), %v1599_v6  ;;  %1465 = vmatprep.mubr.msk.bf16.mxu1 (!%p331_p8), %vm1600_vm0, %v1599_v6  ;;  %s346_s12 = scalar_lea.vmem (!%p331_p8), [#allocation6], %s1693_s24  ;;  %s339_s25 = scalar_lea.vmem (!%p331_p8), [#allocation5], %s1693_s24  ;;  %405 = vst.msk [vmem:[#allocation3] sm:$0xff] (!%p331_p8), %vm404_vm2, %v1601_v10  ;;  %406 = vst.msk [vmem:[#allocation3 + $0x8] sm:$0xff] (!%p331_p8), %vm404_vm2, %v1601_v10  ;;  %vm882_vm4 = vcmask (!%p331_p8), 130048   ;;  %v1602_v25 = vmov (!%p331_p8), 0  }
  0x29   : > { %v1529_v7 = vld [vmem:[%s346_s12] sm:$0xff] (!%p331_p8)   ;;  %v1530_v9 = vld [vmem:[%s339_s25] sm:$0xff] (!%p331_p8)   ;;  %407 = vst.msk [vmem:[#allocation3 + $0x10] sm:$0xff] (!%p331_p8), %vm404_vm2, %v1601_v10  ;;  %408 = vst.msk [vmem:[#allocation3 + $0x18] sm:$0xff] (!%p331_p8), %vm404_vm2, %v1601_v10  ;;  %v1723_v12 = vshrl.u32 (!%p331_p8), %v807_v11, 7  ;;  %v1725_v13 = vand.u32 (!%p331_p8), 127, %v807_v11  ;;  %1527 = vset.pattern.permute.xlu1 (!%p331_p8), %v1602_v25  ;;  %1528 = vset.pattern.permute.xlu0 (!%p331_p8), %v1602_v25 }
  0x2a   : > { %v833_v8 = vsel (!%p331_p8), %vm828_vm1, %v1529_v7, 0  ;;  %409 = vst.msk [vmem:[#allocation4] sm:$0xff] (!%p331_p8), %vm404_vm2, %v1599_v6  ;;  %410 = vst.msk [vmem:[#allocation4 + $0x8] sm:$0xff] (!%p331_p8), %vm404_vm2, %v1599_v6  ;;  %v1531_v26 = vld [vmem:[%s346_s12] sm:$0xff] (!%p331_p8)   ;;  %v1532_v35 = vld [vmem:[%s339_s25] sm:$0xff] (!%p331_p8)   ;;  %s353_s27 = scalar_lea.vmem (!%p331_p8), [#allocation7], %s1693_s24 }
  0x2b   : > { %1458 = vmatpush3.bf16.xpose.msra.mxu0 (!%p331_p8), %v833_v8  ;;  %411 = vst.msk [vmem:[#allocation4 + $0x10] sm:$0xff] (!%p331_p8), %vm404_vm2, %v1599_v6  ;;  %412 = vst.msk [vmem:[#allocation4 + $0x18] sm:$0xff] (!%p331_p8), %vm404_vm2, %v1599_v6  ;;  %v1728_v14 = vadd.s32 (!%p331_p8), 8, %v1723_v12  ;;  %vm812_vm3 = vcmp.ge.s32.totalorder (!%p331_p8), %v1723_v12, %v1725_v13  ;;  %v1533_v36 = vld [vmem:[%s353_s27] sm:$0xff] (!%p331_p8)   ;;  %vm1199_vm6 = vcmask (!%p331_p8), 1048064   ;;  %p390_p9 = scmp.lt.s32.totalorder (!%p331_p8), %s1589_s14, 1 }
  0x2c   : > { %1475 = vmatprep.subr.bf16.mxu0 (!%p331_p8), %v1599_v6  ;;  %1464 = vmatpush3.bf16.msra.mxu1 (!%p331_p8), %v1533_v36 }
  0x2d   : > { %vm813_vm5 = vcmp.ge.s32.totalorder (!%p331_p8), %v1728_v14, %v1725_v13  ;;  %1469 = vmatprep.subr.bf16.mxu1 (!%p331_p8), %v1599_v6 }
  0x2e   : > { %s1853_s14 = smov (!%p390_p9, %s1589_s14), 1 }
  0x2f   : > { %v1745_v27 = vld [vmem:[#allocation3] sm:$0xff]  ;;  %v1750_v30 = vld [vmem:[#allocation3 + $0x8] sm:$0xff]  ;;  %s1441_s28 = sshll.u32 %s1853_s14, 3 }
  0x30   : > { %v1071_v63 = vld [vmem:[#allocation3 + $0x10] sm:$0xff]  ;;  %v1072_v1 = vld [vmem:[#allocation3 + $0x18] sm:$0xff]  ;;  %s397_s4 = scalar_lea.vmem %s1844_s3, %s1441_s28 }
  0x32   : > { %1460 = vmatmul.mubr.msk.bf16.vlgmr.msra.gmra.mrb[0].mxu0 %vm828_vm1, %v1530_v9 }
  0x33   : > { %1477 = vmatprep.mubr.msk.bf16.mxu0 %vm1600_vm0, %v1599_v6 }
 0x105   : > { %v869_v15 = vpop.f32.mrb[0].mxu0 }
 0x106   : > { %v876_v16 = vmul.f32 0.125, %v869_v15  ;;  %v1461_v17 = vpop.f32.mrb[1].mxu0 }
 0x107   : > { %v872_v18 = vpop.f32.mrb[2].mxu0 }
 0x108   : > { %v877_v19 = vmul.f32 0.125, %v872_v18  ;;  %v1462_v20 = vpop.f32.mrb[3].mxu0  ;;  %v878_v21 = vsel %vm812_vm3, %v876_v16, -1e+30 }
 0x109   : > { %v883_v22 = vsel %vm882_vm4, %v878_v21, -inf }
 0x10a   : > { %884 = vmax.xlane.f32.xlu0 %v883_v22  ;;  %v879_v23 = vsel %vm813_vm5, %v877_v19, -1e+30 }
 0x10b   : > { %v886_v24 = vsel %vm882_vm4, %v879_v23, -inf }
 0x10e   : > { %887 = vmax.xlane.f32.xlu0 %v886_v24 }
 0x124   : > { %1017 = vrot.lane.b32.xlu0 %v1531_v26, %s1603_s26 }
 0x197   : > { %v885_v28 = vpop.xlane.xlu0 %884 }
 0x198   : > { %v1748_v29 = vmax.f32 %v1745_v27, %v885_v28 }
 0x19a   : > { %v891_v31 = vsub.f32 %v1745_v27, %v1748_v29  ;;  %928 = vst.msk [vmem:[#allocation3] sm:$0xff] %vm404_vm2, %v1748_v29  ;;  %899 = vperm.xlu1 %1527, %v1748_v29   ;;  %v913_v27 = vld [vmem:[#allocation4] sm:$0xff] }
 0x19b   : > { %v888_v32 = vpop.xlane.xlu0 %887 }
 0x19c   : > { %v1758_v33 = vmax.f32 %v1750_v30, %v888_v32  ;;  %v893_v24 = vmul.f32 1.442695, %v891_v31 }
 0x19e   : > { %v892_v34 = vsub.f32 %v1750_v30, %v1758_v33  ;;  %929 = vst.msk [vmem:[#allocation3 + $0x8] sm:$0xff] %vm404_vm2, %v1758_v33  ;;  %904 = vperm.xlu1 %1527, %v1758_v33  }
 0x19f   : > { %v1018_v43 = vpop.permute.xlu0 %1017 }
 0x1a0   : > { %v1023_v46 = vsel %vm828_vm1, %v1018_v43, 0  ;;  %v895_v25 = vmul.f32 1.442695, %v892_v34  ;;  %v1105_v43 = vld [vmem:[#allocation4 + $0x18] sm:$0xff] }
 0x1a2   : > { %1010 = vrot.lane.b32.xlu1 %v1532_v35, %s1603_s26  ;;  %v914_v35 = vld [vmem:[#allocation4 + $0x8] sm:$0xff] }
 0x219   : > { %v900_v37 = vpop.permute.xlu1 %899 }
 0x21a   : > { %v907_v38 = vsub.f32 %v878_v21, %v900_v37 }
 0x21c   : > { %v909_v39 = vmul.f32 1.442695, %v907_v38 }
 0x21d   : > { %v905_v40 = vpop.permute.xlu1 %904 }
 0x21e   : > { %v908_v41 = vsub.f32 %v879_v23, %v905_v40  ;;  %1535 = vpow2.f32 %v909_v39  ;;  %v1104_v40 = vld [vmem:[#allocation4 + $0x10] sm:$0xff] }
 0x220   : > { %v911_v42 = vmul.f32 1.442695, %v908_v41 }
 0x221   : > { %v1011_v48 = vpop.permute.xlu1 %1010 }
 0x222   : > { %1537 = vpow2.f32 %v911_v42 }
 0x228   : > { %v1536_v44 = vpop.eup %1535 }
 0x229   : > { %v917_v9 = vsel %vm882_vm4, %v1536_v44, 0.0 }
 0x22c   : > { %v1538_v45 = vpop.eup %1537 }
 0x22d   : > { %v930_v47 = vpack.c.bf16 %v1538_v45, %v1536_v44  ;;  %v920_v7 = vsel %vm882_vm4, %v1538_v45, 0.0 }
 0x22f   : > { %1466 = vmatmul.mubr.msk.bf16.vlgmr.msra.gmra.mrb[0].mxu1 %vm882_vm4, %v930_v47 }
 0x230   : > { %1470 = vmatpush3.bf16.xpose.msra.mxu1 %v1023_v46  ;;  %1471 = vmatprep.mubr.msk.bf16.mxu1 %vm1600_vm0, %v1599_v6  ;;  %v1534_v6 = vld [vmem:[%s353_s27] sm:$0xff]  }
 0x237   : > { %1472 = vmatmul.mubr.msk.bf16.vlgmr.msra.gmra.mrb[4].mxu1 %vm828_vm1, %v1011_v48 }
 0x302   : > { %v1777_v49 = vpop.f32.mrb[0].mxu1 }
 0x303   : > { %v1467_v50 = vpop.f32.mrb[1].mxu1 }
 0x304   : > { %v1779_v51 = vpop.f32.mrb[2].mxu1 }
 0x305   : > { %v1468_v52 = vpop.f32.mrb[3].mxu1 }
 0x30a   : > { %v1059_v53 = vpop.f32.mrb[4].mxu1 }
 0x30b   : > { %v1066_v54 = vmul.f32 0.125, %v1059_v53  ;;  %v1473_v55 = vpop.f32.mrb[5].mxu1 }
 0x30c   : > { %v1062_v56 = vpop.f32.mrb[6].mxu1 }
 0x30d   : > { %v1067_v57 = vmul.f32 0.125, %v1062_v56  ;;  %v1474_v58 = vpop.f32.mrb[7].mxu1  ;;  %v1068_v59 = vsel %vm812_vm3, %v1066_v54, -1e+30 }
 0x30e   : > { %v1073_v60 = vsel %vm882_vm4, %v1068_v59, -inf }
 0x30f   : > { %1074 = vmax.xlane.f32.xlu1 %v1073_v60  ;;  %v1069_v61 = vsel %vm813_vm5, %v1067_v57, -1e+30 }
 0x310   : > { %v1076_v62 = vsel %vm882_vm4, %v1069_v61, -inf }
 0x311   : > { %1077 = vmax.xlane.f32.xlu0 %v1076_v62 }
 0x39c   : > { %v1075_v0 = vpop.xlane.xlu1 %1074 }
 0x39d   : > { %v1079_v2 = vmax.f32 %v1071_v63, %v1075_v0 }
 0x39e   : > { %v1078_v3 = vpop.xlane.xlu0 %1077 }
 0x39f   : > { %v1081_v4 = vsub.f32 %v1071_v63, %v1079_v2  ;;  %1118 = vst.msk [vmem:[#allocation3 + $0x10] sm:$0xff] %vm404_vm2, %v1079_v2  ;;  %v1080_v5 = vmax.f32 %v1072_v1, %v1078_v3  ;;  %1089 = vperm.xlu1 %1527, %v1079_v2  }
 0x3a1   : > { %1119 = vst.msk [vmem:[#allocation3 + $0x18] sm:$0xff] %vm404_vm2, %v1080_v5  ;;  %1094 = vperm.xlu0 %1528, %v1080_v5   ;;  %v1082_v8 = vsub.f32 %v1072_v1, %v1080_v5  ;;  %v1083_v26 = vmul.f32 1.442695, %v1081_v4 }
 0x3a3   : > { %1128 = vrot.lane.b32.xlu1 %v1534_v6, %s1603_s26  ;;  %v1085_v10 = vmul.f32 1.442695, %v1082_v8 }
 0x3a5   : > { %1539 = vpow2.f32 %v1085_v10 }
 0x3af   : > { %v1540_v11 = vpop.eup %1539 }
 0x3b0   : > { %v1107_v45 = vmul.f32 %v1540_v11, %v1105_v43 }
 0x3c0   : > { %921 = vadd.xlane.f32.xlu0 %v920_v7 }
 0x3c7   : > { %918 = vadd.xlane.f32.xlu1 %v917_v9 }
 0x3d6   : > { %1184 = vperm.xlu0 %1528, %v1540_v11  }
 0x41e   : > { %v1090_v12 = vpop.permute.xlu1 %1089 }
 0x41f   : > { %v1097_v13 = vsub.f32 %v1068_v59, %v1090_v12 }
 0x420   : > { %v1095_v14 = vpop.permute.xlu0 %1094 }
 0x421   : > { %v1099_v15 = vmul.f32 1.442695, %v1097_v13  ;;  %v1098_v16 = vsub.f32 %v1069_v61, %v1095_v14 }
 0x422   : > { %v1129_v17 = vpop.permute.xlu1 %1128 }
 0x423   : > { %1541 = vpow2.f32 %v1099_v15  ;;  %v1101_v18 = vmul.f32 1.442695, %v1098_v16  ;;  %1476 = vmatpush3.bf16.msra.mxu0 %v1129_v17 }
 0x425   : > { %1543 = vpow2.f32 %v1101_v18 }
 0x426   : > { %1545 = vpow2.f32 %v893_v24 }
 0x427   : > { %1547 = vpow2.f32 %v895_v25 }
 0x428   : > { %1549 = vpow2.f32 %v1083_v26 }
 0x42d   : > { %v1542_v19 = vpop.eup %1541 }
 0x42e   : > { %v1108_v20 = vsel %vm882_vm4, %v1542_v19, 0.0 }
 0x42f   : > { %v1544_v21 = vpop.eup %1543  ;;  %1109 = vadd.xlane.f32.xlu1 %v1108_v20 }
 0x430   : > { %v1120_v22 = vpack.c.bf16 %v1544_v21, %v1542_v19  ;;  %v1111_v23 = vsel %vm882_vm4, %v1544_v21, 0.0  ;;  %v1546_v28 = vpop.eup %1545 }
 0x431   : > { %v1548_v32 = vpop.eup %1547  ;;  %v915_v29 = vmul.f32 %v1546_v28, %v913_v27 }
 0x432   : > { %1478 = vmatmul.mubr.msk.bf16.vlgmr.msra.gmra.mrb[4].mxu0 %vm882_vm4, %v1120_v22  ;;  %v1550_v36 = vpop.eup %1549  ;;  %v916_v37 = vmul.f32 %v1548_v32, %v914_v35 }
 0x433   : > { %1112 = vadd.xlane.f32.xlu1 %v1111_v23  ;;  %v1106_v41 = vmul.f32 %v1550_v36, %v1104_v40 }
 0x444   : > { %987 = vperm.xlu1 %1527, %v1546_v28  }
 0x448   : > { %992 = vperm.xlu1 %1527, %v1548_v32  }
 0x44c   : > { %1179 = vperm.xlu1 %1527, %v1550_v36  }
 0x44d   : > { %v922_v38 = vpop.xlane.xlu0 %921 }
 0x44e   : > { %v924_v39 = vadd.f32 %v922_v38, %v916_v37 }
 0x450   : > { %927 = vst.msk [vmem:[#allocation4 + $0x8] sm:$0xff] %vm404_vm2, %v924_v39 }
 0x454   : > { %v919_v31 = vpop.xlane.xlu1 %918 }
 0x455   : > { %v923_v30 = vadd.f32 %v919_v31, %v915_v29  ;;  %v1185_v7 = vpop.permute.xlu0 %1184 }
 0x457   : > { %926 = vst.msk [vmem:[#allocation4] sm:$0xff] %vm404_vm2, %v923_v30  ;;  %v1208_v58 = vld [vmem:[#allocation4 + $0x8] sm:$0xff] }
 0x45e   : > { %v1207_v33 = vld [vmem:[#allocation4] sm:$0xff] }
 0x45f   : > { %1551 = vrcp.f32 %v1207_v33 }
 0x469   : > { %v1552_v34 = vpop.eup %1551 }
 0x46a   : > { %1213 = vperm.xlu1 %1527, %v1552_v34  }
 0x4bc   : > { %v1110_v42 = vpop.xlane.xlu1 %1109 }
 0x4bd   : > { %v1114_v44 = vadd.f32 %v1110_v42, %v1106_v41 }
 0x4bf   : > { %1116 = vst.msk [vmem:[#allocation4 + $0x10] sm:$0xff] %vm404_vm2, %v1114_v44 }
 0x4c0   : > { %v1113_v46 = vpop.xlane.xlu1 %1112 }
 0x4c1   : > { %v1115_v47 = vadd.f32 %v1113_v46, %v1107_v45 }
 0x4c3   : > { %1117 = vst.msk [vmem:[#allocation4 + $0x18] sm:$0xff] %vm404_vm2, %v1115_v47 }
 0x4c4   : > { %v988_v48 = vpop.permute.xlu1 %987 }
 0x4c5   : > { %v995_v50 = vmul.f32 0.0, %v988_v48 }
 0x4c6   : > { %v1229_v59 = vld [vmem:[#allocation4 + $0x10] sm:$0xff] }
 0x4c7   : > { %v997_v52 = vadd.f32 %v995_v50, %v1777_v49 }
 0x4c8   : > { %v993_v53 = vpop.permute.xlu1 %992 }
 0x4c9   : > { %999 = vst.msk [vmem:[#allocation2] sm:$0xff] %vm828_vm1, %v997_v52  ;;  %v996_v54 = vmul.f32 0.0, %v993_v53 }
 0x4ca   : > { %v1230_v55 = vld [vmem:[#allocation4 + $0x18] sm:$0xff] }
 0x4cb   : > { %v998_v56 = vadd.f32 %v996_v54, %v1779_v51  ;;  %1553 = vrcp.f32 %v1230_v55 }
 0x4cc   : > { %1555 = vrcp.f32 %v1208_v58  ;;  %v1180_v0 = vpop.permute.xlu1 %1179 }
 0x4cd   : > { %1000 = vst.msk [vmem:[#allocation2 + $0x8] sm:$0xff] %vm828_vm1, %v998_v56  ;;  %1557 = vrcp.f32 %v1229_v59 }
 0x4d0   : > { %v1175_v1 = vld [vmem:[#allocation2] sm:$0xff] }
 0x4d1   : > { %v1187_v3 = vmul.f32 %v1180_v0, %v1175_v1 }
 0x4d4   : > { %v1176_v5 = vld [vmem:[#allocation2 + $0x8] sm:$0xff] }
 0x4d5   : > { %v1554_v57 = vpop.eup %1553  ;;  %v1188_v8 = vmul.f32 %v1185_v7, %v1176_v5 }
 0x4d6   : > { %1240 = vperm.xlu0 %1528, %v1554_v57   ;;  %v1556_v63 = vpop.eup %1555 }
 0x4d7   : > { %v1558_v51 = vpop.eup %1557 }
 0x4e9   : > { %v1214_v2 = vpop.permute.xlu1 %1213 }
 0x505   : > { %v1168_v60 = vpop.f32.mrb[4].mxu0 }
 0x506   : > { %1191 = vrot.lane.b32.xlu1 %v1168_v60, %s1603_s26  ;;  %v1479_v61 = vpop.f32.mrb[5].mxu0 }
 0x507   : > { %v1171_v49 = vpop.f32.mrb[6].mxu0 }
 0x508   : > { %v1480_v62 = vpop.f32.mrb[7].mxu0 }
 0x50a   : > { %1193 = vrot.lane.b32.xlu1 %v1171_v49, %s1603_s26 }
 0x50e   : > { %1218 = vperm.xlu1 %1527, %v1556_v63  }
 0x512   : > { %1235 = vperm.xlu1 %1527, %v1558_v51  }
 0x555   : > { %v1241_v19 = vpop.permute.xlu0 %1240 }
 0x578   : > { %v1192_v4 = vpop.permute.xlu1 %1191 }
 0x579   : > { %v1197_v6 = vadd.f32 %v1192_v4, %v1187_v3 }
 0x57b   : > { %1200 = vst.msk [vmem:[#allocation2] sm:$0xff] %vm1199_vm6, %v1197_v6 }
 0x57c   : > { %v1194_v9 = vpop.permute.xlu1 %1193 }
 0x57d   : > { %v1198_v10 = vadd.f32 %v1194_v9, %v1188_v8 }
 0x57f   : > { %1201 = vst.msk [vmem:[#allocation2 + $0x8] sm:$0xff] %vm1199_vm6, %v1198_v10 }
 0x582   : > { %v1205_v11 = vld [vmem:[#allocation2] sm:$0xff] }
 0x583   : > { %v1221_v12 = vmul.f32 %v1214_v2, %v1205_v11 }
 0x585   : > { %1224 = vst.msk [vmem:[#allocation2] sm:$0xff] %vm828_vm1, %v1221_v12 }
 0x586   : > { %v1206_v13 = vld [vmem:[#allocation2 + $0x8] sm:$0xff] }
 0x58c   : > { %v1226_v16 = vld [vmem:[#allocation2] sm:$0xff] }
 0x58d   : > { %v1219_v14 = vpop.permute.xlu1 %1218 }
 0x58e   : > { %v1222_v15 = vmul.f32 %v1219_v14, %v1206_v13 }
 0x590   : > { %1225 = vst.msk [vmem:[#allocation2 + $0x8] sm:$0xff] %vm828_vm1, %v1222_v15 }
 0x591   : > { %v1236_v17 = vpop.permute.xlu1 %1235 }
 0x592   : > { %v1243_v18 = vmul.f32 %v1236_v17, %v1226_v16 }
 0x594   : > { %1246 = vst.msk [vmem:[#allocation2] sm:$0xff] %vm1199_vm6, %v1243_v18 }
 0x597   : > { %v1227_v20 = vld [vmem:[#allocation2 + $0x8] sm:$0xff] }
 0x598   : > { %v1244_v21 = vmul.f32 %v1241_v19, %v1227_v20 }
 0x59a   : > { %1247 = vst.msk [vmem:[#allocation2 + $0x8] sm:$0xff] %vm1199_vm6, %v1244_v21 }
 0x59b   : > { %v1248_v23 = vld [vmem:[#allocation2] sm:$0xff] }
 0x5a1   : > { %v1249_v22 = vld [vmem:[#allocation2 + $0x8] sm:$0xff] }
 0x5a2   : > { %v1447_v24 = vpack.c.bf16 %v1249_v22, %v1248_v23 }
 0x5a4   : > { %1448 = vst [vmem:[%s397_s4] sm:$0xff] %v1447_v24  }
 0x5a5 PF: > { %s13_s16 = sadd.s32 1, %s1597_s16   ;;  %s1846_s12 = smov %s1585_s13 }
 0x5a6   : > { %p10_p10 = scmp.ge.s32.totalorder %s13_s16, 4   ;;  %s1847_s13 = smov %s1663_s21 }
 0x5a7   : > { %s1848_s14 = smov %s1593_s15  ;;  %s1849_s15 = smov %s1851_s17 }
 0x5a8   :  { %12 = sbr.rel (!%p10_p10) target bundleno = 3 (0x3), region = 227 }

// kernel: gpt_forward.17
= control target key start
LH: loop header
LB: loop body
LE: loop exit
PB: predicated region body
PF: predicated region fallthrough
CT: control target
= control target key end

     0   :  { %v462_v38 = vmov 0   ;;  %s654_s0 = inlined_call_operand.vmem [shape: f32[32,128], index: 0, kind: input, shape index: {}]   ;;  %s655_s1 = inlined_call_operand.vmem [shape: bf16[128,512], index: 1, kind: input, shape index: {}]   ;;  %s656_s2 = inlined_call_operand.vmem [shape: f32[32,512], index: 2, kind: output, shape index: {}]  }
   0x1   :  { %v481_v0 = vld [vmem:[%s654_s0] sm:$0xff]  ;;  %v486_v1 = vld [vmem:[%s654_s0 + $0x10] sm:$0xff]  ;;  %v491_v2 = vld [vmem:[%s654_s0 + $0x8] sm:$0xff]  ;;  %279 = vmatprep.mubr.bf16.mxu0 %v462_v38  ;;  %332 = vmatprep.mubr.bf16.mxu1 %v462_v38 }
   0x2   :  { %v20_v3 = vmul.f32 %v481_v0, %v481_v0  ;;  %v22_v4 = vmul.f32 %v486_v1, %v486_v1  ;;  %v500_v5 = vld [vmem:[%s654_s0 + $0x18] sm:$0xff]  ;;  %v406_v6 = vld [vmem:[%s655_s1 + $0x4] ss:$16 sps:$4 sm:$0xff]   ;;  %v21_v7 = vmul.f32 %v491_v2, %v491_v2  ;;  %v410_v10 = vld [vmem:[%s655_s1] ss:$16 sps:$4 sm:$0xff]  }
   0x3   :  { %v23_v8 = vmul.f32 %v500_v5, %v500_v5  ;;  %v408_v9 = vld [vmem:[%s655_s1 + $0xc] ss:$16 sps:$4 sm:$0xff]   ;;  %v411_v11 = vld [vmem:[%s655_s1 + $0x8] ss:$16 sps:$4 sm:$0xff]   ;;  %247 = vmatprep.subr.bf16.mxu0 %v406_v6  ;;  %v412_v12 = vld [vmem:[%s655_s1 + $0x24] ss:$16 sps:$4 sm:$0xff]  }
   0x4   :  { %24 = vadd.xlane.f32.xlu0 %v20_v3  ;;  %28 = vadd.xlane.f32.xlu1 %v22_v4  ;;  %v414_v13 = vld [vmem:[%s655_s1 + $0x2c] ss:$16 sps:$4 sm:$0xff]   ;;  %v416_v14 = vld [vmem:[%s655_s1 + $0x20] ss:$16 sps:$4 sm:$0xff]   ;;  %v417_v15 = vld [vmem:[%s655_s1 + $0x28] ss:$16 sps:$4 sm:$0xff]  }
   0x5   :  { %300 = vmatprep.subr.bf16.mxu1 %v408_v9  ;;  %248 = vmatpush1.bf16.msra.mxu0 %v410_v10  ;;  %v418_v16 = vld [vmem:[%s655_s1 + $0x44] ss:$16 sps:$4 sm:$0xff]   ;;  %v420_v17 = vld [vmem:[%s655_s1 + $0x4c] ss:$16 sps:$4 sm:$0xff]   ;;  %v422_v18 = vld [vmem:[%s655_s1 + $0x40] ss:$16 sps:$4 sm:$0xff]  }
   0x6   :  { %301 = vmatpush1.bf16.msra.mxu1 %v411_v11  ;;  %249 = vmatprep.subr.bf16.mxu0 %v412_v12  ;;  %v423_v19 = vld [vmem:[%s655_s1 + $0x48] ss:$16 sps:$4 sm:$0xff]   ;;  %v424_v20 = vld [vmem:[%s655_s1 + $0x64] ss:$16 sps:$4 sm:$0xff]   ;;  %v426_v21 = vld [vmem:[%s655_s1 + $0x6c] ss:$16 sps:$4 sm:$0xff]  }
   0x7   :  { %302 = vmatprep.subr.bf16.mxu1 %v414_v13  ;;  %v428_v22 = vld [vmem:[%s655_s1 + $0x60] ss:$16 sps:$4 sm:$0xff]   ;;  %v429_v23 = vld [vmem:[%s655_s1 + $0x68] ss:$16 sps:$4 sm:$0xff]   ;;  %v430_v24 = vld [vmem:[%s655_s1 + $0x84] ss:$16 sps:$4 sm:$0xff]  }
   0x8   :  { %26 = vadd.xlane.f32.xlu0 %v21_v7  ;;  %30 = vadd.xlane.f32.xlu1 %v23_v8  ;;  %v432_v25 = vld [vmem:[%s655_s1 + $0x8c] ss:$16 sps:$4 sm:$0xff]   ;;  %v434_v26 = vld [vmem:[%s655_s1 + $0x80] ss:$16 sps:$4 sm:$0xff]   ;;  %v435_v27 = vld [vmem:[%s655_s1 + $0x88] ss:$16 sps:$4 sm:$0xff]  }
   0x9   :  { %250 = vmatpush1.bf16.msra.mxu0 %v416_v14  ;;  %v436_v28 = vld [vmem:[%s655_s1 + $0xa4] ss:$16 sps:$4 sm:$0xff]   ;;  %v438_v29 = vld [vmem:[%s655_s1 + $0xac] ss:$16 sps:$4 sm:$0xff]   ;;  %v440_v30 = vld [vmem:[%s655_s1 + $0xa0] ss:$16 sps:$4 sm:$0xff]  }
   0xa   :  { %303 = vmatpush1.bf16.msra.mxu1 %v417_v15  ;;  %251 = vmatprep.subr.bf16.mxu0 %v418_v16  ;;  %v441_v31 = vld [vmem:[%s655_s1 + $0xa8] ss:$16 sps:$4 sm:$0xff]   ;;  %v442_v32 = vld [vmem:[%s655_s1 + $0xc4] ss:$16 sps:$4 sm:$0xff]   ;;  %v444_v33 = vld [vmem:[%s655_s1 + $0xcc] ss:$16 sps:$4 sm:$0xff]  }
   0xb   :  { %304 = vmatprep.subr.bf16.mxu1 %v420_v17  ;;  %v446_v34 = vld [vmem:[%s655_s1 + $0xc0] ss:$16 sps:$4 sm:$0xff]   ;;  %v447_v35 = vld [vmem:[%s655_s1 + $0xc8] ss:$16 sps:$4 sm:$0xff]   ;;  %v448_v36 = vld [vmem:[%s655_s1 + $0xe4] ss:$16 sps:$4 sm:$0xff]  }
   0xc   :  { %v450_v37 = vld [vmem:[%s655_s1 + $0xec] ss:$16 sps:$4 sm:$0xff]   ;;  %v452_v39 = vld [vmem:[%s655_s1 + $0xe0] ss:$16 sps:$4 sm:$0xff]   ;;  %v453_v40 = vld [vmem:[%s655_s1 + $0xe8] ss:$16 sps:$4 sm:$0xff]  }
   0xd   :  { %252 = vmatpush1.bf16.msra.mxu0 %v422_v18 }
   0xe   :  { %305 = vmatpush1.bf16.msra.mxu1 %v423_v19  ;;  %253 = vmatprep.subr.bf16.mxu0 %v424_v20 }
   0xf   :  { %306 = vmatprep.subr.bf16.mxu1 %v426_v21 }
  0x11   :  { %254 = vmatpush1.bf16.msra.mxu0 %v428_v22 }
  0x12   :  { %307 = vmatpush1.bf16.msra.mxu1 %v429_v23  ;;  %255 = vmatprep.subr.bf16.mxu0 %v430_v24 }
  0x13   :  { %308 = vmatprep.subr.bf16.mxu1 %v432_v25 }
  0x15   :  { %256 = vmatpush1.bf16.msra.mxu0 %v434_v26 }
  0x16   :  { %309 = vmatpush1.bf16.msra.mxu1 %v435_v27  ;;  %257 = vmatprep.subr.bf16.mxu0 %v436_v28 }
  0x17   :  { %310 = vmatprep.subr.bf16.mxu1 %v438_v29 }
  0x19   :  { %258 = vmatpush1.bf16.msra.mxu0 %v440_v30 }
  0x1a   :  { %311 = vmatpush1.bf16.msra.mxu1 %v441_v31  ;;  %259 = vmatprep.subr.bf16.mxu0 %v442_v32 }
  0x1b   :  { %312 = vmatprep.subr.bf16.mxu1 %v444_v33 }
  0x1d   :  { %260 = vmatpush1.bf16.msra.mxu0 %v446_v34 }
  0x1e   :  { %313 = vmatpush1.bf16.msra.mxu1 %v447_v35  ;;  %261 = vmatprep.subr.bf16.mxu0 %v448_v36 }
  0x1f   :  { %314 = vmatprep.subr.bf16.mxu1 %v450_v37 }
  0x21   :  { %262 = vmatpush1.bf16.msra.mxu0 %v452_v39 }
  0x22   :  { %315 = vmatpush1.bf16.msra.mxu1 %v453_v40 }
  0x91   :  { %v25_v41 = vpop.xlane.xlu0 %24  ;;  %v29_v42 = vpop.xlane.xlu1 %28 }
  0x92   :  { %v33_v43 = vmul.f32 0.0078125, %v25_v41  ;;  %v35_v45 = vmul.f32 0.0078125, %v29_v42 }
  0x94   :  { %v37_v44 = vadd.f32 1.1920929e-07, %v33_v43  ;;  %v39_v51 = vadd.f32 1.1920929e-07, %v35_v45 }
  0x95   :  { %v27_v46 = vpop.xlane.xlu0 %26  ;;  %v31_v47 = vpop.xlane.xlu1 %30 }
  0x96   :  { %v34_v48 = vmul.f32 0.0078125, %v27_v46  ;;  %v36_v49 = vmul.f32 0.0078125, %v31_v47  ;;  %454 = vrsqrt.f32 %v37_v44 }
  0x98   :  { %v38_v50 = vadd.f32 1.1920929e-07, %v34_v48  ;;  %v40_v52 = vadd.f32 1.1920929e-07, %v36_v49 }
  0x9a   :  { %456 = vrsqrt.f32 %v38_v50 }
  0x9b   :  { %458 = vrsqrt.f32 %v39_v51 }
  0x9c   :  { %460 = vrsqrt.f32 %v40_v52 }
  0xa0   :  { %v455_v53 = vpop.eup %454 }
  0xa1   :  { %v45_v55 = vmul.f32 %v455_v53, %v481_v0 }
  0xa4   :  { %v457_v54 = vpop.eup %456 }
  0xa5   :  { %v46_v56 = vmul.f32 %v457_v54, %v491_v2  ;;  %v459_v57 = vpop.eup %458 }
  0xa6   :  { %v461_v59 = vpop.eup %460  ;;  %v47_v60 = vmul.f32 %v459_v57, %v486_v1 }
  0xa7   :  { %v49_v58 = vpack.c.bf16 %v46_v56, %v45_v55  ;;  %v48_v61 = vmul.f32 %v461_v59, %v500_v5 }
  0xa9   :  { %280 = vmatmul.mubr.bf16.vlgmr.msra.gmra.mrb[0].mxu0 %v49_v58  ;;  %333 = vmatmul.mubr.bf16.vlgmr.msra.gmra.mrb[0].mxu1 %v49_v58  ;;  %v50_v62 = vpack.c.bf16 %v48_v61, %v47_v60 }
  0xaa   :  { %289 = vmatprep.mubr.bf16.mxu0 %v462_v38  ;;  %342 = vmatprep.mubr.bf16.mxu1 %v462_v38 }
  0xb1   :  { %290 = vmatmul.mubr.bf16.gmra.mrb[4].mxu0 %v50_v62  ;;  %343 = vmatmul.mubr.bf16.gmra.mrb[4].mxu1 %v50_v62 }
 0x17c   :  { %v281_v63 = vpop.f32.mrb[0].mxu0  ;;  %v334_v3 = vpop.f32.mrb[0].mxu1 }
 0x17d   :  { %353 = vst [vmem:[%s656_s2] sm:$0xff] %v281_v63  ;;  %355 = vst [vmem:[%s656_s2 + $0x10] sm:$0xff] %v334_v3  ;;  %v283_v0 = vpop.f32.mrb[1].mxu0  ;;  %v336_v2 = vpop.f32.mrb[1].mxu1 }
 0x17e   :  { %354 = vst [vmem:[%s656_s2 + $0x8] sm:$0xff] %v283_v0  ;;  %356 = vst [vmem:[%s656_s2 + $0x18] sm:$0xff] %v336_v2  ;;  %v285_v1 = vpop.f32.mrb[2].mxu0  ;;  %v338_v4 = vpop.f32.mrb[2].mxu1 }
 0x17f   :  { %357 = vst [vmem:[%s656_s2 + $0x20] sm:$0xff] %v285_v1  ;;  %359 = vst [vmem:[%s656_s2 + $0x30] sm:$0xff] %v338_v4  ;;  %v287_v5 = vpop.f32.mrb[3].mxu0  ;;  %v340_v6 = vpop.f32.mrb[3].mxu1 }
 0x180   :  { %358 = vst [vmem:[%s656_s2 + $0x28] sm:$0xff] %v287_v5  ;;  %360 = vst [vmem:[%s656_s2 + $0x38] sm:$0xff] %v340_v6 }
 0x184   :  { %v291_v7 = vpop.f32.mrb[4].mxu0  ;;  %v344_v8 = vpop.f32.mrb[4].mxu1 }
 0x185   :  { %361 = vst [vmem:[%s656_s2 + $0x40] sm:$0xff] %v291_v7  ;;  %363 = vst [vmem:[%s656_s2 + $0x50] sm:$0xff] %v344_v8  ;;  %v293_v9 = vpop.f32.mrb[5].mxu0  ;;  %v346_v10 = vpop.f32.mrb[5].mxu1 }
 0x186   :  { %362 = vst [vmem:[%s656_s2 + $0x48] sm:$0xff] %v293_v9  ;;  %364 = vst [vmem:[%s656_s2 + $0x58] sm:$0xff] %v346_v10  ;;  %v295_v11 = vpop.f32.mrb[6].mxu0  ;;  %v348_v12 = vpop.f32.mrb[6].mxu1 }
 0x187   :  { %365 = vst [vmem:[%s656_s2 + $0x60] sm:$0xff] %v295_v11  ;;  %367 = vst [vmem:[%s656_s2 + $0x70] sm:$0xff] %v348_v12  ;;  %v297_v13 = vpop.f32.mrb[7].mxu0  ;;  %v350_v14 = vpop.f32.mrb[7].mxu1 }
 0x188   :  { %366 = vst [vmem:[%s656_s2 + $0x68] sm:$0xff] %v297_v13  ;;  %368 = vst [vmem:[%s656_s2 + $0x78] sm:$0xff] %v350_v14 }

</bundles_post_ra>
